<compile_context>
chip_gen: v5e
topology: v5e:2x2
jax: 0.10.0
libtpu: 0.0.40
codegen_flags: <defaults>
</compile_context>

<pallas_src>
import math

import jax
import jax.numpy as jnp
from jax.experimental import pallas as pl
from jax.experimental.pallas import tpu as pltpu

HIDDEN = 256
LANES = 128


def _round_up(x, m):
    return (x + m - 1) // m * m


def _num_tensorcores():
    """v7x packs 2 TensorCores per chip; v5e/v6e have 1."""
    try:
        kind = jax.devices()[0].device_kind.lower()
    except Exception:
        return 1
    return 2 if "v7" in kind else 1


def _choose_block_b(B, n_tc):
    """One tile per TensorCore when possible, capped for VMEM safety.

    Per-row VMEM footprint is ~5.5 KiB (x/out tiles double-buffered + f32
    h1/h2 + bf16 casts), so cap at 2048 rows on v7x (64 MiB VMEM) and 4096 on
    v5e/v6e (128 MiB VMEM)."""
    max_block = 2048 if n_tc == 2 else 4096
    bb = _round_up(max(pl.cdiv(_round_up(B, 16), n_tc), 16), 16)
    return min(bb, max_block)


def actor_kernel(x_ref, w1_ref, b1_ref, w2_ref, b2_ref, w3_ref, b3_ref, o_ref):
    # In-kernel bf16 cast of x (hidden under DMA/MXU); f32 accumulation.
    x = x_ref[...].astype(jnp.bfloat16)                               # [tb, obs_pad]
    h1 = jnp.dot(x, w1_ref[...], preferred_element_type=jnp.float32) + b1_ref[...]
    h1 = jnp.maximum(h1, 0.0)                                         # ReLU (VPU, f32)
    h2 = jnp.dot(h1.astype(jnp.bfloat16), w2_ref[...],
                 preferred_element_type=jnp.float32) + b2_ref[...]
    h2 = jnp.maximum(h2, 0.0)                                         # ReLU (VPU, f32)
    mu = jnp.dot(h2.astype(jnp.bfloat16), w3_ref[...],
                 preferred_element_type=jnp.float32) + b3_ref[...]
    o_ref[...] = jnp.tanh(mu).astype(o_ref.dtype)                     # tanh (EUP, f32)


def prepare_actor_params(params):
    """One-time prep: zero-pad to lane-dense shapes and pre-cast matmul
    operands to bf16, so the per-call forward is a single pallas_call."""
    w1, b1, w2, b2, w3, b3 = params
    obs_dim, _ = w1.shape
    act_dim = w3.shape[1]
    obs_pad = _round_up(obs_dim, LANES)
    act_pad = _round_up(act_dim, LANES)

    # Pad K of w1 with zeros (padded x columns are zeros -> contributes 0).
    w1p = jnp.pad(w1, ((0, obs_pad - obs_dim), (0, 0)))
    # Pad N of w3/b3 with zeros (padded outputs are tanh(0)=0, sliced off).
    w3p = jnp.pad(w3, ((0, 0), (0, act_pad - act_dim)))
    b3p = jnp.pad(b3, ((0, 0), (0, act_pad - act_dim)))

    return {
        "w1": w1p.astype(jnp.bfloat16), "b1": b1,
        "w2": w2.astype(jnp.bfloat16), "b2": b2,
        "w3": w3p.astype(jnp.bfloat16), "b3": b3p,
        "obs_dim": obs_dim, "obs_pad": obs_pad,
        "act_dim": act_dim, "act_pad": act_pad,
    }


def actor_forward(x, kparams):
    """x: [B, obs_dim] float32 -> [B, act_dim] float32."""
    w1, b1 = kparams["w1"], kparams["b1"]
    w2, b2 = kparams["w2"], kparams["b2"]
    w3, b3 = kparams["w3"], kparams["b3"]
    obs_dim, obs_pad = kparams["obs_dim"], kparams["obs_pad"]
    act_dim, act_pad = kparams["act_dim"], kparams["act_pad"]

    B = x.shape[0]
    assert x.shape[1] == obs_dim

    # --- generation-aware batch tiling --------------------------------------
    n_tc = _num_tensorcores()
    block_b = _choose_block_b(B, n_tc)
    Bp = _round_up(B, block_b)
    grid = (Bp // block_b,)

    # Single pad op: batch rows AND lane-dense obs columns (both zeros).
    if Bp != B or obs_pad != obs_dim:
        x = jnp.pad(x, ((0, Bp - B), (0, obs_pad - obs_dim)))

    def full(a):  # weights/biases: same full block every grid step
        return pl.BlockSpec(a.shape, lambda i: (0, 0))

    # Advisory cost estimate for XLA's scheduler (padded dims).
    flops = 2 * Bp * (obs_pad * HIDDEN + HIDDEN * HIDDEN + HIDDEN * act_pad)
    bytes_accessed = (Bp * obs_pad * 4
                      + (w1.size + w2.size + w3.size) * 2
                      + (b1.size + b2.size + b3.size) * 4
                      + Bp * act_pad * 4)
    cost = pl.CostEstimate(flops=flops, transcendentals=Bp * act_pad,
                           bytes_accessed=bytes_accessed)

    # VMEM budget: double-buffered x/out tiles + weights + f32 intermediates,
    # clamped generation-aware (v7x scoped VMEM is smaller).
    weight_bytes = 2 * ((w1.size + w2.size + w3.size) * 2
                        + (b1.size + b2.size + b3.size) * 4)
    io_bytes = 2 * block_b * obs_pad * 4 + 2 * block_b * act_pad * 4
    scratch_bytes = 8 * block_b * HIDDEN * 4      # generous slack for h1/h2/casts
    vmem_cap = (32 << 20) if n_tc == 2 else (64 << 20)
    vmem_limit = int(min(max(weight_bytes + io_bytes + scratch_bytes, 4 << 20),
                         vmem_cap))

    out = pl.pallas_call(
        actor_kernel,
        out_shape=jax.ShapeDtypeStruct((Bp, act_pad), jnp.float32),
        grid_spec=pltpu.PrefetchScalarGridSpec(
            num_scalar_prefetch=0,
            grid=grid,
            in_specs=[
                pl.BlockSpec((block_b, obs_pad), lambda i: (i, 0)),   # x tile (f32)
                full(w1), full(b1),
                full(w2), full(b2),
                full(w3), full(b3),
            ],
            out_specs=pl.BlockSpec((block_b, act_pad), lambda i: (i, 0)),
        ),
        compiler_params=pltpu.CompilerParams(
            dimension_semantics=("parallel",),
            vmem_limit_bytes=vmem_limit,
        ),
        cost_estimate=cost,
    )(x, w1, b1, w2, b2, w3, b3)

    # Strip batch padding and the zero-padded action columns in one slice.
    return out[:B, :act_dim]


def init_actor_params(key, obs_dim, act_dim):
    """Deterministic init mimicking nn.Linear defaults:
    U(-1/sqrt(fan_in), 1/sqrt(fan_in)) for weights and biases."""
    def linear(key, fan_in, fan_out):
        kw, kb = jax.random.split(key)
        bound = 1.0 / math.sqrt(fan_in)
        w = jax.random.uniform(kw, (fan_in, fan_out), jnp.float32, -bound, bound)
        b = jax.random.uniform(kb, (1, fan_out), jnp.float32, -bound, bound)
        return w, b

    k1, k2, k3 = jax.random.split(key, 3)
    w1, b1 = linear(k1, obs_dim, HIDDEN)
    w2, b2 = linear(k2, HIDDEN, HIDDEN)
    w3, b3 = linear(k3, HIDDEN, act_dim)
    return (w1, b1, w2, b2, w3, b3)


def actor_forward_ref_f32(x, params):
    w1, b1, w2, b2, w3, b3 = params
    h = jnp.maximum(x @ w1 + b1, 0.0)
    h = jnp.maximum(h @ w2 + b2, 0.0)
    return jnp.tanh(h @ w3 + b3)


def actor_forward_ref_bf16(x, params):
    """Matched-precision reference: bf16 matmul inputs, f32 accumulation."""
    w1, b1, w2, b2, w3, b3 = params
    bf = jnp.bfloat16
    h = jnp.maximum(jnp.dot(x.astype(bf), w1.astype(bf),
                            preferred_element_type=jnp.float32) + b1, 0.0)
    h = jnp.maximum(jnp.dot(h.astype(bf), w2.astype(bf),
                            preferred_element_type=jnp.float32) + b2, 0.0)
    return jnp.tanh(jnp.dot(h.astype(bf), w3.astype(bf),
                            preferred_element_type=jnp.float32) + b3)


if __name__ == "__main__":
    key = jax.random.PRNGKey(0)
    k_param, k_x = jax.random.split(key)

    # Shapes consistent with a continuous-control env; B=500 exercises batch
    # padding and (on v7x) the 2-tile / 2-TensorCore split.
    B, OBS_DIM, ACT_DIM = 500, 16, 8

    params = init_actor_params(k_param, OBS_DIM, ACT_DIM)
    kparams = prepare_actor_params(params)          # one-time pad + bf16 cast
    x = jax.random.normal(k_x, (B, OBS_DIM), jnp.float32)

    out = actor_forward(x, kparams)
    out = jax.block_until_ready(out)
    assert out.shape == (B, ACT_DIM)

    # Matched-precision check (same bf16-in / f32-acc arithmetic).
    ref_bf16 = actor_forward_ref_bf16(x, params)
    assert jnp.allclose(out, ref_bf16, atol=2e-3, rtol=2e-3), "mismatch vs bf16 reference"

    # Loose check against the full-f32 PyTorch-equivalent forward.
    ref_f32 = actor_forward_ref_f32(x, params)
    assert jnp.allclose(out, ref_f32, atol=5e-2, rtol=5e-2), "mismatch vs f32 reference"

    print("KERNEL_OK")
</pallas_src>

<mosaic_0001>
module attributes {stable_mosaic.version = 11 : i64} {
  func.func @actor_kernel(%arg0: i32, %arg1: memref<512x128xf32, #tpu.memory_space<vmem>>, %arg2: memref<128x256xbf16, #tpu.memory_space<vmem>>, %arg3: memref<1x256xf32, #tpu.memory_space<vmem>>, %arg4: memref<256x256xbf16, #tpu.memory_space<vmem>>, %arg5: memref<1x256xf32, #tpu.memory_space<vmem>>, %arg6: memref<256x128xbf16, #tpu.memory_space<vmem>>, %arg7: memref<1x128xf32, #tpu.memory_space<vmem>>, %arg8: memref<512x128xf32, #tpu.memory_space<vmem>>) attributes {dimension_semantics = [#tpu.dimension_semantics<parallel>], iteration_bounds = array<i64: 1>, scalar_prefetch = 0 : i64, scratch_operands = 0 : i64, tpu.core_type = #tpu.core_type<tc>, window_params = [{transform_indices = @transform_0, window_bounds = array<i64: 512, 128>}, {pipeline_mode = #tpu.pipeline_mode<synchronous>, transform_indices = @transform_1, window_bounds = array<i64: 128, 256>}, {pipeline_mode = #tpu.pipeline_mode<synchronous>, transform_indices = @transform_2, window_bounds = array<i64: 1, 256>}, {pipeline_mode = #tpu.pipeline_mode<synchronous>, transform_indices = @transform_3, window_bounds = array<i64: 256, 256>}, {pipeline_mode = #tpu.pipeline_mode<synchronous>, transform_indices = @transform_4, window_bounds = array<i64: 1, 256>}, {pipeline_mode = #tpu.pipeline_mode<synchronous>, transform_indices = @transform_5, window_bounds = array<i64: 256, 128>}, {pipeline_mode = #tpu.pipeline_mode<synchronous>, transform_indices = @transform_6, window_bounds = array<i64: 1, 128>}, {transform_indices = @transform_7, window_bounds = array<i64: 512, 128>}]} {
    %c0 = arith.constant 0 : index
    %c0_0 = arith.constant 0 : index
    %0 = vector.load %arg1[%c0, %c0_0] : memref<512x128xf32, #tpu.memory_space<vmem>>, vector<512x128xf32>
    %1 = arith.truncf %0 : vector<512x128xf32> to vector<512x128xbf16>
    %c0_1 = arith.constant 0 : index
    %c0_2 = arith.constant 0 : index
    %2 = vector.load %arg2[%c0_1, %c0_2] : memref<128x256xbf16, #tpu.memory_space<vmem>>, vector<128x256xbf16>
    %cst = arith.constant dense<0.000000e+00> : vector<512x256xf32>
    %3 = tpu.matmul %1, %2, %cst {dimension_numbers = #tpu.dot_dimension_numbers<[1], [0], [0], [1], [0, 0, 1, 1], [], []>} : vector<512x128xbf16>, vector<128x256xbf16>, vector<512x256xf32> -> vector<512x256xf32>
    %c0_3 = arith.constant 0 : index
    %c0_4 = arith.constant 0 : index
    %4 = vector.load %arg3[%c0_3, %c0_4] : memref<1x256xf32, #tpu.memory_space<vmem>>, vector<1x256xf32>
    %5 = vector.broadcast %4 : vector<1x256xf32> to vector<512x256xf32>
    %6 = arith.addf %3, %5 : vector<512x256xf32>
    %cst_5 = arith.constant 0.000000e+00 : f32
    %7 = vector.broadcast %cst_5 : f32 to vector<512x256xf32>
    %8 = arith.maximumf %6, %7 : vector<512x256xf32>
    %9 = arith.truncf %8 : vector<512x256xf32> to vector<512x256xbf16>
    %c0_6 = arith.constant 0 : index
    %c0_7 = arith.constant 0 : index
    %10 = vector.load %arg4[%c0_6, %c0_7] : memref<256x256xbf16, #tpu.memory_space<vmem>>, vector<256x256xbf16>
    %cst_8 = arith.constant dense<0.000000e+00> : vector<512x256xf32>
    %11 = tpu.matmul %9, %10, %cst_8 {dimension_numbers = #tpu.dot_dimension_numbers<[1], [0], [0], [1], [0, 0, 1, 1], [], []>} : vector<512x256xbf16>, vector<256x256xbf16>, vector<512x256xf32> -> vector<512x256xf32>
    %c0_9 = arith.constant 0 : index
    %c0_10 = arith.constant 0 : index
    %12 = vector.load %arg5[%c0_9, %c0_10] : memref<1x256xf32, #tpu.memory_space<vmem>>, vector<1x256xf32>
    %13 = vector.broadcast %12 : vector<1x256xf32> to vector<512x256xf32>
    %14 = arith.addf %11, %13 : vector<512x256xf32>
    %cst_11 = arith.constant 0.000000e+00 : f32
    %15 = vector.broadcast %cst_11 : f32 to vector<512x256xf32>
    %16 = arith.maximumf %14, %15 : vector<512x256xf32>
    %17 = arith.truncf %16 : vector<512x256xf32> to vector<512x256xbf16>
    %c0_12 = arith.constant 0 : index
    %c0_13 = arith.constant 0 : index
    %18 = vector.load %arg6[%c0_12, %c0_13] : memref<256x128xbf16, #tpu.memory_space<vmem>>, vector<256x128xbf16>
    %cst_14 = arith.constant dense<0.000000e+00> : vector<512x128xf32>
    %19 = tpu.matmul %17, %18, %cst_14 {dimension_numbers = #tpu.dot_dimension_numbers<[1], [0], [0], [1], [0, 0, 1, 1], [], []>} : vector<512x256xbf16>, vector<256x128xbf16>, vector<512x128xf32> -> vector<512x128xf32>
    %c0_15 = arith.constant 0 : index
    %c0_16 = arith.constant 0 : index
    %20 = vector.load %arg7[%c0_15, %c0_16] : memref<1x128xf32, #tpu.memory_space<vmem>>, vector<1x128xf32>
    %21 = vector.broadcast %20 : vector<1x128xf32> to vector<512x128xf32>
    %22 = arith.addf %19, %21 : vector<512x128xf32>
    %23 = math.tanh %22 : vector<512x128xf32>
    %c0_17 = arith.constant 0 : index
    %c0_18 = arith.constant 0 : index
    %24 = vector.load %arg8[%c0_17, %c0_18] : memref<512x128xf32, #tpu.memory_space<vmem>>, vector<512x128xf32>
    tpu.vector_store %arg8[%c0_17, %c0_18], %23 {strides = array<i32>} : memref<512x128xf32, #tpu.memory_space<vmem>>, vector<512x128xf32>,
    return
  }
  func.func @transform_0(%arg0: i32) -> (i32, i32) {
    %c0_i32 = arith.constant 0 : i32
    %c0_i32_0 = arith.constant 0 : i32
    return %arg0, %c0_i32 : i32, i32
  }
  func.func @transform_1(%arg0: i32) -> (i32, i32) {
    %c0_i32 = arith.constant 0 : i32
    %c0_i32_0 = arith.constant 0 : i32
    %c0_i32_1 = arith.constant 0 : i32
    return %c0_i32, %c0_i32_0 : i32, i32
  }
  func.func @transform_2(%arg0: i32) -> (i32, i32) {
    %c0_i32 = arith.constant 0 : i32
    %c0_i32_0 = arith.constant 0 : i32
    %c0_i32_1 = arith.constant 0 : i32
    return %c0_i32, %c0_i32_0 : i32, i32
  }
  func.func @transform_3(%arg0: i32) -> (i32, i32) {
    %c0_i32 = arith.constant 0 : i32
    %c0_i32_0 = arith.constant 0 : i32
    %c0_i32_1 = arith.constant 0 : i32
    return %c0_i32, %c0_i32_0 : i32, i32
  }
  func.func @transform_4(%arg0: i32) -> (i32, i32) {
    %c0_i32 = arith.constant 0 : i32
    %c0_i32_0 = arith.constant 0 : i32
    %c0_i32_1 = arith.constant 0 : i32
    return %c0_i32, %c0_i32_0 : i32, i32
  }
  func.func @transform_5(%arg0: i32) -> (i32, i32) {
    %c0_i32 = arith.constant 0 : i32
    %c0_i32_0 = arith.constant 0 : i32
    %c0_i32_1 = arith.constant 0 : i32
    return %c0_i32, %c0_i32_0 : i32, i32
  }
  func.func @transform_6(%arg0: i32) -> (i32, i32) {
    %c0_i32 = arith.constant 0 : i32
    %c0_i32_0 = arith.constant 0 : i32
    %c0_i32_1 = arith.constant 0 : i32
    return %c0_i32, %c0_i32_0 : i32, i32
  }
  func.func @transform_7(%arg0: i32) -> (i32, i32) {
    %c0_i32 = arith.constant 0 : i32
    %c0_i32_0 = arith.constant 0 : i32
    return %arg0, %c0_i32 : i32, i32
  }
}

</mosaic_0001>

<bundles_post_ra>
// kernel: tpu_custom_call.1
= control target key start
LH: loop header
LB: loop body
LE: loop exit
PB: predicated region body
PF: predicated region fallthrough
CT: control target
= control target key end

     0   :  { %12 = vsyncpa [#allocation3], 0  ;;  %s3905_s0 = inlined_call_operand.hbm [shape: f32[512,128], index: 0, kind: input, shape index: {}]   ;;  %s3906_s1 = inlined_call_operand.hbm [shape: bf16[128,256], index: 1, kind: input, shape index: {}]   ;;  %s3907_s2 = inlined_call_operand.hbm [shape: f32[1,256], index: 2, kind: input, shape index: {}]   ;;  %s3908_s3 = inlined_call_operand.hbm [shape: bf16[256,256], index: 3, kind: input, shape index: {}]   ;;  %s3909_s4 = inlined_call_operand.vmem [shape: f32[1,256], index: 4, kind: input, shape index: {}]   ;;  %s3910_s5 = inlined_call_operand.hbm [shape: bf16[256,128], index: 5, kind: input, shape index: {}]   ;;  %s3911_s6 = inlined_call_operand.vmem [shape: f32[1,128], index: 6, kind: input, shape index: {}]   ;;  %s3912_s7 = inlined_call_operand.hbm [shape: f32[512,128], index: 7, kind: output, shape index: {}]  }
   0x1   :  { %13 = vsyncpa [#allocation6], 0 }
   0x2   :  { %14 = vsyncpa [#allocation9], 0 }
   0x3   :  { %15 = vsyncpa [#allocation4], 0  ;;  %s33_s26 = sshll.u32 %s3906_s1, 4  ;;  %s3129_s27 = smov [#allocation5]   ;;  %s34_s26 = int_to_ptr.hbm [resolvable:$true] %s33_s26 }
   0x4   :  { %s35_s28 = sshll.u32 %s3129_s27, 4  ;;  %s57_s8 = sshll.u32 %s3908_s3, 4  ;;  %s36_s28 = int_to_ptr.vmem [resolvable:$true] %s35_s28  ;;  %s58_s8 = int_to_ptr.hbm [resolvable:$true] %s57_s8 }
   0x5   :  { %s3130_s9 = smov 128   ;;  %s3131_s10 = smov 8  }
   0x6   :  { %41 = dma.hbm_to_vmem [thread:$0]  %s34_s26, 2048, %s36_s28, [#allocation6], %s3130_s9, %s3130_s9, %s3131_s10  }
   0x7   :  { %s3132_s11 = smov [#allocation8]   ;;  %s20_s1 = sshll.u32 %s3905_s0, 4  ;;  %s21_s1 = int_to_ptr.hbm [resolvable:$true] %s20_s1 }
   0x8   :  { %s59_s12 = sshll.u32 %s3132_s11, 4  ;;  %s47_s16 = sshll.u32 %s3907_s2, 4  ;;  %s60_s12 = int_to_ptr.vmem [resolvable:$true] %s59_s12  ;;  %s48_s16 = int_to_ptr.hbm [resolvable:$true] %s47_s16 }
   0x9   :  { %65 = dma.hbm_to_vmem [thread:$0]  %s58_s8, 4096, %s60_s12, [#allocation9], %s3130_s9, %s3130_s9, %s3131_s10  }
   0xa   :  { %s3133_s17 = smov [#allocation2]   ;;  %s3134_s19 = smov [#allocation7]  }
   0xb   :  { %s22_s18 = sshll.u32 %s3133_s17, 4  ;;  %s49_s0 = sshll.u32 %s3134_s19, 4  ;;  %s23_s18 = int_to_ptr.vmem [resolvable:$true] %s22_s18  ;;  %s50_s0 = int_to_ptr.vmem [resolvable:$true] %s49_s0 }
   0xc   :  { %28 = dma.hbm_to_vmem [thread:$0]  %s21_s1, 8192, %s23_s18, [#allocation3], %s3130_s9, %s3130_s9, %s3131_s10  }
   0xd   :  { %s72_s22 = sshll.u32 %s3910_s5, 4  ;;  %s3135_s23 = smov [#allocation10]   ;;  %s73_s22 = int_to_ptr.hbm [resolvable:$true] %s72_s22 }
   0xe   :  { %52 = dma.hbm_to_vmem [thread:$0]  %s48_s16, 32, %s50_s0, [#allocation6]  }
   0xf   :  { %s74_s24 = sshll.u32 %s3135_s23, 4  ;;  %s3136_s2 = smov 64   ;;  %s75_s24 = int_to_ptr.vmem [resolvable:$true] %s74_s24 }
  0x10   :  { %s3137_s25 = smov 4  }
  0x11   :  { %80 = dma.hbm_to_vmem [thread:$0]  %s73_s22, 2048, %s75_s24, [#allocation9], %s3136_s2, %s3136_s2, %s3137_s25  }
  0x12   :  { %3121 = dma.done.wait [#allocation3], 8192  }
  0x13   :  { %3122 = vsyncadd [#allocation3], 4294959104 }
  0x14   :  { %3123 = dma.done.wait [#allocation6], 2080  }
  0x15   :  { %3124 = vsyncadd [#allocation6], 4294965216 }
  0x16   :  { %3125 = dma.done.wait [#allocation9], 6144  }
  0x17   :  { %3126 = vsyncadd [#allocation9], 4294961152  ;;  %v2574_v0 = vld [vmem:[#allocation5 + $0x70] sm:$0xf]  ;;  %v2787_v1 = vld [vmem:[#allocation5 + $0x74] sm:$0xf0] }
  0x18   :  { %v2786_v2 = vld [vmem:[#allocation5 + $0x74] sm:$0xf]  ;;  %v2575_v3 = vor.u32 %v2787_v1, %v2574_v0  ;;  %v2576_v4 = vld [vmem:[#allocation5 + $0x78] sm:$0xf0]  ;;  %v2566_v5 = vld [vmem:[#allocation5 + $0x60] sm:$0xf] }
  0x19   :  { %v2785_v6 = vld [vmem:[#allocation5 + $0x64] sm:$0xf0]  ;;  %v2579_v7 = vor.u32 %v2786_v2, %v2576_v4  ;;  %v2784_v8 = vld [vmem:[#allocation5 + $0x64] sm:$0xf]  ;;  %v2568_v9 = vld [vmem:[#allocation5 + $0x68] sm:$0xf0] }
  0x1a   :  { %301 = vmatpush.bf16.msra.mxu0 %v2575_v3  ;;  %v2567_v10 = vor.u32 %v2785_v6, %v2566_v5  ;;  %v2571_v11 = vor.u32 %v2784_v8, %v2568_v9  ;;  %v2558_v12 = vld [vmem:[#allocation5 + $0x50] sm:$0xf]  ;;  %v2783_v13 = vld [vmem:[#allocation5 + $0x54] sm:$0xf0]  ;;  %v2782_v14 = vld [vmem:[#allocation5 + $0x54] sm:$0xf] }
  0x1b   :  { %470 = vmatpush.bf16.msra.mxu1 %v2579_v7  ;;  %v2560_v15 = vld [vmem:[#allocation5 + $0x58] sm:$0xf0]  ;;  %v2559_v16 = vor.u32 %v2783_v13, %v2558_v12  ;;  %v2550_v18 = vld [vmem:[#allocation5 + $0x40] sm:$0xf]  ;;  %v2781_v19 = vld [vmem:[#allocation5 + $0x44] sm:$0xf0] }
  0x1c   :  { %v2563_v17 = vor.u32 %v2782_v14, %v2560_v15  ;;  %v2780_v20 = vld [vmem:[#allocation5 + $0x44] sm:$0xf]  ;;  %v2552_v21 = vld [vmem:[#allocation5 + $0x48] sm:$0xf0]  ;;  %v2551_v22 = vor.u32 %v2781_v19, %v2550_v18  ;;  %v2542_v24 = vld [vmem:[#allocation5 + $0x30] sm:$0xf] }
  0x1d   :  { %v2555_v23 = vor.u32 %v2780_v20, %v2552_v21  ;;  %v2779_v25 = vld [vmem:[#allocation5 + $0x34] sm:$0xf0]  ;;  %v2778_v26 = vld [vmem:[#allocation5 + $0x34] sm:$0xf]  ;;  %v2544_v27 = vld [vmem:[#allocation5 + $0x38] sm:$0xf0] }
  0x1e   :  { %302 = vmatpush.bf16.msra.mxu0 %v2567_v10  ;;  %v2543_v28 = vor.u32 %v2779_v25, %v2542_v24  ;;  %v2547_v29 = vor.u32 %v2778_v26, %v2544_v27  ;;  %v2534_v30 = vld [vmem:[#allocation5 + $0x20] sm:$0xf]  ;;  %v2777_v31 = vld [vmem:[#allocation5 + $0x24] sm:$0xf0]  ;;  %v2776_v32 = vld [vmem:[#allocation5 + $0x24] sm:$0xf] }
  0x1f   :  { %471 = vmatpush.bf16.msra.mxu1 %v2571_v11  ;;  %v2536_v33 = vld [vmem:[#allocation5 + $0x28] sm:$0xf0]  ;;  %v2535_v34 = vor.u32 %v2777_v31, %v2534_v30  ;;  %v2526_v36 = vld [vmem:[#allocation5 + $0x10] sm:$0xf]  ;;  %v2775_v37 = vld [vmem:[#allocation5 + $0x14] sm:$0xf0] }
  0x20   :  { %v2539_v35 = vor.u32 %v2776_v32, %v2536_v33  ;;  %v2774_v38 = vld [vmem:[#allocation5 + $0x14] sm:$0xf]  ;;  %v2528_v39 = vld [vmem:[#allocation5 + $0x18] sm:$0xf0]  ;;  %v2527_v40 = vor.u32 %v2775_v37, %v2526_v36  ;;  %v2518_v42 = vld [vmem:[#allocation5] sm:$0xf] }
  0x21   :  { %v2531_v41 = vor.u32 %v2774_v38, %v2528_v39  ;;  %v2773_v43 = vld [vmem:[#allocation5 + $0x4] sm:$0xf0]  ;;  %v2772_v44 = vld [vmem:[#allocation5 + $0x4] sm:$0xf]  ;;  %v2520_v45 = vld [vmem:[#allocation5 + $0x8] sm:$0xf0] }
  0x22   :  { %303 = vmatpush.bf16.msra.mxu0 %v2559_v16  ;;  %v2802_v46 = vld [vmem:[#allocation8 + $0x74] sm:$0xf]  ;;  %v2640_v47 = vld [vmem:[#allocation8 + $0x78] sm:$0xf0]  ;;  %v2519_v50 = vor.u32 %v2773_v43, %v2518_v42  ;;  %v104_v52 = vld [vmem:[#allocation2 + $0x8] sm:$0xff]  ;;  %v2523_v53 = vor.u32 %v2772_v44, %v2520_v45  ;;  %s2501_s14 = sshll.u32 %s3912_s7, 4  ;;  %s2502_s14 = int_to_ptr.hbm [resolvable:$true] %s2501_s14 }
  0x23   :  { %472 = vmatpush.bf16.msra.mxu1 %v2563_v17  ;;  %v2818_v48 = vld [vmem:[#allocation8 + $0xf4] sm:$0xf]  ;;  %v2704_v49 = vld [vmem:[#allocation8 + $0xf8] sm:$0xf0]  ;;  %v2643_v54 = vor.u32 %v2802_v46, %v2640_v47  ;;  %v108_v61 = vld [vmem:[#allocation2 + $0x28] sm:$0xff] }
  0x24   :  { %v103_v51 = vld [vmem:[#allocation2] sm:$0xff]  ;;  %v2707_v55 = vor.u32 %v2818_v48, %v2704_v49  ;;  %v105_v57 = vld [vmem:[#allocation2 + $0x10] sm:$0xff]  ;;  %v106_v58 = vld [vmem:[#allocation2 + $0x18] sm:$0xff] }
  0x25   :  { %v167_v56 = vpack.c.bf16 %v104_v52, %v103_v51  ;;  %v168_v59 = vpack.c.bf16 %v106_v58, %v105_v57  ;;  %v107_v60 = vld [vmem:[#allocation2 + $0x20] sm:$0xff]  ;;  %v2632_v0 = vld [vmem:[#allocation8 + $0x68] sm:$0xf0]  ;;  %v110_v6 = vld [vmem:[#allocation2 + $0x38] sm:$0xff] }
  0x26   :  { %304 = vmatpush.bf16.msra.mxu0 %v2551_v22  ;;  %v169_v62 = vpack.c.bf16 %v108_v61, %v107_v60  ;;  %v2800_v63 = vld [vmem:[#allocation8 + $0x64] sm:$0xf]  ;;  %v2696_v3 = vld [vmem:[#allocation8 + $0xe8] sm:$0xf0]  ;;  %v2638_v11 = vld [vmem:[#allocation8 + $0x70] sm:$0xf] }
  0x27   :  { %473 = vmatpush.bf16.msra.mxu1 %v2555_v23  ;;  %v2816_v1 = vld [vmem:[#allocation8 + $0xe4] sm:$0xf]  ;;  %v2635_v2 = vor.u32 %v2800_v63, %v2632_v0  ;;  %v109_v5 = vld [vmem:[#allocation2 + $0x30] sm:$0xff]  ;;  %v2803_v12 = vld [vmem:[#allocation8 + $0x74] sm:$0xf0] }
  0x28   :  { %v2699_v4 = vor.u32 %v2816_v1, %v2696_v3  ;;  %v170_v7 = vpack.c.bf16 %v110_v6, %v109_v5  ;;  %v111_v8 = vld [vmem:[#allocation2 + $0x40] sm:$0xff]  ;;  %v112_v9 = vld [vmem:[#allocation2 + $0x48] sm:$0xff]  ;;  %v2702_v13 = vld [vmem:[#allocation8 + $0xf0] sm:$0xf]  ;;  %v2639_v14 = vor.u32 %v2803_v12, %v2638_v11 }
  0x29   :  { %v171_v10 = vpack.c.bf16 %v112_v9, %v111_v8  ;;  %v2819_v15 = vld [vmem:[#allocation8 + $0xf4] sm:$0xf0]  ;;  %v113_v17 = vld [vmem:[#allocation2 + $0x50] sm:$0xff]  ;;  %v2630_v20 = vld [vmem:[#allocation8 + $0x60] sm:$0xf] }
  0x2a   :  { %305 = vmatpush.bf16.msra.mxu0 %v2543_v28  ;;  %v2703_v16 = vor.u32 %v2819_v15, %v2702_v13  ;;  %1029 = vmatpush.bf16.msra.mxu2 %v2639_v14  ;;  %v114_v18 = vld [vmem:[#allocation2 + $0x58] sm:$0xff]  ;;  %v2801_v21 = vld [vmem:[#allocation8 + $0x64] sm:$0xf0]  ;;  %v2694_v22 = vld [vmem:[#allocation8 + $0xe0] sm:$0xf] }
  0x2b   :  { %474 = vmatpush.bf16.msra.mxu1 %v2547_v29  ;;  %v172_v19 = vpack.c.bf16 %v114_v18, %v113_v17  ;;  %v2631_v23 = vor.u32 %v2801_v21, %v2630_v20  ;;  %v2817_v24 = vld [vmem:[#allocation8 + $0xe4] sm:$0xf0]  ;;  %v2622_v26 = vld [vmem:[#allocation8 + $0x50] sm:$0xf]  ;;  %v2799_v27 = vld [vmem:[#allocation8 + $0x54] sm:$0xf0] }
  0x2c   :  { %1198 = vmatpush.bf16.msra.mxu3 %v2703_v16  ;;  %v2695_v25 = vor.u32 %v2817_v24, %v2694_v22  ;;  %v2686_v28 = vld [vmem:[#allocation8 + $0xd0] sm:$0xf]  ;;  %v2623_v29 = vor.u32 %v2799_v27, %v2622_v26  ;;  %v2815_v30 = vld [vmem:[#allocation8 + $0xd4] sm:$0xf0]  ;;  %v2614_v32 = vld [vmem:[#allocation8 + $0x40] sm:$0xf] }
  0x2d   :  { %v2687_v31 = vor.u32 %v2815_v30, %v2686_v28  ;;  %v2797_v33 = vld [vmem:[#allocation8 + $0x44] sm:$0xf0]  ;;  %v115_v38 = vld [vmem:[#allocation2 + $0x60] sm:$0xff]  ;;  %v2670_v42 = vld [vmem:[#allocation8 + $0xb0] sm:$0xf] }
  0x2e   :  { %306 = vmatpush.bf16.msra.mxu0 %v2535_v34  ;;  %1030 = vmatpush.bf16.msra.mxu2 %v2631_v23  ;;  %v2678_v34 = vld [vmem:[#allocation8 + $0xc0] sm:$0xf]  ;;  %v2615_v36 = vor.u32 %v2797_v33, %v2614_v32  ;;  %v116_v39 = vld [vmem:[#allocation2 + $0x68] sm:$0xff]  ;;  %v2811_v45 = vld [vmem:[#allocation8 + $0xb4] sm:$0xf0] }
  0x2f   :  { %475 = vmatpush.bf16.msra.mxu1 %v2539_v35  ;;  %v2813_v35 = vld [vmem:[#allocation8 + $0xc4] sm:$0xf0]  ;;  %v173_v43 = vpack.c.bf16 %v116_v39, %v115_v38  ;;  %v2671_v46 = vor.u32 %v2811_v45, %v2670_v42  ;;  %v2598_v47 = vld [vmem:[#allocation8 + $0x20] sm:$0xf]  ;;  %v2798_v52 = vld [vmem:[#allocation8 + $0x54] sm:$0xf] }
  0x30   :  { %1199 = vmatpush.bf16.msra.mxu3 %v2695_v25  ;;  %v2679_v37 = vor.u32 %v2813_v35, %v2678_v34  ;;  %v2793_v48 = vld [vmem:[#allocation8 + $0x24] sm:$0xf0]  ;;  %v2688_v57 = vld [vmem:[#allocation8 + $0xd8] sm:$0xf0]  ;;  %v2791_v60 = vld [vmem:[#allocation8 + $0x14] sm:$0xf0] }
  0x31   :  { %v2599_v49 = vor.u32 %v2793_v48, %v2598_v47  ;;  %v2809_v51 = vld [vmem:[#allocation8 + $0xa4] sm:$0xf0]  ;;  %v2654_v61 = vld [vmem:[#allocation8 + $0x90] sm:$0xf]  ;;  %v2807_v63 = vld [vmem:[#allocation8 + $0x94] sm:$0xf0] }
  0x32   :  { %307 = vmatpush.bf16.msra.mxu0 %v2527_v40  ;;  %1031 = vmatpush.bf16.msra.mxu2 %v2623_v29  ;;  %v2606_v40 = vld [vmem:[#allocation8 + $0x30] sm:$0xf]  ;;  %v2655_v0 = vor.u32 %v2807_v63, %v2654_v61  ;;  %v2582_v1 = vld [vmem:[#allocation8] sm:$0xf]  ;;  %v2805_v5 = vld [vmem:[#allocation8 + $0x84] sm:$0xf0] }
  0x33   :  { %476 = vmatpush.bf16.msra.mxu1 %v2531_v41  ;;  %v2795_v41 = vld [vmem:[#allocation8 + $0x34] sm:$0xf0]  ;;  %v2646_v3 = vld [vmem:[#allocation8 + $0x80] sm:$0xf]  ;;  %v117_v6 = vld [vmem:[#allocation2 + $0x70] sm:$0xff] }
  0x34   :  { %1200 = vmatpush.bf16.msra.mxu3 %v2687_v31  ;;  %v2607_v44 = vor.u32 %v2795_v41, %v2606_v40  ;;  %v2647_v8 = vor.u32 %v2805_v5, %v2646_v3  ;;  %v2835_v11 = vld [vmem:[#allocation10 + $0x78] sm:$0xff]  ;;  %v120_v13 = vld [vmem:[#allocation2 + $0x88] sm:$0xff]  ;;  %v121_v30 = vld [vmem:[#allocation2 + $0x90] sm:$0xff] }
  0x35   :  { %v119_v12 = vld [vmem:[#allocation2 + $0x80] sm:$0xff]  ;;  %v122_v31 = vld [vmem:[#allocation2 + $0x98] sm:$0xff]  ;;  %v124_v48 = vld [vmem:[#allocation2 + $0xa8] sm:$0xff] }
  0x36   :  { %308 = vmatpush.bf16.msra.mxu0 %v2519_v50  ;;  %1032 = vmatpush.bf16.msra.mxu2 %v2615_v36  ;;  %v2662_v50 = vld [vmem:[#allocation8 + $0xa0] sm:$0xf]  ;;  %v175_v14 = vpack.c.bf16 %v120_v13, %v119_v12  ;;  %v215_v15 = vld [vmem:[#allocation7] sm:$0x3]  ;;  %v176_v34 = vpack.c.bf16 %v122_v31, %v121_v30  ;;  %v2826_v12 = vld [vmem:[#allocation10 + $0x30] sm:$0xff] }
  0x37   :  { %477 = vmatpush.bf16.msra.mxu1 %v2523_v53  ;;  %v2624_v53 = vld [vmem:[#allocation8 + $0x58] sm:$0xf0]  ;;  %v3203_v18 = vperm.slane %v215_v15, 0 }
  0x38   :  { %1201 = vmatpush.bf16.msra.mxu3 %v2679_v37  ;;  %v123_v47 = vld [vmem:[#allocation2 + $0xa0] sm:$0xff] }
  0x39   :  { %309 = vmatmul.bf16.vlgmr.msra.gmra.mxu0 %v167_v56 }
  0x3a   :  { %1367 = vmatpush.bf16.msrb.mxu0 %v2643_v54  ;;  %478 = vmatmul.bf16.vlgmr.msra.gmra.mxu1 %v167_v56  ;;  %v2663_v54 = vor.u32 %v2809_v51, %v2662_v50  ;;  %v2627_v56 = vor.u32 %v2798_v52, %v2624_v53  ;;  %v177_v51 = vpack.c.bf16 %v124_v48, %v123_v47  ;;  %v130_v47 = vld [vmem:[#allocation2 + $0xd8] sm:$0xff] }
  0x3b   :  { %1536 = vmatpush.bf16.msrb.mxu1 %v2707_v55  ;;  %1033 = vmatpush.bf16.msra.mxu2 %v2607_v44  ;;  %v2814_v55 = vld [vmem:[#allocation8 + $0xd4] sm:$0xf] }
  0x3c   :  { %1202 = vmatpush.bf16.msra.mxu3 %v2671_v46  ;;  %v2691_v58 = vor.u32 %v2814_v55, %v2688_v57  ;;  %v2616_v55 = vld [vmem:[#allocation8 + $0x48] sm:$0xf0]  ;;  %v2812_v57 = vld [vmem:[#allocation8 + $0xc4] sm:$0xf] }
  0x3e   :  { %1368 = vmatpush.bf16.msrb.mxu0 %v2635_v2  ;;  %v2789_v2 = vld [vmem:[#allocation8 + $0x4] sm:$0xf0] }
  0x3f   :  { %1537 = vmatpush.bf16.msrb.mxu1 %v2699_v4  ;;  %1034 = vmatpush.bf16.msra.mxu2 %v2599_v49  ;;  %v2583_v4 = vor.u32 %v2789_v2, %v2582_v1 }
  0x40   :  { %1203 = vmatpush.bf16.msra.mxu3 %v2663_v54  ;;  %v2796_v54 = vld [vmem:[#allocation8 + $0x44] sm:$0xf] }
  0x42   :  { %1369 = vmatpush.bf16.msrb.mxu0 %v2627_v56  ;;  %v2619_v56 = vor.u32 %v2796_v54, %v2616_v55 }
  0x43   :  { %1538 = vmatpush.bf16.msrb.mxu1 %v2691_v58  ;;  %v2680_v58 = vld [vmem:[#allocation8 + $0xc8] sm:$0xf0] }
  0x44   :  { %1204 = vmatpush.bf16.msra.mxu3 %v2655_v0 }
  0x46   :  { %1370 = vmatpush.bf16.msrb.mxu0 %v2619_v56 }
  0x48   :  { %1205 = vmatpush.bf16.msra.mxu3 %v2647_v8 }
  0x49   :  { %314 = vmatmul.bf16.gmra.mxu0 %v168_v59 }
  0x4a   :  { %483 = vmatmul.bf16.gmra.mxu1 %v168_v59  ;;  %v2590_v59 = vld [vmem:[#allocation8 + $0x10] sm:$0xf] }
  0x4c   :  { %2198 = vmatpush.bf16.msrb.mxu3 %v2835_v11 }
  0x59   :  { %319 = vmatmul.bf16.gmra.mxu0 %v169_v62 }
  0x5a   :  { %488 = vmatmul.bf16.gmra.mxu1 %v169_v62  ;;  %v2591_v62 = vor.u32 %v2791_v60, %v2590_v59  ;;  %v2683_v59 = vor.u32 %v2812_v57, %v2680_v58 }
  0x5c   :  { %1035 = vmatpush.bf16.msra.mxu2 %v2591_v62  ;;  %1539 = vmatpush.bf16.msrb.mxu1 %v2683_v59 }
  0x60   :  { %1036 = vmatpush.bf16.msra.mxu2 %v2583_v4 }
  0x69   :  { %324 = vmatmul.bf16.gmra.mxu0 %v170_v7 }
  0x6a   :  { %493 = vmatmul.bf16.gmra.mxu1 %v170_v7  ;;  %v118_v7 = vld [vmem:[#allocation2 + $0x78] sm:$0xff] }
  0x6b   :  { %v174_v9 = vpack.c.bf16 %v118_v7, %v117_v6  ;;  %v125_v6 = vld [vmem:[#allocation2 + $0xb0] sm:$0xff]  ;;  %v126_v7 = vld [vmem:[#allocation2 + $0xb8] sm:$0xff] }
  0x79   :  { %329 = vmatmul.bf16.gmra.mxu0 %v171_v10 }
  0x7a   :  { %498 = vmatmul.bf16.gmra.mxu1 %v171_v10  ;;  %v2827_v10 = vld [vmem:[#allocation10 + $0x38] sm:$0xff] }
  0x7b   :  { %2029 = vmatpush.bf16.msrb.mxu2 %v2827_v10  ;;  %v178_v10 = vpack.c.bf16 %v126_v7, %v125_v6 }
  0x7f   :  { %2030 = vmatpush.bf16.msrb.mxu2 %v2826_v12 }
  0x89   :  { %334 = vmatmul.bf16.gmra.mxu0 %v172_v19 }
  0x8a   :  { %503 = vmatmul.bf16.gmra.mxu1 %v172_v19  ;;  %v3205_v19 = vperm.slane %v215_v15, 1 }
  0x99   :  { %339 = vmatmul.bf16.gmra.mxu0 %v173_v43 }
  0x9a   :  { %508 = vmatmul.bf16.gmra.mxu1 %v173_v43 }
  0xa9   :  { %344 = vmatmul.bf16.gmra.mxu0 %v174_v9 }
  0xaa   :  { %513 = vmatmul.bf16.gmra.mxu1 %v174_v9 }
  0xb6   :  { %v310_v16 = vpop.f32.mrf.mxu0 }
  0xb7   :  { %v479_v17 = vpop.f32.mrf.mxu1  ;;  %v311_v20 = vadd.f32 %v310_v16, %v3203_v18 }
  0xb8   :  { %v480_v21 = vadd.f32 %v479_v17, %v3205_v19 }
  0xb9   :  { %349 = vmatmul.bf16.gmra.mxu0 %v175_v14  ;;  %v639_v26 = vmax.f32 %v311_v20, 0.0 }
  0xba   :  { %518 = vmatmul.bf16.gmra.mxu1 %v175_v14  ;;  %v640_v28 = vmax.f32 %v480_v21, 0.0  ;;  %v2834_v14 = vld [vmem:[#allocation10 + $0x70] sm:$0xff] }
  0xbb   :  { %2199 = vmatpush.bf16.msrb.mxu3 %v2834_v14  ;;  %v2672_v14 = vld [vmem:[#allocation8 + $0xb8] sm:$0xf0] }
  0xbe   :  { %v312_v22 = vpop.f32.mrf.mxu0 }
  0xbf   :  { %v313_v23 = vadd.f32 %v312_v22, %v3203_v18  ;;  %v481_v24 = vpop.f32.mrf.mxu1 }
  0xc0   :  { %v482_v25 = vadd.f32 %v481_v24, %v3205_v19 }
  0xc1   :  { %v641_v27 = vmax.f32 %v313_v23, 0.0 }
  0xc2   :  { %v642_v29 = vmax.f32 %v482_v25, 0.0 }
  0xc3   :  { %v3211_v32 = vpack.c.bf16 %v641_v27, %v639_v26  ;;  %v127_v27 = vld [vmem:[#allocation2 + $0xc0] sm:$0xff] }
  0xc4   :  { %v3213_v33 = vpack.c.bf16 %v642_v29, %v640_v28  ;;  %v128_v28 = vld [vmem:[#allocation2 + $0xc8] sm:$0xff] }
  0xc5   :  { %1037 = vmatmul.bf16.vlgmr.msra.gmra.mxu2 %v3211_v32  ;;  %v179_v31 = vpack.c.bf16 %v128_v28, %v127_v27  ;;  %v133_v28 = vld [vmem:[#allocation2 + $0xf0] sm:$0xff] }
  0xc6   :  { %1206 = vmatmul.bf16.vlgmr.msra.gmra.mxu3 %v3213_v33  ;;  %v315_v35 = vpop.f32.mrf.mxu0 }
  0xc7   :  { %v484_v36 = vpop.f32.mrf.mxu1  ;;  %v316_v37 = vadd.f32 %v315_v35, %v3203_v18 }
  0xc8   :  { %v485_v38 = vadd.f32 %v484_v36, %v3205_v19 }
  0xc9   :  { %354 = vmatmul.bf16.gmra.mxu0 %v176_v34  ;;  %v643_v43 = vmax.f32 %v316_v37, 0.0 }
  0xca   :  { %523 = vmatmul.bf16.gmra.mxu1 %v176_v34  ;;  %v644_v45 = vmax.f32 %v485_v38, 0.0 }
  0xce   :  { %v317_v39 = vpop.f32.mrf.mxu0 }
  0xcf   :  { %v318_v40 = vadd.f32 %v317_v39, %v3203_v18  ;;  %v486_v41 = vpop.f32.mrf.mxu1 }
  0xd0   :  { %v487_v42 = vadd.f32 %v486_v41, %v3205_v19 }
  0xd1   :  { %v645_v44 = vmax.f32 %v318_v40, 0.0 }
  0xd2   :  { %v646_v46 = vmax.f32 %v487_v42, 0.0 }
  0xd3   :  { %v3221_v49 = vpack.c.bf16 %v645_v44, %v643_v43 }
  0xd4   :  { %v3223_v50 = vpack.c.bf16 %v646_v46, %v644_v45  ;;  %v129_v46 = vld [vmem:[#allocation2 + $0xd0] sm:$0xff] }
  0xd5   :  { %1042 = vmatmul.bf16.gmra.mxu2 %v3221_v49 }
  0xd6   :  { %1211 = vmatmul.bf16.gmra.mxu3 %v3223_v50  ;;  %v320_v52 = vpop.f32.mrf.mxu0 }
  0xd7   :  { %v489_v53 = vpop.f32.mrf.mxu1  ;;  %v321_v60 = vadd.f32 %v320_v52, %v3203_v18  ;;  %v180_v52 = vpack.c.bf16 %v130_v47, %v129_v46 }
  0xd8   :  { %v490_v61 = vadd.f32 %v489_v53, %v3205_v19 }
  0xd9   :  { %359 = vmatmul.bf16.gmra.mxu0 %v177_v51  ;;  %v647_v2 = vmax.f32 %v321_v60, 0.0 }
  0xda   :  { %528 = vmatmul.bf16.gmra.mxu1 %v177_v51  ;;  %v648_v4 = vmax.f32 %v490_v61, 0.0 }
  0xde   :  { %v322_v62 = vpop.f32.mrf.mxu0 }
  0xdf   :  { %v323_v63 = vadd.f32 %v322_v62, %v3203_v18  ;;  %v491_v0 = vpop.f32.mrf.mxu1 }
  0xe0   :  { %v492_v1 = vadd.f32 %v491_v0, %v3205_v19 }
  0xe1   :  { %v649_v3 = vmax.f32 %v323_v63, 0.0 }
  0xe2   :  { %v650_v5 = vmax.f32 %v492_v1, 0.0  ;;  %v131_v1 = vld [vmem:[#allocation2 + $0xe0] sm:$0xff] }
  0xe3   :  { %v3231_v8 = vpack.c.bf16 %v649_v3, %v647_v2  ;;  %v132_v2 = vld [vmem:[#allocation2 + $0xe8] sm:$0xff] }
  0xe4   :  { %v3233_v9 = vpack.c.bf16 %v650_v5, %v648_v4  ;;  %v181_v5 = vpack.c.bf16 %v132_v2, %v131_v1 }
  0xe5   :  { %1047 = vmatmul.bf16.gmra.mxu2 %v3231_v8 }
  0xe6   :  { %1216 = vmatmul.bf16.gmra.mxu3 %v3233_v9  ;;  %v325_v11 = vpop.f32.mrf.mxu0 }
  0xe7   :  { %v494_v13 = vpop.f32.mrf.mxu1  ;;  %v326_v15 = vadd.f32 %v325_v11, %v3203_v18  ;;  %v2608_v11 = vld [vmem:[#allocation8 + $0x38] sm:$0xf0] }
  0xe8   :  { %v495_v16 = vadd.f32 %v494_v13, %v3205_v19  ;;  %v2810_v13 = vld [vmem:[#allocation8 + $0xb4] sm:$0xf] }
  0xe9   :  { %364 = vmatmul.bf16.gmra.mxu0 %v178_v10  ;;  %v651_v23 = vmax.f32 %v326_v15, 0.0  ;;  %v2675_v15 = vor.u32 %v2810_v13, %v2672_v14  ;;  %v137_v13 = vld [vmem:[#allocation2 + $0x110] sm:$0xff]  ;;  %v138_v14 = vld [vmem:[#allocation2 + $0x118] sm:$0xff] }
  0xea   :  { %533 = vmatmul.bf16.gmra.mxu1 %v178_v10  ;;  %v652_v25 = vmax.f32 %v495_v16, 0.0  ;;  %v2794_v10 = vld [vmem:[#allocation8 + $0x34] sm:$0xf] }
  0xeb   :  { %v2611_v12 = vor.u32 %v2794_v10, %v2608_v11  ;;  %1540 = vmatpush.bf16.msrb.mxu1 %v2675_v15 }
  0xed   :  { %1371 = vmatpush.bf16.msrb.mxu0 %v2611_v12  ;;  %v863_v12 = vld [vmem:[%s3909_s4] sm:$0x3] }
  0xee   :  { %v327_v17 = vpop.f32.mrf.mxu0 }
  0xef   :  { %v328_v20 = vadd.f32 %v327_v17, %v3203_v18  ;;  %v496_v21 = vpop.f32.mrf.mxu1 }
  0xf0   :  { %v497_v22 = vadd.f32 %v496_v21, %v3205_v19 }
  0xf1   :  { %v653_v24 = vmax.f32 %v328_v20, 0.0 }
  0xf2   :  { %v654_v26 = vmax.f32 %v497_v22, 0.0 }
  0xf3   :  { %v3241_v29 = vpack.c.bf16 %v653_v24, %v651_v23 }
  0xf4   :  { %v3243_v30 = vpack.c.bf16 %v654_v26, %v652_v25 }
  0xf5   :  { %1052 = vmatmul.bf16.gmra.mxu2 %v3241_v29 }
  0xf6   :  { %1221 = vmatmul.bf16.gmra.mxu3 %v3243_v30  ;;  %v330_v34 = vpop.f32.mrf.mxu0 }
  0xf7   :  { %v499_v35 = vpop.f32.mrf.mxu1  ;;  %v331_v36 = vadd.f32 %v330_v34, %v3203_v18 }
  0xf8   :  { %v500_v37 = vadd.f32 %v499_v35, %v3205_v19 }
  0xf9   :  { %369 = vmatmul.bf16.gmra.mxu0 %v179_v31  ;;  %v655_v42 = vmax.f32 %v331_v36, 0.0 }
  0xfa   :  { %538 = vmatmul.bf16.gmra.mxu1 %v179_v31  ;;  %v656_v44 = vmax.f32 %v500_v37, 0.0  ;;  %v134_v31 = vld [vmem:[#allocation2 + $0xf8] sm:$0xff] }
  0xfb   :  { %v182_v36 = vpack.c.bf16 %v134_v31, %v133_v28 }
  0xfe   :  { %v332_v38 = vpop.f32.mrf.mxu0 }
  0xff   :  { %v333_v39 = vadd.f32 %v332_v38, %v3203_v18  ;;  %v501_v40 = vpop.f32.mrf.mxu1  ;;  %v2825_v38 = vld [vmem:[#allocation10 + $0x28] sm:$0xff] }
 0x100   :  { %v502_v41 = vadd.f32 %v501_v40, %v3205_v19  ;;  %2031 = vmatpush.bf16.msrb.mxu2 %v2825_v38  ;;  %v2833_v40 = vld [vmem:[#allocation10 + $0x68] sm:$0xff] }
 0x101   :  { %v657_v43 = vmax.f32 %v333_v39, 0.0  ;;  %2200 = vmatpush.bf16.msrb.mxu3 %v2833_v40 }
 0x102   :  { %v658_v45 = vmax.f32 %v502_v41, 0.0 }
 0x103   :  { %v3251_v48 = vpack.c.bf16 %v657_v43, %v655_v42 }
 0x104   :  { %v3253_v51 = vpack.c.bf16 %v658_v45, %v656_v44 }
 0x105   :  { %1057 = vmatmul.bf16.gmra.mxu2 %v3251_v48 }
 0x106   :  { %1226 = vmatmul.bf16.gmra.mxu3 %v3253_v51  ;;  %v335_v53 = vpop.f32.mrf.mxu0 }
 0x107   :  { %v504_v54 = vpop.f32.mrf.mxu1  ;;  %v336_v55 = vadd.f32 %v335_v53, %v3203_v18 }
 0x108   :  { %v505_v56 = vadd.f32 %v504_v54, %v3205_v19 }
 0x109   :  { %374 = vmatmul.bf16.gmra.mxu0 %v180_v52  ;;  %v659_v61 = vmax.f32 %v336_v55, 0.0  ;;  %v135_v55 = vld [vmem:[#allocation2 + $0x100] sm:$0xff] }
 0x10a   :  { %543 = vmatmul.bf16.gmra.mxu1 %v180_v52  ;;  %v660_v63 = vmax.f32 %v505_v56, 0.0  ;;  %v136_v56 = vld [vmem:[#allocation2 + $0x108] sm:$0xff] }
 0x10e   :  { %v337_v57 = vpop.f32.mrf.mxu0 }
 0x10f   :  { %v338_v58 = vadd.f32 %v337_v57, %v3203_v18  ;;  %v506_v59 = vpop.f32.mrf.mxu1 }
 0x110   :  { %v507_v60 = vadd.f32 %v506_v59, %v3205_v19  ;;  %v183_v59 = vpack.c.bf16 %v136_v56, %v135_v55 }
 0x111   :  { %v661_v62 = vmax.f32 %v338_v58, 0.0 }
 0x112   :  { %v662_v0 = vmax.f32 %v507_v60, 0.0 }
 0x113   :  { %v3261_v3 = vpack.c.bf16 %v661_v62, %v659_v61 }
 0x114   :  { %v3263_v4 = vpack.c.bf16 %v662_v0, %v660_v63 }
 0x115   :  { %1062 = vmatmul.bf16.gmra.mxu2 %v3261_v3 }
 0x116   :  { %1231 = vmatmul.bf16.gmra.mxu3 %v3263_v4  ;;  %v340_v6 = vpop.f32.mrf.mxu0 }
 0x117   :  { %v509_v7 = vpop.f32.mrf.mxu1  ;;  %v341_v16 = vadd.f32 %v340_v6, %v3203_v18 }
 0x118   :  { %v510_v17 = vadd.f32 %v509_v7, %v3205_v19 }
 0x119   :  { %379 = vmatmul.bf16.gmra.mxu0 %v181_v5  ;;  %v663_v24 = vmax.f32 %v341_v16, 0.0 }
 0x11a   :  { %548 = vmatmul.bf16.gmra.mxu1 %v181_v5  ;;  %v664_v26 = vmax.f32 %v510_v17, 0.0  ;;  %v3299_v17 = vperm.slane %v863_v12, 0 }
 0x11e   :  { %v342_v20 = vpop.f32.mrf.mxu0 }
 0x11f   :  { %v343_v21 = vadd.f32 %v342_v20, %v3203_v18  ;;  %v511_v22 = vpop.f32.mrf.mxu1  ;;  %v184_v20 = vpack.c.bf16 %v138_v14, %v137_v13  ;;  %v2808_v13 = vld [vmem:[#allocation8 + $0xa4] sm:$0xf]  ;;  %v2664_v14 = vld [vmem:[#allocation8 + $0xa8] sm:$0xf0] }
 0x120   :  { %v512_v23 = vadd.f32 %v511_v22, %v3205_v19 }
 0x121   :  { %v665_v25 = vmax.f32 %v343_v21, 0.0 }
 0x122   :  { %v666_v27 = vmax.f32 %v512_v23, 0.0 }
 0x123   :  { %v3271_v34 = vpack.c.bf16 %v665_v25, %v663_v24 }
 0x124   :  { %v3273_v35 = vpack.c.bf16 %v666_v27, %v664_v26 }
 0x125   :  { %1067 = vmatmul.bf16.gmra.mxu2 %v3271_v34 }
 0x126   :  { %1236 = vmatmul.bf16.gmra.mxu3 %v3273_v35  ;;  %v345_v37 = vpop.f32.mrf.mxu0 }
 0x127   :  { %v514_v39 = vpop.f32.mrf.mxu1  ;;  %v346_v41 = vadd.f32 %v345_v37, %v3203_v18 }
 0x128   :  { %v515_v42 = vadd.f32 %v514_v39, %v3205_v19 }
 0x129   :  { %384 = vmatmul.bf16.gmra.mxu0 %v182_v36  ;;  %v667_v47 = vmax.f32 %v346_v41, 0.0 }
 0x12a   :  { %553 = vmatmul.bf16.gmra.mxu1 %v182_v36  ;;  %v668_v53 = vmax.f32 %v515_v42, 0.0 }
 0x12e   :  { %v347_v43 = vpop.f32.mrf.mxu0 }
 0x12f   :  { %v348_v44 = vadd.f32 %v347_v43, %v3203_v18  ;;  %v516_v45 = vpop.f32.mrf.mxu1 }
 0x130   :  { %v517_v46 = vadd.f32 %v516_v45, %v3205_v19 }
 0x131   :  { %v669_v52 = vmax.f32 %v348_v44, 0.0 }
 0x132   :  { %v670_v54 = vmax.f32 %v517_v46, 0.0  ;;  %v139_v46 = vld [vmem:[#allocation2 + $0x120] sm:$0xff] }
 0x133   :  { %v3281_v57 = vpack.c.bf16 %v669_v52, %v667_v47  ;;  %v140_v47 = vld [vmem:[#allocation2 + $0x128] sm:$0xff] }
 0x134   :  { %v3283_v58 = vpack.c.bf16 %v670_v54, %v668_v53 }
 0x135   :  { %1072 = vmatmul.bf16.gmra.mxu2 %v3281_v57 }
 0x136   :  { %1241 = vmatmul.bf16.gmra.mxu3 %v3283_v58  ;;  %v350_v60 = vpop.f32.mrf.mxu0 }
 0x137   :  { %v519_v61 = vpop.f32.mrf.mxu1  ;;  %v351_v62 = vadd.f32 %v350_v60, %v3203_v18 }
 0x138   :  { %v520_v63 = vadd.f32 %v519_v61, %v3205_v19 }
 0x139   :  { %389 = vmatmul.bf16.gmra.mxu0 %v183_v59  ;;  %v671_v6 = vmax.f32 %v351_v62, 0.0 }
 0x13a   :  { %558 = vmatmul.bf16.gmra.mxu1 %v183_v59  ;;  %v672_v10 = vmax.f32 %v520_v63, 0.0  ;;  %v185_v59 = vpack.c.bf16 %v140_v47, %v139_v46  ;;  %v2824_v46 = vld [vmem:[#allocation10 + $0x20] sm:$0xff] }
 0x13b   :  { %2032 = vmatpush.bf16.msrb.mxu2 %v2824_v46 }
 0x13e   :  { %v352_v0 = vpop.f32.mrf.mxu0 }
 0x13f   :  { %v353_v1 = vadd.f32 %v352_v0, %v3203_v18  ;;  %v521_v2 = vpop.f32.mrf.mxu1 }
 0x140   :  { %v522_v5 = vadd.f32 %v521_v2, %v3205_v19 }
 0x141   :  { %v673_v7 = vmax.f32 %v353_v1, 0.0 }
 0x142   :  { %v674_v11 = vmax.f32 %v522_v5, 0.0 }
 0x143   :  { %v3294_v15 = vpack.c.bf16 %v673_v7, %v671_v6  ;;  %v2792_v6 = vld [vmem:[#allocation8 + $0x24] sm:$0xf]  ;;  %v2600_v7 = vld [vmem:[#allocation8 + $0x28] sm:$0xf0] }
 0x144   :  { %v3296_v16 = vpack.c.bf16 %v674_v11, %v672_v10  ;;  %v2603_v12 = vor.u32 %v2792_v6, %v2600_v7 }
 0x145   :  { %1077 = vmatmul.bf16.gmra.mxu2 %v3294_v15 }
 0x146   :  { %1246 = vmatmul.bf16.gmra.mxu3 %v3296_v16  ;;  %v355_v21 = vpop.f32.mrf.mxu0  ;;  %1372 = vmatpush.bf16.msrb.mxu0 %v2603_v12 }
 0x147   :  { %v524_v22 = vpop.f32.mrf.mxu1  ;;  %v356_v27 = vadd.f32 %v355_v21, %v3203_v18 }
 0x148   :  { %v1038_v23 = vpop.f32.mrf.mxu2  ;;  %v525_v28 = vadd.f32 %v524_v22, %v3205_v19  ;;  %v2667_v22 = vor.u32 %v2808_v13, %v2664_v14 }
 0x149   :  { %v1039_v24 = vadd.f32 %v1038_v23, %v3299_v17  ;;  %v1207_v25 = vpop.f32.mrf.mxu3  ;;  %394 = vmatmul.bf16.gmra.mxu0 %v184_v20  ;;  %v675_v40 = vmax.f32 %v356_v27, 0.0 }
 0x14a   :  { %563 = vmatmul.bf16.gmra.mxu1 %v184_v20  ;;  %v676_v44 = vmax.f32 %v525_v28, 0.0 }
 0x14b   :  { %v1208_v26 = vadd.f32 %v1207_v25, %v1039_v24  ;;  %1541 = vmatpush.bf16.msrb.mxu1 %v2667_v22  ;;  %v144_v22 = vld [vmem:[#allocation2 + $0x148] sm:$0xff] }
 0x14d   :  { %v1705_v55 = vmax.f32 %v1208_v26, 0.0 }
 0x14e   :  { %v357_v31 = vpop.f32.mrf.mxu0 }
 0x14f   :  { %v358_v36 = vadd.f32 %v357_v31, %v3203_v18  ;;  %v526_v37 = vpop.f32.mrf.mxu1 }
 0x150   :  { %v527_v38 = vadd.f32 %v526_v37, %v3205_v19  ;;  %v1040_v39 = vpop.f32.mrf.mxu2  ;;  %v141_v37 = vld [vmem:[#allocation2 + $0x130] sm:$0xff] }
 0x151   :  { %v677_v41 = vmax.f32 %v358_v36, 0.0  ;;  %v1041_v42 = vadd.f32 %v1040_v39, %v3299_v17  ;;  %v1209_v43 = vpop.f32.mrf.mxu3 }
 0x152   :  { %v678_v45 = vmax.f32 %v527_v38, 0.0  ;;  %v142_v38 = vld [vmem:[#allocation2 + $0x138] sm:$0xff] }
 0x153   :  { %v1210_v52 = vadd.f32 %v1209_v43, %v1041_v42  ;;  %v3308_v53 = vpack.c.bf16 %v677_v41, %v675_v40 }
 0x154   :  { %v3310_v54 = vpack.c.bf16 %v678_v45, %v676_v44  ;;  %v186_v44 = vpack.c.bf16 %v142_v38, %v141_v37 }
 0x155   :  { %v1707_v56 = vmax.f32 %v1210_v52, 0.0  ;;  %1082 = vmatmul.bf16.gmra.mxu2 %v3308_v53 }
 0x156   :  { %1251 = vmatmul.bf16.gmra.mxu3 %v3310_v54  ;;  %v360_v60 = vpop.f32.mrf.mxu0 }
 0x157   :  { %v3314_v61 = vpack.c.bf16 %v1707_v56, %v1705_v55  ;;  %v529_v62 = vpop.f32.mrf.mxu1  ;;  %v361_v5 = vadd.f32 %v360_v60, %v3203_v18  ;;  %v2832_v60 = vld [vmem:[#allocation10 + $0x60] sm:$0xff] }
 0x158   :  { %v1043_v63 = vpop.f32.mrf.mxu2  ;;  %v530_v10 = vadd.f32 %v529_v62, %v3205_v19  ;;  %2201 = vmatpush.bf16.msrb.mxu3 %v2832_v60 }
 0x159   :  { %v1044_v0 = vadd.f32 %v1043_v63, %v3299_v17  ;;  %v1212_v1 = vpop.f32.mrf.mxu3  ;;  %399 = vmatmul.bf16.gmra.mxu0 %v185_v59  ;;  %v679_v25 = vmax.f32 %v361_v5, 0.0 }
 0x15a   :  { %568 = vmatmul.bf16.gmra.mxu1 %v185_v59  ;;  %v680_v31 = vmax.f32 %v530_v10, 0.0 }
 0x15b   :  { %v1213_v2 = vadd.f32 %v1212_v1, %v1044_v0 }
 0x15d   :  { %v1709_v42 = vmax.f32 %v1213_v2, 0.0 }
 0x15e   :  { %v362_v11 = vpop.f32.mrf.mxu0 }
 0x15f   :  { %v363_v20 = vadd.f32 %v362_v11, %v3203_v18  ;;  %v531_v21 = vpop.f32.mrf.mxu1 }
 0x160   :  { %v532_v23 = vadd.f32 %v531_v21, %v3205_v19  ;;  %v1045_v24 = vpop.f32.mrf.mxu2  ;;  %v143_v21 = vld [vmem:[#allocation2 + $0x140] sm:$0xff] }
 0x161   :  { %v681_v26 = vmax.f32 %v363_v20, 0.0  ;;  %v1046_v27 = vadd.f32 %v1045_v24, %v3299_v17  ;;  %v1214_v28 = vpop.f32.mrf.mxu3 }
 0x162   :  { %v682_v36 = vmax.f32 %v532_v23, 0.0 }
 0x163   :  { %v1215_v39 = vadd.f32 %v1214_v28, %v1046_v27  ;;  %v3322_v40 = vpack.c.bf16 %v681_v26, %v679_v25  ;;  %v187_v28 = vpack.c.bf16 %v144_v22, %v143_v21 }
 0x164   :  { %v3324_v41 = vpack.c.bf16 %v682_v36, %v680_v31 }
 0x165   :  { %v1711_v43 = vmax.f32 %v1215_v39, 0.0  ;;  %1087 = vmatmul.bf16.gmra.mxu2 %v3322_v40 }
 0x166   :  { %1256 = vmatmul.bf16.gmra.mxu3 %v3324_v41  ;;  %v365_v45 = vpop.f32.mrf.mxu0 }
 0x167   :  { %v534_v47 = vpop.f32.mrf.mxu1  ;;  %v3328_v52 = vpack.c.bf16 %v1711_v43, %v1709_v42  ;;  %v366_v63 = vadd.f32 %v365_v45, %v3203_v18 }
 0x168   :  { %v1048_v55 = vpop.f32.mrf.mxu2  ;;  %v535_v0 = vadd.f32 %v534_v47, %v3205_v19 }
 0x169   :  { %v1049_v56 = vadd.f32 %v1048_v55, %v3299_v17  ;;  %v1217_v59 = vpop.f32.mrf.mxu3  ;;  %404 = vmatmul.bf16.gmra.mxu0 %v186_v44  ;;  %v683_v10 = vmax.f32 %v366_v63, 0.0 }
 0x16a   :  { %573 = vmatmul.bf16.gmra.mxu1 %v186_v44  ;;  %v684_v14 = vmax.f32 %v535_v0, 0.0 }
 0x16b   :  { %v1218_v62 = vadd.f32 %v1217_v59, %v1049_v56 }
 0x16d   :  { %v1713_v26 = vmax.f32 %v1218_v62, 0.0 }
 0x16e   :  { %v367_v1 = vpop.f32.mrf.mxu0 }
 0x16f   :  { %v368_v2 = vadd.f32 %v367_v1, %v3203_v18  ;;  %v536_v5 = vpop.f32.mrf.mxu1 }
 0x170   :  { %v537_v6 = vadd.f32 %v536_v5, %v3205_v19  ;;  %v1050_v7 = vpop.f32.mrf.mxu2  ;;  %v145_v5 = vld [vmem:[#allocation2 + $0x150] sm:$0xff] }
 0x171   :  { %v685_v11 = vmax.f32 %v368_v2, 0.0  ;;  %v1051_v12 = vadd.f32 %v1050_v7, %v3299_v17  ;;  %v1219_v13 = vpop.f32.mrf.mxu3 }
 0x172   :  { %v686_v20 = vmax.f32 %v537_v6, 0.0  ;;  %v146_v6 = vld [vmem:[#allocation2 + $0x158] sm:$0xff] }
 0x173   :  { %v1220_v23 = vadd.f32 %v1219_v13, %v1051_v12  ;;  %v3336_v24 = vpack.c.bf16 %v685_v11, %v683_v10 }
 0x174   :  { %v3338_v25 = vpack.c.bf16 %v686_v20, %v684_v14  ;;  %v188_v14 = vpack.c.bf16 %v146_v6, %v145_v5 }
 0x175   :  { %v1715_v27 = vmax.f32 %v1220_v23, 0.0  ;;  %1092 = vmatmul.bf16.gmra.mxu2 %v3336_v24 }
 0x176   :  { %1261 = vmatmul.bf16.gmra.mxu3 %v3338_v25  ;;  %v370_v31 = vpop.f32.mrf.mxu0 }
 0x177   :  { %v539_v36 = vpop.f32.mrf.mxu1  ;;  %v3342_v37 = vpack.c.bf16 %v1715_v27, %v1713_v26  ;;  %v371_v44 = vadd.f32 %v370_v31, %v3203_v18 }
 0x178   :  { %v1053_v38 = vpop.f32.mrf.mxu2  ;;  %v540_v45 = vadd.f32 %v539_v36, %v3205_v19 }
 0x179   :  { %v1054_v39 = vadd.f32 %v1053_v38, %v3299_v17  ;;  %v1222_v42 = vpop.f32.mrf.mxu3  ;;  %409 = vmatmul.bf16.gmra.mxu0 %v187_v28  ;;  %v687_v60 = vmax.f32 %v371_v44, 0.0 }
 0x17a   :  { %578 = vmatmul.bf16.gmra.mxu1 %v187_v28  ;;  %v688_v1 = vmax.f32 %v540_v45, 0.0 }
 0x17b   :  { %v1223_v43 = vadd.f32 %v1222_v42, %v1054_v39 }
 0x17d   :  { %v1717_v12 = vmax.f32 %v1223_v43, 0.0 }
 0x17e   :  { %v372_v46 = vpop.f32.mrf.mxu0 }
 0x17f   :  { %v373_v47 = vadd.f32 %v372_v46, %v3203_v18  ;;  %v541_v55 = vpop.f32.mrf.mxu1 }
 0x180   :  { %v542_v56 = vadd.f32 %v541_v55, %v3205_v19  ;;  %v1055_v59 = vpop.f32.mrf.mxu2 }
 0x181   :  { %v689_v62 = vmax.f32 %v373_v47, 0.0  ;;  %v1056_v63 = vadd.f32 %v1055_v59, %v3299_v17  ;;  %v1224_v0 = vpop.f32.mrf.mxu3 }
 0x182   :  { %v690_v2 = vmax.f32 %v542_v56, 0.0 }
 0x183   :  { %v1225_v7 = vadd.f32 %v1224_v0, %v1056_v63  ;;  %v3350_v10 = vpack.c.bf16 %v689_v62, %v687_v60  ;;  %v147_v60 = vld [vmem:[#allocation2 + $0x160] sm:$0xff]  ;;  %v148_v62 = vld [vmem:[#allocation2 + $0x168] sm:$0xff] }
 0x184   :  { %v3352_v11 = vpack.c.bf16 %v690_v2, %v688_v1  ;;  %v189_v6 = vpack.c.bf16 %v148_v62, %v147_v60 }
 0x185   :  { %v1719_v13 = vmax.f32 %v1225_v7, 0.0  ;;  %1097 = vmatmul.bf16.gmra.mxu2 %v3350_v10 }
 0x186   :  { %1266 = vmatmul.bf16.gmra.mxu3 %v3352_v11  ;;  %v375_v20 = vpop.f32.mrf.mxu0 }
 0x187   :  { %v544_v21 = vpop.f32.mrf.mxu1  ;;  %v3356_v22 = vpack.c.bf16 %v1719_v13, %v1717_v12  ;;  %v376_v31 = vadd.f32 %v375_v20, %v3203_v18 }
 0x188   :  { %v1058_v23 = vpop.f32.mrf.mxu2  ;;  %v545_v36 = vadd.f32 %v544_v21, %v3205_v19 }
 0x189   :  { %v1059_v26 = vadd.f32 %v1058_v23, %v3299_v17  ;;  %v1227_v27 = vpop.f32.mrf.mxu3  ;;  %414 = vmatmul.bf16.gmra.mxu0 %v188_v14  ;;  %v691_v45 = vmax.f32 %v376_v31, 0.0 }
 0x18a   :  { %583 = vmatmul.bf16.gmra.mxu1 %v188_v14  ;;  %v692_v56 = vmax.f32 %v545_v36, 0.0 }
 0x18b   :  { %v1228_v28 = vadd.f32 %v1227_v27, %v1059_v26  ;;  %v2790_v27 = vld [vmem:[#allocation8 + $0x14] sm:$0xf] }
 0x18d   :  { %v1721_v2 = vmax.f32 %v1228_v28, 0.0  ;;  %v2592_v28 = vld [vmem:[#allocation8 + $0x18] sm:$0xf0] }
 0x18e   :  { %v377_v38 = vpop.f32.mrf.mxu0 }
 0x18f   :  { %v378_v39 = vadd.f32 %v377_v38, %v3203_v18  ;;  %v546_v42 = vpop.f32.mrf.mxu1  ;;  %v2595_v38 = vor.u32 %v2790_v27, %v2592_v28  ;;  %v2823_v27 = vld [vmem:[#allocation10 + $0x18] sm:$0xff] }
 0x190   :  { %v547_v43 = vadd.f32 %v546_v42, %v3205_v19  ;;  %v1060_v44 = vpop.f32.mrf.mxu2  ;;  %v2656_v42 = vld [vmem:[#allocation8 + $0x98] sm:$0xf0]  ;;  %2033 = vmatpush.bf16.msrb.mxu2 %v2823_v27 }
 0x191   :  { %v693_v46 = vmax.f32 %v378_v39, 0.0  ;;  %v1061_v47 = vadd.f32 %v1060_v44, %v3299_v17  ;;  %v1229_v55 = vpop.f32.mrf.mxu3  ;;  %v2806_v39 = vld [vmem:[#allocation8 + $0x94] sm:$0xf]  ;;  %1373 = vmatpush.bf16.msrb.mxu0 %v2595_v38 }
 0x192   :  { %v694_v59 = vmax.f32 %v547_v43, 0.0 }
 0x193   :  { %v1230_v63 = vadd.f32 %v1229_v55, %v1061_v47  ;;  %v3364_v0 = vpack.c.bf16 %v693_v46, %v691_v45  ;;  %v2659_v45 = vor.u32 %v2806_v39, %v2656_v42  ;;  %v2831_v42 = vld [vmem:[#allocation10 + $0x58] sm:$0xff] }
 0x194   :  { %v3366_v1 = vpack.c.bf16 %v694_v59, %v692_v56  ;;  %2202 = vmatpush.bf16.msrb.mxu3 %v2831_v42 }
 0x195   :  { %v1723_v5 = vmax.f32 %v1230_v63, 0.0  ;;  %1102 = vmatmul.bf16.gmra.mxu2 %v3364_v0  ;;  %1542 = vmatpush.bf16.msrb.mxu1 %v2659_v45 }
 0x196   :  { %1271 = vmatmul.bf16.gmra.mxu3 %v3366_v1  ;;  %v380_v7 = vpop.f32.mrf.mxu0 }
 0x197   :  { %v549_v12 = vpop.f32.mrf.mxu1  ;;  %v3370_v13 = vpack.c.bf16 %v1723_v5, %v1721_v2  ;;  %v381_v26 = vadd.f32 %v380_v7, %v3203_v18  ;;  %v149_v2 = vld [vmem:[#allocation2 + $0x170] sm:$0xff]  ;;  %v150_v5 = vld [vmem:[#allocation2 + $0x178] sm:$0xff] }
 0x198   :  { %v1063_v14 = vpop.f32.mrf.mxu2  ;;  %v550_v31 = vadd.f32 %v549_v12, %v3205_v19 }
 0x199   :  { %v1064_v20 = vadd.f32 %v1063_v14, %v3299_v17  ;;  %v1232_v21 = vpop.f32.mrf.mxu3  ;;  %419 = vmatmul.bf16.gmra.mxu0 %v189_v6  ;;  %v695_v55 = vmax.f32 %v381_v26, 0.0 }
 0x19a   :  { %588 = vmatmul.bf16.gmra.mxu1 %v189_v6  ;;  %v696_v62 = vmax.f32 %v550_v31, 0.0 }
 0x19b   :  { %v1233_v23 = vadd.f32 %v1232_v21, %v1064_v20  ;;  %v190_v21 = vpack.c.bf16 %v150_v5, %v149_v2 }
 0x19d   :  { %v1725_v14 = vmax.f32 %v1233_v23, 0.0 }
 0x19e   :  { %v382_v36 = vpop.f32.mrf.mxu0 }
 0x19f   :  { %v383_v43 = vadd.f32 %v382_v36, %v3203_v18  ;;  %v551_v44 = vpop.f32.mrf.mxu1 }
 0x1a0   :  { %v552_v46 = vadd.f32 %v551_v44, %v3205_v19  ;;  %v1065_v47 = vpop.f32.mrf.mxu2 }
 0x1a1   :  { %v697_v56 = vmax.f32 %v383_v43, 0.0  ;;  %v1066_v59 = vadd.f32 %v1065_v47, %v3299_v17  ;;  %v1234_v60 = vpop.f32.mrf.mxu3 }
 0x1a2   :  { %v698_v63 = vmax.f32 %v552_v46, 0.0 }
 0x1a3   :  { %v1235_v6 = vadd.f32 %v1234_v60, %v1066_v59  ;;  %v3378_v7 = vpack.c.bf16 %v697_v56, %v695_v55 }
 0x1a4   :  { %v3380_v12 = vpack.c.bf16 %v698_v63, %v696_v62 }
 0x1a5   :  { %v1727_v20 = vmax.f32 %v1235_v6, 0.0  ;;  %1107 = vmatmul.bf16.gmra.mxu2 %v3378_v7  ;;  %v151_v6 = vld [vmem:[#allocation2 + $0x180] sm:$0xff] }
 0x1a6   :  { %1276 = vmatmul.bf16.gmra.mxu3 %v3380_v12  ;;  %v385_v26 = vpop.f32.mrf.mxu0 }
 0x1a7   :  { %v554_v28 = vpop.f32.mrf.mxu1  ;;  %v3384_v36 = vpack.c.bf16 %v1727_v20, %v1725_v14  ;;  %v386_v43 = vadd.f32 %v385_v26, %v3203_v18  ;;  %v152_v14 = vld [vmem:[#allocation2 + $0x188] sm:$0xff] }
 0x1a8   :  { %v1068_v31 = vpop.f32.mrf.mxu2  ;;  %v555_v44 = vadd.f32 %v554_v28, %v3205_v19 }
 0x1a9   :  { %v1069_v38 = vadd.f32 %v1068_v31, %v3299_v17  ;;  %v1237_v39 = vpop.f32.mrf.mxu3  ;;  %424 = vmatmul.bf16.gmra.mxu0 %v190_v21  ;;  %v699_v59 = vmax.f32 %v386_v43, 0.0  ;;  %v191_v31 = vpack.c.bf16 %v152_v14, %v151_v6 }
 0x1aa   :  { %593 = vmatmul.bf16.gmra.mxu1 %v190_v21  ;;  %v700_v2 = vmax.f32 %v555_v44, 0.0 }
 0x1ab   :  { %v1238_v23 = vadd.f32 %v1237_v39, %v1069_v38 }
 0x1ad   :  { %v1729_v27 = vmax.f32 %v1238_v23, 0.0 }
 0x1ae   :  { %v387_v45 = vpop.f32.mrf.mxu0 }
 0x1af   :  { %v388_v46 = vadd.f32 %v387_v45, %v3203_v18  ;;  %v556_v47 = vpop.f32.mrf.mxu1 }
 0x1b0   :  { %v557_v55 = vadd.f32 %v556_v47, %v3205_v19  ;;  %v1070_v56 = vpop.f32.mrf.mxu2 }
 0x1b1   :  { %v701_v60 = vmax.f32 %v388_v46, 0.0  ;;  %v1071_v62 = vadd.f32 %v1070_v56, %v3299_v17  ;;  %v1239_v63 = vpop.f32.mrf.mxu3 }
 0x1b2   :  { %v702_v5 = vmax.f32 %v557_v55, 0.0 }
 0x1b3   :  { %v1240_v20 = vadd.f32 %v1239_v63, %v1071_v62  ;;  %v3392_v21 = vpack.c.bf16 %v701_v60, %v699_v59 }
 0x1b4   :  { %v3394_v26 = vpack.c.bf16 %v702_v5, %v700_v2 }
 0x1b5   :  { %v1731_v28 = vmax.f32 %v1240_v20, 0.0  ;;  %1112 = vmatmul.bf16.gmra.mxu2 %v3392_v21 }
 0x1b6   :  { %1281 = vmatmul.bf16.gmra.mxu3 %v3394_v26  ;;  %v390_v38 = vpop.f32.mrf.mxu0 }
 0x1b7   :  { %v559_v39 = vpop.f32.mrf.mxu1  ;;  %v3398_v42 = vpack.c.bf16 %v1731_v28, %v1729_v27  ;;  %v391_v47 = vadd.f32 %v390_v38, %v3203_v18  ;;  %v153_v27 = vld [vmem:[#allocation2 + $0x190] sm:$0xff]  ;;  %v154_v28 = vld [vmem:[#allocation2 + $0x198] sm:$0xff] }
 0x1b8   :  { %v1073_v43 = vpop.f32.mrf.mxu2  ;;  %v560_v23 = vadd.f32 %v559_v39, %v3205_v19 }
 0x1b9   :  { %v1074_v44 = vadd.f32 %v1073_v43, %v3299_v17  ;;  %v1242_v45 = vpop.f32.mrf.mxu3  ;;  %429 = vmatmul.bf16.gmra.mxu0 %v191_v31  ;;  %v703_v63 = vmax.f32 %v391_v47, 0.0 }
 0x1ba   :  { %598 = vmatmul.bf16.gmra.mxu1 %v191_v31  ;;  %v704_v14 = vmax.f32 %v560_v23, 0.0 }
 0x1bb   :  { %v1243_v46 = vadd.f32 %v1242_v45, %v1074_v44  ;;  %v192_v45 = vpack.c.bf16 %v154_v28, %v153_v27 }
 0x1bd   :  { %v1733_v43 = vmax.f32 %v1243_v46, 0.0 }
 0x1be   :  { %v392_v55 = vpop.f32.mrf.mxu0 }
 0x1bf   :  { %v393_v56 = vadd.f32 %v392_v55, %v3203_v18  ;;  %v561_v59 = vpop.f32.mrf.mxu1 }
 0x1c0   :  { %v562_v60 = vadd.f32 %v561_v59, %v3205_v19  ;;  %v1075_v62 = vpop.f32.mrf.mxu2 }
 0x1c1   :  { %v705_v2 = vmax.f32 %v393_v56, 0.0  ;;  %v1076_v5 = vadd.f32 %v1075_v62, %v3299_v17  ;;  %v1244_v6 = vpop.f32.mrf.mxu3 }
 0x1c2   :  { %v706_v20 = vmax.f32 %v562_v60, 0.0 }
 0x1c3   :  { %v1245_v31 = vadd.f32 %v1244_v6, %v1076_v5  ;;  %v3406_v38 = vpack.c.bf16 %v705_v2, %v703_v63 }
 0x1c4   :  { %v3408_v39 = vpack.c.bf16 %v706_v20, %v704_v14 }
 0x1c5   :  { %3936 = vst [vmem:[#allocation16_spill] sm:$0xff] %v3406_v38  ;;  %v1735_v44 = vmax.f32 %v1245_v31, 0.0  ;;  %1117 = vmatmul.bf16.gmra.mxu2 %v3406_v38 }
 0x1c6   :  { %3937 = vst [vmem:[#allocation17_spill] sm:$0xff] %v3408_v39  ;;  %1286 = vmatmul.bf16.gmra.mxu3 %v3408_v39  ;;  %v395_v47 = vpop.f32.mrf.mxu0 }
 0x1c7   :  { %v564_v55 = vpop.f32.mrf.mxu1  ;;  %v3412_v56 = vpack.c.bf16 %v1735_v44, %v1733_v43  ;;  %v396_v63 = vadd.f32 %v395_v47, %v3203_v18 }
 0x1c8   :  { %v1078_v23 = vpop.f32.mrf.mxu2  ;;  %v565_v46 = vadd.f32 %v564_v55, %v3205_v19 }
 0x1c9   :  { %3938 = vst [vmem:[#allocation18_spill] sm:$0xff] %v3412_v56  ;;  %v1079_v59 = vadd.f32 %v1078_v23, %v3299_v17  ;;  %v1247_v60 = vpop.f32.mrf.mxu3  ;;  %434 = vmatmul.bf16.gmra.mxu0 %v192_v45  ;;  %v707_v27 = vmax.f32 %v396_v63, 0.0 }
 0x1ca   :  { %603 = vmatmul.bf16.gmra.mxu1 %v192_v45  ;;  %v708_v44 = vmax.f32 %v565_v46, 0.0  ;;  %v155_v45 = vld [vmem:[#allocation2 + $0x1a0] sm:$0xff] }
 0x1cb   :  { %v1248_v62 = vadd.f32 %v1247_v60, %v1079_v59  ;;  %v156_v59 = vld [vmem:[#allocation2 + $0x1a8] sm:$0xff] }
 0x1cd   :  { %v1737_v39 = vmax.f32 %v1248_v62, 0.0  ;;  %v2788_v62 = vld [vmem:[#allocation8 + $0x4] sm:$0xf] }
 0x1ce   :  { %v397_v2 = vpop.f32.mrf.mxu0 }
 0x1cf   :  { %v398_v5 = vadd.f32 %v397_v2, %v3203_v18  ;;  %v566_v6 = vpop.f32.mrf.mxu1 }
 0x1d0   :  { %v567_v14 = vadd.f32 %v566_v6, %v3205_v19  ;;  %v1080_v20 = vpop.f32.mrf.mxu2  ;;  %v193_v6 = vpack.c.bf16 %v156_v59, %v155_v45  ;;  %v2804_v45 = vld [vmem:[#allocation8 + $0x84] sm:$0xf]  ;;  %v2648_v59 = vld [vmem:[#allocation8 + $0x88] sm:$0xf0] }
 0x1d1   :  { %v709_v28 = vmax.f32 %v398_v5, 0.0  ;;  %v1081_v31 = vadd.f32 %v1080_v20, %v3299_v17  ;;  %v1249_v43 = vpop.f32.mrf.mxu3 }
 0x1d2   :  { %v710_v23 = vmax.f32 %v567_v14, 0.0 }
 0x1d3   :  { %v1250_v60 = vadd.f32 %v1249_v43, %v1081_v31  ;;  %v3420_v47 = vpack.c.bf16 %v709_v28, %v707_v27  ;;  %v2584_v31 = vld [vmem:[#allocation8 + $0x8] sm:$0xf0] }
 0x1d4   :  { %v3422_v55 = vpack.c.bf16 %v710_v23, %v708_v44  ;;  %v2587_v23 = vor.u32 %v2788_v62, %v2584_v31  ;;  %v158_v62 = vld [vmem:[#allocation2 + $0x1b8] sm:$0xff] }
 0x1d5   :  { %3939 = vst [vmem:[#allocation19_spill] sm:$0xff] %v3420_v47  ;;  %v1739_v2 = vmax.f32 %v1250_v60, 0.0  ;;  %1122 = vmatmul.bf16.gmra.mxu2 %v3420_v47 }
 0x1d6   :  { %3940 = vst [vmem:[#allocation20_spill] sm:$0xff] %v3422_v55  ;;  %1291 = vmatmul.bf16.gmra.mxu3 %v3422_v55  ;;  %v400_v63 = vpop.f32.mrf.mxu0  ;;  %1374 = vmatpush.bf16.msrb.mxu0 %v2587_v23 }
 0x1d7   :  { %v569_v5 = vpop.f32.mrf.mxu1  ;;  %v3426_v20 = vpack.c.bf16 %v1739_v2, %v1737_v39  ;;  %v401_v28 = vadd.f32 %v400_v63, %v3203_v18  ;;  %v2651_v2 = vor.u32 %v2804_v45, %v2648_v59 }
 0x1d8   :  { %v1083_v46 = vpop.f32.mrf.mxu2  ;;  %v570_v43 = vadd.f32 %v569_v5, %v3205_v19 }
 0x1d9   :  { %3941 = vst [vmem:[#allocation21_spill] sm:$0xff] %v3426_v20  ;;  %v1084_v14 = vadd.f32 %v1083_v46, %v3299_v17  ;;  %v1252_v38 = vpop.f32.mrf.mxu3  ;;  %439 = vmatmul.bf16.gmra.mxu0 %v193_v6  ;;  %1543 = vmatpush.bf16.msrb.mxu1 %v2651_v2  ;;  %v157_v20 = vld [vmem:[#allocation2 + $0x1b0] sm:$0xff] }
 0x1da   :  { %608 = vmatmul.bf16.gmra.mxu1 %v193_v6  ;;  %v711_v6 = vmax.f32 %v401_v28, 0.0  ;;  %v712_v47 = vmax.f32 %v570_v43, 0.0  ;;  %v194_v23 = vpack.c.bf16 %v158_v62, %v157_v20 }
 0x1db   :  { %v1253_v27 = vadd.f32 %v1252_v38, %v1084_v14 }
 0x1dd   :  { %v1741_v45 = vmax.f32 %v1253_v27, 0.0 }
 0x1de   :  { %v402_v44 = vpop.f32.mrf.mxu0 }
 0x1df   :  { %v403_v39 = vadd.f32 %v402_v44, %v3203_v18  ;;  %v571_v60 = vpop.f32.mrf.mxu1 }
 0x1e0   :  { %v572_v46 = vadd.f32 %v571_v60, %v3205_v19  ;;  %v1085_v55 = vpop.f32.mrf.mxu2 }
 0x1e1   :  { %v713_v38 = vmax.f32 %v403_v39, 0.0  ;;  %v1086_v63 = vadd.f32 %v1085_v55, %v3299_v17  ;;  %v1254_v14 = vpop.f32.mrf.mxu3  ;;  %v2822_v55 = vld [vmem:[#allocation10 + $0x10] sm:$0xff] }
 0x1e2   :  { %v714_v5 = vmax.f32 %v572_v46, 0.0  ;;  %2034 = vmatpush.bf16.msrb.mxu2 %v2822_v55 }
 0x1e3   :  { %v1255_v31 = vadd.f32 %v1254_v14, %v1086_v63  ;;  %v3434_v56 = vpack.c.bf16 %v713_v38, %v711_v6 }
 0x1e4   :  { %v3436_v44 = vpack.c.bf16 %v714_v5, %v712_v47  ;;  %v2830_v47 = vld [vmem:[#allocation10 + $0x50] sm:$0xff] }
 0x1e5   :  { %3942 = vst [vmem:[#allocation22_spill] sm:$0xff] %v3434_v56  ;;  %v1743_v59 = vmax.f32 %v1255_v31, 0.0  ;;  %1127 = vmatmul.bf16.gmra.mxu2 %v3434_v56  ;;  %2203 = vmatpush.bf16.msrb.mxu3 %v2830_v47 }
 0x1e6   :  { %3943 = vst [vmem:[#allocation23_spill] sm:$0xff] %v3436_v44  ;;  %1296 = vmatmul.bf16.gmra.mxu3 %v3436_v44  ;;  %v405_v28 = vpop.f32.mrf.mxu0 }
 0x1e7   :  { %v574_v39 = vpop.f32.mrf.mxu1  ;;  %v3440_v60 = vpack.c.bf16 %v1743_v59, %v1741_v45  ;;  %v406_v6 = vadd.f32 %v405_v28, %v3203_v18 }
 0x1e8   :  { %v1088_v43 = vpop.f32.mrf.mxu2  ;;  %v575_v20 = vadd.f32 %v574_v39, %v3205_v19 }
 0x1e9   :  { %v1089_v2 = vadd.f32 %v1088_v43, %v3299_v17  ;;  %v1257_v46 = vpop.f32.mrf.mxu3  ;;  %444 = vmatmul.bf16.gmra.mxu0 %v194_v23  ;;  %v715_v31 = vmax.f32 %v406_v6, 0.0 }
 0x1ea   :  { %613 = vmatmul.bf16.gmra.mxu1 %v194_v23  ;;  %v716_v23 = vmax.f32 %v575_v20, 0.0 }
 0x1eb   :  { %v1258_v27 = vadd.f32 %v1257_v46, %v1089_v2  ;;  %v159_v2 = vld [vmem:[#allocation2 + $0x1c0] sm:$0xff]  ;;  %v160_v46 = vld [vmem:[#allocation2 + $0x1c8] sm:$0xff] }
 0x1ed   :  { %v1745_v44 = vmax.f32 %v1258_v27, 0.0 }
 0x1ee   :  { %v407_v38 = vpop.f32.mrf.mxu0 }
 0x1ef   :  { %v408_v63 = vadd.f32 %v407_v38, %v3203_v18  ;;  %v576_v14 = vpop.f32.mrf.mxu1 }
 0x1f0   :  { %v577_v5 = vadd.f32 %v576_v14, %v3205_v19  ;;  %v1090_v62 = vpop.f32.mrf.mxu2  ;;  %v195_v14 = vpack.c.bf16 %v160_v46, %v159_v2 }
 0x1f1   :  { %v717_v45 = vmax.f32 %v408_v63, 0.0  ;;  %v1091_v59 = vadd.f32 %v1090_v62, %v3299_v17  ;;  %v1259_v55 = vpop.f32.mrf.mxu3 }
 0x1f2   :  { %v718_v43 = vmax.f32 %v577_v5, 0.0 }
 0x1f3   :  { %v1260_v47 = vadd.f32 %v1259_v55, %v1091_v59  ;;  %v3448_v28 = vpack.c.bf16 %v717_v45, %v715_v31 }
 0x1f4   :  { %v3450_v39 = vpack.c.bf16 %v718_v43, %v716_v23 }
 0x1f5   :  { %3944 = vst [vmem:[#allocation24_spill] sm:$0xff] %v3448_v28  ;;  %v1747_v38 = vmax.f32 %v1260_v47, 0.0  ;;  %1132 = vmatmul.bf16.gmra.mxu2 %v3448_v28 }
 0x1f6   :  { %3945 = vst [vmem:[#allocation25_spill] sm:$0xff] %v3450_v39  ;;  %1301 = vmatmul.bf16.gmra.mxu3 %v3450_v39  ;;  %v410_v6 = vpop.f32.mrf.mxu0 }
 0x1f7   :  { %v579_v63 = vpop.f32.mrf.mxu1  ;;  %v3454_v62 = vpack.c.bf16 %v1747_v38, %v1745_v44  ;;  %v411_v45 = vadd.f32 %v410_v6, %v3203_v18 }
 0x1f8   :  { %v1093_v20 = vpop.f32.mrf.mxu2  ;;  %v580_v27 = vadd.f32 %v579_v63, %v3205_v19 }
 0x1f9   :  { %3946 = vst [vmem:[#allocation26_spill] sm:$0xff] %v3454_v62  ;;  %v1094_v5 = vadd.f32 %v1093_v20, %v3299_v17  ;;  %v1262_v56 = vpop.f32.mrf.mxu3  ;;  %449 = vmatmul.bf16.gmra.mxu0 %v195_v14  ;;  %v719_v44 = vmax.f32 %v411_v45, 0.0 }
 0x1fa   :  { %618 = vmatmul.bf16.gmra.mxu1 %v195_v14  ;;  %v720_v20 = vmax.f32 %v580_v27, 0.0  ;;  %v161_v14 = vld [vmem:[#allocation2 + $0x1d0] sm:$0xff] }
 0x1fb   :  { %v1263_v31 = vadd.f32 %v1262_v56, %v1094_v5  ;;  %v162_v56 = vld [vmem:[#allocation2 + $0x1d8] sm:$0xff] }
 0x1fd   :  { %v1749_v28 = vmax.f32 %v1263_v31, 0.0 }
 0x1fe   :  { %v412_v59 = vpop.f32.mrf.mxu0 }
 0x1ff   :  { %v413_v55 = vadd.f32 %v412_v59, %v3203_v18  ;;  %v581_v23 = vpop.f32.mrf.mxu1 }
 0x200   :  { %v582_v43 = vadd.f32 %v581_v23, %v3205_v19  ;;  %v1095_v2 = vpop.f32.mrf.mxu2  ;;  %v196_v23 = vpack.c.bf16 %v162_v56, %v161_v14 }
 0x201   :  { %v721_v46 = vmax.f32 %v413_v55, 0.0  ;;  %v1096_v47 = vadd.f32 %v1095_v2, %v3299_v17  ;;  %v1264_v38 = vpop.f32.mrf.mxu3 }
 0x202   :  { %v722_v39 = vmax.f32 %v582_v43, 0.0 }
 0x203   :  { %v1265_v5 = vadd.f32 %v1264_v38, %v1096_v47  ;;  %v3462_v6 = vpack.c.bf16 %v721_v46, %v719_v44 }
 0x204   :  { %v3464_v63 = vpack.c.bf16 %v722_v39, %v720_v20 }
 0x205   :  { %3947 = vst [vmem:[#allocation27_spill] sm:$0xff] %v3462_v6  ;;  %v1751_v59 = vmax.f32 %v1265_v5, 0.0  ;;  %1137 = vmatmul.bf16.gmra.mxu2 %v3462_v6 }
 0x206   :  { %3948 = vst [vmem:[#allocation28_spill] sm:$0xff] %v3464_v63  ;;  %1306 = vmatmul.bf16.gmra.mxu3 %v3464_v63  ;;  %v415_v45 = vpop.f32.mrf.mxu0 }
 0x207   :  { %v584_v55 = vpop.f32.mrf.mxu1  ;;  %v3468_v2 = vpack.c.bf16 %v1751_v59, %v1749_v28  ;;  %v416_v39 = vadd.f32 %v415_v45, %v3203_v18 }
 0x208   :  { %v1098_v27 = vpop.f32.mrf.mxu2  ;;  %v585_v31 = vadd.f32 %v584_v55, %v3205_v19 }
 0x209   :  { %3949 = vst [vmem:[#allocation29_spill] sm:$0xff] %v3468_v2  ;;  %v1099_v43 = vadd.f32 %v1098_v27, %v3299_v17  ;;  %v1267_v62 = vpop.f32.mrf.mxu3  ;;  %454 = vmatmul.bf16.gmra.mxu0 %v196_v23  ;;  %v723_v28 = vmax.f32 %v416_v39, 0.0 }
 0x20a   :  { %623 = vmatmul.bf16.gmra.mxu1 %v196_v23  ;;  %v724_v27 = vmax.f32 %v585_v31, 0.0  ;;  %v163_v23 = vld [vmem:[#allocation2 + $0x1e0] sm:$0xff] }
 0x20b   :  { %v1268_v44 = vadd.f32 %v1267_v62, %v1099_v43  ;;  %v164_v62 = vld [vmem:[#allocation2 + $0x1e8] sm:$0xff] }
 0x20d   :  { %v1753_v6 = vmax.f32 %v1268_v44, 0.0 }
 0x20e   :  { %v417_v46 = vpop.f32.mrf.mxu0 }
 0x20f   :  { %v418_v47 = vadd.f32 %v417_v46, %v3203_v18  ;;  %v586_v38 = vpop.f32.mrf.mxu1 }
 0x210   :  { %v587_v20 = vadd.f32 %v586_v38, %v3205_v19  ;;  %v1100_v14 = vpop.f32.mrf.mxu2  ;;  %v197_v38 = vpack.c.bf16 %v164_v62, %v163_v23 }
 0x211   :  { %v725_v56 = vmax.f32 %v418_v47, 0.0  ;;  %v1101_v5 = vadd.f32 %v1100_v14, %v3299_v17  ;;  %v1269_v59 = vpop.f32.mrf.mxu3 }
 0x212   :  { %v726_v63 = vmax.f32 %v587_v20, 0.0 }
 0x213   :  { %v1270_v43 = vadd.f32 %v1269_v59, %v1101_v5  ;;  %v3476_v45 = vpack.c.bf16 %v725_v56, %v723_v28 }
 0x214   :  { %v3478_v55 = vpack.c.bf16 %v726_v63, %v724_v27 }
 0x215   :  { %3950 = vst [vmem:[#allocation30_spill] sm:$0xff] %v3476_v45  ;;  %v1755_v46 = vmax.f32 %v1270_v43, 0.0  ;;  %1142 = vmatmul.bf16.gmra.mxu2 %v3476_v45 }
 0x216   :  { %3951 = vst [vmem:[#allocation31_spill] sm:$0xff] %v3478_v55  ;;  %1311 = vmatmul.bf16.gmra.mxu3 %v3478_v55  ;;  %v420_v39 = vpop.f32.mrf.mxu0 }
 0x217   :  { %v589_v47 = vpop.f32.mrf.mxu1  ;;  %v3482_v14 = vpack.c.bf16 %v1755_v46, %v1753_v6  ;;  %v421_v63 = vadd.f32 %v420_v39, %v3203_v18 }
 0x218   :  { %v1103_v31 = vpop.f32.mrf.mxu2  ;;  %v590_v44 = vadd.f32 %v589_v47, %v3205_v19 }
 0x219   :  { %3952 = vst [vmem:[#allocation32_spill] sm:$0xff] %v3482_v14  ;;  %v1104_v20 = vadd.f32 %v1103_v31, %v3299_v17  ;;  %v1272_v2 = vpop.f32.mrf.mxu3  ;;  %459 = vmatmul.bf16.gmra.mxu0 %v197_v38  ;;  %v727_v6 = vmax.f32 %v421_v63, 0.0 }
 0x21a   :  { %628 = vmatmul.bf16.gmra.mxu1 %v197_v38  ;;  %v728_v31 = vmax.f32 %v590_v44, 0.0  ;;  %v165_v38 = vld [vmem:[#allocation2 + $0x1f0] sm:$0xff] }
 0x21b   :  { %v1273_v28 = vadd.f32 %v1272_v2, %v1104_v20  ;;  %v166_v2 = vld [vmem:[#allocation2 + $0x1f8] sm:$0xff] }
 0x21d   :  { %v1757_v45 = vmax.f32 %v1273_v28, 0.0 }
 0x21e   :  { %v422_v56 = vpop.f32.mrf.mxu0 }
 0x21f   :  { %v423_v5 = vadd.f32 %v422_v56, %v3203_v18  ;;  %v591_v59 = vpop.f32.mrf.mxu1 }
 0x220   :  { %v592_v27 = vadd.f32 %v591_v59, %v3205_v19  ;;  %v1105_v23 = vpop.f32.mrf.mxu2  ;;  %v198_v59 = vpack.c.bf16 %v166_v2, %v165_v38 }
 0x221   :  { %v729_v62 = vmax.f32 %v423_v5, 0.0  ;;  %v1106_v43 = vadd.f32 %v1105_v23, %v3299_v17  ;;  %v1274_v46 = vpop.f32.mrf.mxu3  ;;  %v2821_v5 = vld [vmem:[#allocation10 + $0x8] sm:$0xff] }
 0x222   :  { %v730_v55 = vmax.f32 %v592_v27, 0.0  ;;  %2035 = vmatpush.bf16.msrb.mxu2 %v2821_v5 }
 0x223   :  { %v1275_v20 = vadd.f32 %v1274_v46, %v1106_v43  ;;  %v3490_v39 = vpack.c.bf16 %v729_v62, %v727_v6 }
 0x224   :  { %v3492_v47 = vpack.c.bf16 %v730_v55, %v728_v31  ;;  %v2829_v55 = vld [vmem:[#allocation10 + $0x48] sm:$0xff] }
 0x225   :  { %v1759_v56 = vmax.f32 %v1275_v20, 0.0  ;;  %1147 = vmatmul.bf16.gmra.mxu2 %v3490_v39  ;;  %2204 = vmatpush.bf16.msrb.mxu3 %v2829_v55 }
 0x226   :  { %3953 = vst [vmem:[#allocation33_spill] sm:$0xff] %v3492_v47  ;;  %1316 = vmatmul.bf16.gmra.mxu3 %v3492_v47  ;;  %v425_v63 = vpop.f32.mrf.mxu0 }
 0x227   :  { %v594_v23 = vpop.f32.mrf.mxu1  ;;  %v3496_v14 = vpack.c.bf16 %v1759_v56, %v1757_v45  ;;  %v426_v62 = vadd.f32 %v425_v63, %v3203_v18 }
 0x228   :  { %v1108_v44 = vpop.f32.mrf.mxu2  ;;  %v595_v43 = vadd.f32 %v594_v23, %v3205_v19 }
 0x229   :  { %v1109_v27 = vadd.f32 %v1108_v44, %v3299_v17  ;;  %v1277_v6 = vpop.f32.mrf.mxu3  ;;  %464 = vmatmul.bf16.gmra.mxu0 %v198_v59  ;;  %v731_v20 = vmax.f32 %v426_v62, 0.0 }
 0x22a   :  { %633 = vmatmul.bf16.gmra.mxu1 %v198_v59  ;;  %v732_v59 = vmax.f32 %v595_v43, 0.0 }
 0x22b   :  { %v1278_v28 = vadd.f32 %v1277_v6, %v1109_v27 }
 0x22d   :  { %v1761_v23 = vmax.f32 %v1278_v28, 0.0 }
 0x22e   :  { %v427_v46 = vpop.f32.mrf.mxu0 }
 0x22f   :  { %v428_v31 = vadd.f32 %v427_v46, %v3203_v18  ;;  %v596_v38 = vpop.f32.mrf.mxu1 }
 0x230   :  { %v597_v45 = vadd.f32 %v596_v38, %v3205_v19  ;;  %v1110_v2 = vpop.f32.mrf.mxu2 }
 0x231   :  { %v733_v56 = vmax.f32 %v428_v31, 0.0  ;;  %v1111_v5 = vadd.f32 %v1110_v2, %v3299_v17  ;;  %v1279_v44 = vpop.f32.mrf.mxu3 }
 0x232   :  { %v734_v47 = vmax.f32 %v597_v45, 0.0 }
 0x233   :  { %v1280_v27 = vadd.f32 %v1279_v44, %v1111_v5  ;;  %v3504_v6 = vpack.c.bf16 %v733_v56, %v731_v20 }
 0x234   :  { %v3506_v63 = vpack.c.bf16 %v734_v47, %v732_v59 }
 0x235   :  { %v1763_v55 = vmax.f32 %v1280_v27, 0.0  ;;  %1152 = vmatmul.bf16.gmra.mxu2 %v3504_v6 }
 0x236   :  { %3954 = vst [vmem:[#allocation34_spill] sm:$0xff] %v3506_v63  ;;  %1321 = vmatmul.bf16.gmra.mxu3 %v3506_v63  ;;  %v430_v46 = vpop.f32.mrf.mxu0 }
 0x237   :  { %v599_v38 = vpop.f32.mrf.mxu1  ;;  %v3510_v62 = vpack.c.bf16 %v1763_v55, %v1761_v23  ;;  %v431_v28 = vadd.f32 %v430_v46, %v3203_v18 }
 0x238   :  { %v1113_v31 = vpop.f32.mrf.mxu2  ;;  %v600_v45 = vadd.f32 %v599_v38, %v3205_v19 }
 0x239   :  { %v1114_v2 = vadd.f32 %v1113_v31, %v3299_v17  ;;  %v1282_v43 = vpop.f32.mrf.mxu3  ;;  %1375 = vmatmul.bf16.vlgmr.msrb.gmra.mxu0 %v3211_v32  ;;  %v735_v27 = vmax.f32 %v431_v28, 0.0 }
 0x23a   :  { %1544 = vmatmul.bf16.vlgmr.msrb.gmra.mxu1 %v3213_v33  ;;  %v736_v32 = vmax.f32 %v600_v45, 0.0 }
 0x23b   :  { %v1283_v47 = vadd.f32 %v1282_v43, %v1114_v2 }
 0x23d   :  { %v1765_v38 = vmax.f32 %v1283_v47, 0.0 }
 0x23e   :  { %v432_v20 = vpop.f32.mrf.mxu0 }
 0x23f   :  { %v433_v56 = vadd.f32 %v432_v20, %v3203_v18  ;;  %v601_v5 = vpop.f32.mrf.mxu1 }
 0x240   :  { %v602_v44 = vadd.f32 %v601_v5, %v3205_v19  ;;  %v1115_v59 = vpop.f32.mrf.mxu2 }
 0x241   :  { %v737_v23 = vmax.f32 %v433_v56, 0.0  ;;  %v1116_v55 = vadd.f32 %v1115_v59, %v3299_v17  ;;  %v1284_v31 = vpop.f32.mrf.mxu3 }
 0x242   :  { %v738_v63 = vmax.f32 %v602_v44, 0.0 }
 0x243   :  { %v1285_v33 = vadd.f32 %v1284_v31, %v1116_v55  ;;  %v3520_v2 = vpack.c.bf16 %v737_v23, %v735_v27 }
 0x244   :  { %v3522_v46 = vpack.c.bf16 %v738_v63, %v736_v32 }
 0x245   :  { %v1767_v43 = vmax.f32 %v1285_v33, 0.0  ;;  %1157 = vmatmul.bf16.gmra.mxu2 %v3520_v2 }
 0x246   :  { %3955 = vst [vmem:[#allocation35_spill] sm:$0xff] %v3522_v46  ;;  %1326 = vmatmul.bf16.gmra.mxu3 %v3522_v46  ;;  %v435_v20 = vpop.f32.mrf.mxu0 }
 0x247   :  { %v604_v5 = vpop.f32.mrf.mxu1  ;;  %v3526_v28 = vpack.c.bf16 %v1767_v43, %v1765_v38  ;;  %v436_v47 = vadd.f32 %v435_v20, %v3203_v18 }
 0x248   :  { %v1118_v56 = vpop.f32.mrf.mxu2  ;;  %v605_v44 = vadd.f32 %v604_v5, %v3205_v19 }
 0x249   :  { %v1119_v59 = vadd.f32 %v1118_v56, %v3299_v17  ;;  %v1287_v45 = vpop.f32.mrf.mxu3  ;;  %1380 = vmatmul.bf16.gmra.mxu0 %v3221_v49  ;;  %v739_v33 = vmax.f32 %v436_v47, 0.0 }
 0x24a   :  { %1549 = vmatmul.bf16.gmra.mxu1 %v3223_v50  ;;  %v740_v49 = vmax.f32 %v605_v44, 0.0 }
 0x24b   :  { %v1288_v63 = vadd.f32 %v1287_v45, %v1119_v59 }
 0x24d   :  { %v1769_v5 = vmax.f32 %v1288_v63, 0.0 }
 0x24e   :  { %v437_v27 = vpop.f32.mrf.mxu0 }
 0x24f   :  { %v438_v23 = vadd.f32 %v437_v27, %v3203_v18  ;;  %v606_v55 = vpop.f32.mrf.mxu1 }
 0x250   :  { %v607_v31 = vadd.f32 %v606_v55, %v3205_v19  ;;  %v1120_v32 = vpop.f32.mrf.mxu2 }
 0x251   :  { %v741_v38 = vmax.f32 %v438_v23, 0.0  ;;  %v1121_v43 = vadd.f32 %v1120_v32, %v3299_v17  ;;  %v1289_v56 = vpop.f32.mrf.mxu3 }
 0x252   :  { %v742_v46 = vmax.f32 %v607_v31, 0.0 }
 0x253   :  { %v1290_v50 = vadd.f32 %v1289_v56, %v1121_v43  ;;  %v3536_v59 = vpack.c.bf16 %v741_v38, %v739_v33 }
 0x254   :  { %v3538_v20 = vpack.c.bf16 %v742_v46, %v740_v49 }
 0x255   :  { %v1771_v45 = vmax.f32 %v1290_v50, 0.0  ;;  %1162 = vmatmul.bf16.gmra.mxu2 %v3536_v59 }
 0x256   :  { %3956 = vst [vmem:[#allocation36_spill] sm:$0xff] %v3538_v20  ;;  %1331 = vmatmul.bf16.gmra.mxu3 %v3538_v20  ;;  %v440_v27 = vpop.f32.mrf.mxu0 }
 0x257   :  { %v609_v55 = vpop.f32.mrf.mxu1  ;;  %v3542_v47 = vpack.c.bf16 %v1771_v45, %v1769_v5  ;;  %v441_v63 = vadd.f32 %v440_v27, %v3203_v18 }
 0x258   :  { %v1123_v23 = vpop.f32.mrf.mxu2  ;;  %v610_v31 = vadd.f32 %v609_v55, %v3205_v19 }
 0x259   :  { %v1124_v32 = vadd.f32 %v1123_v23, %v3299_v17  ;;  %v1292_v44 = vpop.f32.mrf.mxu3  ;;  %1385 = vmatmul.bf16.gmra.mxu0 %v3231_v8  ;;  %v743_v50 = vmax.f32 %v441_v63, 0.0 }
 0x25a   :  { %1554 = vmatmul.bf16.gmra.mxu1 %v3233_v9  ;;  %v744_v8 = vmax.f32 %v610_v31, 0.0 }
 0x25b   :  { %v1293_v46 = vadd.f32 %v1292_v44, %v1124_v32 }
 0x25d   :  { %v1773_v55 = vmax.f32 %v1293_v46, 0.0 }
 0x25e   :  { %v442_v33 = vpop.f32.mrf.mxu0 }
 0x25f   :  { %v443_v38 = vadd.f32 %v442_v33, %v3203_v18  ;;  %v611_v43 = vpop.f32.mrf.mxu1 }
 0x260   :  { %v612_v56 = vadd.f32 %v611_v43, %v3205_v19  ;;  %v1125_v49 = vpop.f32.mrf.mxu2  ;;  %v2820_v43 = vld [vmem:[#allocation10] sm:$0xff] }
 0x261   :  { %v745_v5 = vmax.f32 %v443_v38, 0.0  ;;  %v1126_v45 = vadd.f32 %v1125_v49, %v3299_v17  ;;  %v1294_v23 = vpop.f32.mrf.mxu3  ;;  %2036 = vmatpush.bf16.msrb.mxu2 %v2820_v43 }
 0x262   :  { %v746_v20 = vmax.f32 %v612_v56, 0.0 }
 0x263   :  { %v1295_v9 = vadd.f32 %v1294_v23, %v1126_v45  ;;  %v3552_v32 = vpack.c.bf16 %v745_v5, %v743_v50 }
 0x264   :  { %v3554_v27 = vpack.c.bf16 %v746_v20, %v744_v8  ;;  %v2828_v20 = vld [vmem:[#allocation10 + $0x40] sm:$0xff] }
 0x265   :  { %v1775_v44 = vmax.f32 %v1295_v9, 0.0  ;;  %1167 = vmatmul.bf16.gmra.mxu2 %v3552_v32  ;;  %2205 = vmatpush.bf16.msrb.mxu3 %v2828_v20 }
 0x266   :  { %3957 = vst [vmem:[#allocation37_spill] sm:$0xff] %v3554_v27  ;;  %1336 = vmatmul.bf16.gmra.mxu3 %v3554_v27  ;;  %v445_v33 = vpop.f32.mrf.mxu0 }
 0x267   :  { %v614_v63 = vpop.f32.mrf.mxu1  ;;  %v3558_v38 = vpack.c.bf16 %v1775_v44, %v1773_v55  ;;  %v446_v50 = vadd.f32 %v445_v33, %v3203_v18 }
 0x268   :  { %v1128_v49 = vpop.f32.mrf.mxu2  ;;  %v615_v5 = vadd.f32 %v614_v63, %v3205_v19 }
 0x269   :  { %v1129_v31 = vadd.f32 %v1128_v49, %v3299_v17  ;;  %v1297_v56 = vpop.f32.mrf.mxu3  ;;  %1390 = vmatmul.bf16.gmra.mxu0 %v3241_v29  ;;  %v747_v44 = vmax.f32 %v446_v50, 0.0 }
 0x26a   :  { %1559 = vmatmul.bf16.gmra.mxu1 %v3243_v30  ;;  %v748_v30 = vmax.f32 %v615_v5, 0.0 }
 0x26b   :  { %v1298_v46 = vadd.f32 %v1297_v56, %v1129_v31 }
 0x26d   :  { %v1777_v63 = vmax.f32 %v1298_v46, 0.0 }
 0x26e   :  { %v447_v45 = vpop.f32.mrf.mxu0 }
 0x26f   :  { %v448_v23 = vadd.f32 %v447_v45, %v3203_v18  ;;  %v616_v8 = vpop.f32.mrf.mxu1 }
 0x270   :  { %v617_v9 = vadd.f32 %v616_v8, %v3205_v19  ;;  %v1130_v55 = vpop.f32.mrf.mxu2 }
 0x271   :  { %v749_v43 = vmax.f32 %v448_v23, 0.0  ;;  %v1131_v29 = vadd.f32 %v1130_v55, %v3299_v17  ;;  %v1299_v49 = vpop.f32.mrf.mxu3 }
 0x272   :  { %v750_v27 = vmax.f32 %v617_v9, 0.0 }
 0x273   :  { %v1300_v31 = vadd.f32 %v1299_v49, %v1131_v29  ;;  %v3568_v56 = vpack.c.bf16 %v749_v43, %v747_v44 }
 0x274   :  { %v3570_v33 = vpack.c.bf16 %v750_v27, %v748_v30 }
 0x275   :  { %v1779_v20 = vmax.f32 %v1300_v31, 0.0  ;;  %1172 = vmatmul.bf16.gmra.mxu2 %v3568_v56 }
 0x276   :  { %3958 = vst [vmem:[#allocation38_spill] sm:$0xff] %v3570_v33  ;;  %1341 = vmatmul.bf16.gmra.mxu3 %v3570_v33  ;;  %v450_v45 = vpop.f32.mrf.mxu0 }
 0x277   :  { %v619_v8 = vpop.f32.mrf.mxu1  ;;  %v3574_v50 = vpack.c.bf16 %v1779_v20, %v1777_v63  ;;  %v451_v46 = vadd.f32 %v450_v45, %v3203_v18 }
 0x278   :  { %v1133_v23 = vpop.f32.mrf.mxu2  ;;  %v620_v9 = vadd.f32 %v619_v8, %v3205_v19 }
 0x279   :  { %v1134_v55 = vadd.f32 %v1133_v23, %v3299_v17  ;;  %v1302_v5 = vpop.f32.mrf.mxu3  ;;  %1395 = vmatmul.bf16.gmra.mxu0 %v3251_v48  ;;  %v751_v31 = vmax.f32 %v451_v46, 0.0 }
 0x27a   :  { %1564 = vmatmul.bf16.gmra.mxu1 %v3253_v51  ;;  %v752_v48 = vmax.f32 %v620_v9, 0.0 }
 0x27b   :  { %v1303_v27 = vadd.f32 %v1302_v5, %v1134_v55 }
 0x27d   :  { %v1781_v8 = vmax.f32 %v1303_v27, 0.0 }
 0x27e   :  { %v452_v44 = vpop.f32.mrf.mxu0 }
 0x27f   :  { %v453_v43 = vadd.f32 %v452_v44, %v3203_v18  ;;  %v621_v29 = vpop.f32.mrf.mxu1 }
 0x280   :  { %v622_v49 = vadd.f32 %v621_v29, %v3205_v19  ;;  %v1135_v30 = vpop.f32.mrf.mxu2 }
 0x281   :  { %v753_v63 = vmax.f32 %v453_v43, 0.0  ;;  %v1136_v20 = vadd.f32 %v1135_v30, %v3299_v17  ;;  %v1304_v23 = vpop.f32.mrf.mxu3 }
 0x282   :  { %v754_v33 = vmax.f32 %v622_v49, 0.0 }
 0x283   :  { %v1305_v51 = vadd.f32 %v1304_v23, %v1136_v20  ;;  %v3584_v55 = vpack.c.bf16 %v753_v63, %v751_v31 }
 0x284   :  { %v3586_v45 = vpack.c.bf16 %v754_v33, %v752_v48 }
 0x285   :  { %v1783_v5 = vmax.f32 %v1305_v51, 0.0  ;;  %1177 = vmatmul.bf16.gmra.mxu2 %v3584_v55 }
 0x286   :  { %3959 = vst [vmem:[#allocation39_spill] sm:$0xff] %v3586_v45  ;;  %1346 = vmatmul.bf16.gmra.mxu3 %v3586_v45  ;;  %v455_v44 = vpop.f32.mrf.mxu0 }
 0x287   :  { %v624_v29 = vpop.f32.mrf.mxu1  ;;  %v3590_v46 = vpack.c.bf16 %v1783_v5, %v1781_v8  ;;  %v456_v27 = vadd.f32 %v455_v44, %v3203_v18 }
 0x288   :  { %v1138_v43 = vpop.f32.mrf.mxu2  ;;  %v625_v49 = vadd.f32 %v624_v29, %v3205_v19 }
 0x289   :  { %v1139_v30 = vadd.f32 %v1138_v43, %v3299_v17  ;;  %v1307_v9 = vpop.f32.mrf.mxu3  ;;  %1400 = vmatmul.bf16.gmra.mxu0 %v3261_v3  ;;  %v755_v51 = vmax.f32 %v456_v27, 0.0 }
 0x28a   :  { %1569 = vmatmul.bf16.gmra.mxu1 %v3263_v4  ;;  %v756_v3 = vmax.f32 %v625_v49, 0.0 }
 0x28b   :  { %v1308_v33 = vadd.f32 %v1307_v9, %v1139_v30 }
 0x28d   :  { %v1785_v29 = vmax.f32 %v1308_v33, 0.0 }
 0x28e   :  { %v457_v31 = vpop.f32.mrf.mxu0 }
 0x28f   :  { %v458_v63 = vadd.f32 %v457_v31, %v3203_v18  ;;  %v626_v20 = vpop.f32.mrf.mxu1 }
 0x290   :  { %v627_v23 = vadd.f32 %v626_v20, %v3205_v19  ;;  %v1140_v48 = vpop.f32.mrf.mxu2 }
 0x291   :  { %v757_v8 = vmax.f32 %v458_v63, 0.0  ;;  %v1141_v5 = vadd.f32 %v1140_v48, %v3299_v17  ;;  %v1309_v43 = vpop.f32.mrf.mxu3 }
 0x292   :  { %v758_v45 = vmax.f32 %v627_v23, 0.0 }
 0x293   :  { %v1310_v4 = vadd.f32 %v1309_v43, %v1141_v5  ;;  %v3600_v30 = vpack.c.bf16 %v757_v8, %v755_v51 }
 0x294   :  { %v3602_v44 = vpack.c.bf16 %v758_v45, %v756_v3 }
 0x295   :  { %v1787_v9 = vmax.f32 %v1310_v4, 0.0  ;;  %1182 = vmatmul.bf16.gmra.mxu2 %v3600_v30 }
 0x296   :  { %3960 = vst [vmem:[#allocation40_spill] sm:$0xff] %v3602_v44  ;;  %1351 = vmatmul.bf16.gmra.mxu3 %v3602_v44  ;;  %v460_v31 = vpop.f32.mrf.mxu0 }
 0x297   :  { %v629_v20 = vpop.f32.mrf.mxu1  ;;  %v3606_v27 = vpack.c.bf16 %v1787_v9, %v1785_v29  ;;  %v461_v33 = vadd.f32 %v460_v31, %v3203_v18 }
 0x298   :  { %v1143_v63 = vpop.f32.mrf.mxu2  ;;  %v630_v23 = vadd.f32 %v629_v20, %v3205_v19 }
 0x299   :  { %v1144_v48 = vadd.f32 %v1143_v63, %v3299_v17  ;;  %v1312_v49 = vpop.f32.mrf.mxu3  ;;  %1405 = vmatmul.bf16.gmra.mxu0 %v3271_v34  ;;  %v759_v4 = vmax.f32 %v461_v33, 0.0 }
 0x29a   :  { %1574 = vmatmul.bf16.gmra.mxu1 %v3273_v35  ;;  %v760_v34 = vmax.f32 %v630_v23, 0.0 }
 0x29b   :  { %v1313_v45 = vadd.f32 %v1312_v49, %v1144_v48 }
 0x29d   :  { %v1789_v20 = vmax.f32 %v1313_v45, 0.0 }
 0x29e   :  { %v462_v51 = vpop.f32.mrf.mxu0 }
 0x29f   :  { %v463_v8 = vadd.f32 %v462_v51, %v3203_v18  ;;  %v631_v5 = vpop.f32.mrf.mxu1 }
 0x2a0   :  { %v632_v43 = vadd.f32 %v631_v5, %v3205_v19  ;;  %v1145_v3 = vpop.f32.mrf.mxu2 }
 0x2a1   :  { %v761_v29 = vmax.f32 %v463_v8, 0.0  ;;  %v1146_v9 = vadd.f32 %v1145_v3, %v3299_v17  ;;  %v1314_v63 = vpop.f32.mrf.mxu3 }
 0x2a2   :  { %v762_v44 = vmax.f32 %v632_v43, 0.0 }
 0x2a3   :  { %v1315_v35 = vadd.f32 %v1314_v63, %v1146_v9  ;;  %v3616_v48 = vpack.c.bf16 %v761_v29, %v759_v4 }
 0x2a4   :  { %v3618_v31 = vpack.c.bf16 %v762_v44, %v760_v34 }
 0x2a5   :  { %v1791_v49 = vmax.f32 %v1315_v35, 0.0  ;;  %1187 = vmatmul.bf16.gmra.mxu2 %v3616_v48 }
 0x2a6   :  { %3961 = vst [vmem:[#allocation41_spill] sm:$0xff] %v3618_v31  ;;  %1356 = vmatmul.bf16.gmra.mxu3 %v3618_v31  ;;  %v465_v51 = vpop.f32.mrf.mxu0 }
 0x2a7   :  { %v634_v5 = vpop.f32.mrf.mxu1  ;;  %v3622_v33 = vpack.c.bf16 %v1791_v49, %v1789_v20  ;;  %v466_v45 = vadd.f32 %v465_v51, %v3203_v18 }
 0x2a8   :  { %v1148_v8 = vpop.f32.mrf.mxu2  ;;  %v635_v43 = vadd.f32 %v634_v5, %v3205_v19 }
 0x2a9   :  { %v1149_v3 = vadd.f32 %v1148_v8, %v3299_v17  ;;  %v1317_v23 = vpop.f32.mrf.mxu3  ;;  %1410 = vmatmul.bf16.gmra.mxu0 %v3281_v57  ;;  %v763_v35 = vmax.f32 %v466_v45, 0.0 }
 0x2aa   :  { %1579 = vmatmul.bf16.gmra.mxu1 %v3283_v58  ;;  %v764_v57 = vmax.f32 %v635_v43, 0.0 }
 0x2ab   :  { %v1318_v44 = vadd.f32 %v1317_v23, %v1149_v3 }
 0x2ad   :  { %v1793_v5 = vmax.f32 %v1318_v44, 0.0 }
 0x2ae   :  { %v467_v4 = vpop.f32.mrf.mxu0 }
 0x2af   :  { %v468_v29 = vadd.f32 %v467_v4, %v3203_v18  ;;  %v636_v9 = vpop.f32.mrf.mxu1 }
 0x2b0   :  { %v637_v63 = vadd.f32 %v636_v9, %v3205_v19  ;;  %v1150_v34 = vpop.f32.mrf.mxu2  ;;  %v2975_v19 = vld [vmem:[%s3909_s4] sm:$0x3] }
 0x2b1   :  { %v765_v20 = vmax.f32 %v468_v29, 0.0  ;;  %v1151_v49 = vadd.f32 %v1150_v34, %v3299_v17  ;;  %v1319_v8 = vpop.f32.mrf.mxu3  ;;  %v3641_v45 = vperm.slane %v2975_v19, 1 }
 0x2b2   :  { %v766_v31 = vmax.f32 %v637_v63, 0.0 }
 0x2b3   :  { %v1320_v58 = vadd.f32 %v1319_v8, %v1151_v49  ;;  %v3632_v3 = vpack.c.bf16 %v765_v20, %v763_v35 }
 0x2b4   :  { %v3634_v51 = vpack.c.bf16 %v766_v31, %v764_v57 }
 0x2b5   :  { %3962 = vst [vmem:[#allocation42_spill] sm:$0xff] %v3632_v3  ;;  %v1795_v23 = vmax.f32 %v1320_v58, 0.0  ;;  %1192 = vmatmul.bf16.gmra.mxu2 %v3632_v3 }
 0x2b6   :  { %3963 = vst [vmem:[#allocation43_spill] sm:$0xff] %v3634_v51  ;;  %1361 = vmatmul.bf16.gmra.mxu3 %v3634_v51  ;;  %v1376_v18 = vpop.f32.mrf.mxu0 }
 0x2b7   :  { %v1545_v43 = vpop.f32.mrf.mxu1  ;;  %v3643_v4 = vpack.c.bf16 %v1795_v23, %v1793_v5  ;;  %v1377_v44 = vadd.f32 %v1376_v18, %v3641_v45 }
 0x2b8   :  { %v1153_v29 = vpop.f32.mrf.mxu2 }
 0x2b9   :  { %v1154_v31 = vadd.f32 %v1153_v29, %v3299_v17  ;;  %v1322_v9 = vpop.f32.mrf.mxu3  ;;  %1415 = vmatmul.bf16.gmra.mxu0 %v3294_v15  ;;  %v1546_v35 = vadd.f32 %v1545_v43, %v1377_v44 }
 0x2ba   :  { %1584 = vmatmul.bf16.gmra.mxu1 %v3296_v16 }
 0x2bb   :  { %v1323_v63 = vadd.f32 %v1322_v9, %v1154_v31  ;;  %v1706_v23 = vmax.f32 %v1546_v35, 0.0 }
 0x2bd   :  { %v1797_v51 = vmax.f32 %v1323_v63, 0.0 }
 0x2be   :  { %v1378_v34 = vpop.f32.mrf.mxu0 }
 0x2bf   :  { %v1379_v20 = vadd.f32 %v1378_v34, %v3641_v45  ;;  %v1547_v49 = vpop.f32.mrf.mxu1 }
 0x2c0   :  { %v1155_v8 = vpop.f32.mrf.mxu2 }
 0x2c1   :  { %v1548_v57 = vadd.f32 %v1547_v49, %v1379_v20  ;;  %v1156_v58 = vadd.f32 %v1155_v8, %v3299_v17  ;;  %v1324_v5 = vpop.f32.mrf.mxu3 }
 0x2c3   :  { %v1708_v19 = vmax.f32 %v1548_v57, 0.0  ;;  %v1325_v29 = vadd.f32 %v1324_v5, %v1156_v58 }
 0x2c5   :  { %v1834_v15 = vpack.c.bf16 %v1708_v19, %v1706_v23  ;;  %v1799_v3 = vmax.f32 %v1325_v29, 0.0  ;;  %2037 = vmatmul.bf16.vlgmr.msrb.gmra.mxu2 %v3314_v61 }
 0x2c6   :  { %v1381_v16 = vpop.f32.mrf.mxu0 }
 0x2c7   :  { %v1550_v18 = vpop.f32.mrf.mxu1  ;;  %2206 = vmatmul.bf16.vlgmr.msrb.gmra.mxu3 %v1834_v15  ;;  %v3652_v43 = vpack.c.bf16 %v1799_v3, %v1797_v51  ;;  %v1382_v34 = vadd.f32 %v1381_v16, %v3641_v45 }
 0x2c8   :  { %v1158_v31 = vpop.f32.mrf.mxu2 }
 0x2c9   :  { %v1159_v9 = vadd.f32 %v1158_v31, %v3299_v17  ;;  %v1327_v44 = vpop.f32.mrf.mxu3  ;;  %1420 = vmatmul.bf16.gmra.mxu0 %v3308_v53  ;;  %v1551_v20 = vadd.f32 %v1550_v18, %v1382_v34 }
 0x2ca   :  { %1589 = vmatmul.bf16.gmra.mxu1 %v3310_v54 }
 0x2cb   :  { %v1328_v63 = vadd.f32 %v1327_v44, %v1159_v9  ;;  %v1710_v58 = vmax.f32 %v1551_v20, 0.0 }
 0x2cd   :  { %v1801_v19 = vmax.f32 %v1328_v63, 0.0 }
 0x2ce   :  { %v1383_v35 = vpop.f32.mrf.mxu0 }
 0x2cf   :  { %v1384_v61 = vadd.f32 %v1383_v35, %v3641_v45  ;;  %v1552_v49 = vpop.f32.mrf.mxu1 }
 0x2d0   :  { %v1160_v8 = vpop.f32.mrf.mxu2 }
 0x2d1   :  { %v1553_v57 = vadd.f32 %v1552_v49, %v1384_v61  ;;  %v1161_v3 = vadd.f32 %v1160_v8, %v3299_v17  ;;  %v1329_v51 = vpop.f32.mrf.mxu3 }
 0x2d3   :  { %v1712_v5 = vmax.f32 %v1553_v57, 0.0  ;;  %v1330_v23 = vadd.f32 %v1329_v51, %v1161_v3 }
 0x2d5   :  { %v1803_v53 = vmax.f32 %v1330_v23, 0.0  ;;  %2042 = vmatmul.bf16.gmra.mxu2 %v3328_v52  ;;  %v1836_v54 = vpack.c.bf16 %v1712_v5, %v1710_v58 }
 0x2d6   :  { %v1386_v29 = vpop.f32.mrf.mxu0 }
 0x2d7   :  { %v1555_v15 = vpop.f32.mrf.mxu1  ;;  %2211 = vmatmul.bf16.gmra.mxu3 %v1836_v54  ;;  %v3661_v16 = vpack.c.bf16 %v1803_v53, %v1801_v19  ;;  %v1387_v44 = vadd.f32 %v1386_v29, %v3641_v45 }
 0x2d8   :  { %v1163_v18 = vpop.f32.mrf.mxu2 }
 0x2d9   :  { %v1164_v31 = vadd.f32 %v1163_v18, %v3299_v17  ;;  %v1332_v9 = vpop.f32.mrf.mxu3  ;;  %1425 = vmatmul.bf16.gmra.mxu0 %v3322_v40  ;;  %v1556_v35 = vadd.f32 %v1555_v15, %v1387_v44 }
 0x2da   :  { %1594 = vmatmul.bf16.gmra.mxu1 %v3324_v41 }
 0x2db   :  { %v1333_v34 = vadd.f32 %v1332_v9, %v1164_v31  ;;  %v1714_v3 = vmax.f32 %v1556_v35, 0.0 }
 0x2dd   :  { %v1805_v5 = vmax.f32 %v1333_v34, 0.0 }
 0x2de   :  { %v1388_v63 = vpop.f32.mrf.mxu0 }
 0x2df   :  { %v1389_v52 = vadd.f32 %v1388_v63, %v3641_v45  ;;  %v1557_v20 = vpop.f32.mrf.mxu1 }
 0x2e0   :  { %v1165_v61 = vpop.f32.mrf.mxu2 }
 0x2e1   :  { %v1558_v49 = vadd.f32 %v1557_v20, %v1389_v52  ;;  %v1166_v8 = vadd.f32 %v1165_v61, %v3299_v17  ;;  %v1334_v57 = vpop.f32.mrf.mxu3 }
 0x2e3   :  { %v1716_v51 = vmax.f32 %v1558_v49, 0.0  ;;  %v1335_v58 = vadd.f32 %v1334_v57, %v1166_v8 }
 0x2e5   :  { %v1807_v40 = vmax.f32 %v1335_v58, 0.0  ;;  %2047 = vmatmul.bf16.gmra.mxu2 %v3342_v37  ;;  %v1838_v41 = vpack.c.bf16 %v1716_v51, %v1714_v3 }
 0x2e6   :  { %v1391_v23 = vpop.f32.mrf.mxu0 }
 0x2e7   :  { %v1560_v19 = vpop.f32.mrf.mxu1  ;;  %2216 = vmatmul.bf16.gmra.mxu3 %v1838_v41  ;;  %v3670_v53 = vpack.c.bf16 %v1807_v40, %v1805_v5  ;;  %v1392_v18 = vadd.f32 %v1391_v23, %v3641_v45 }
 0x2e8   :  { %v1168_v54 = vpop.f32.mrf.mxu2 }
 0x2e9   :  { %v1169_v29 = vadd.f32 %v1168_v54, %v3299_v17  ;;  %v1337_v15 = vpop.f32.mrf.mxu3  ;;  %1430 = vmatmul.bf16.gmra.mxu0 %v3336_v24  ;;  %v1561_v44 = vadd.f32 %v1560_v19, %v1392_v18 }
 0x2ea   :  { %1599 = vmatmul.bf16.gmra.mxu1 %v3338_v25 }
 0x2eb   :  { %v1338_v31 = vadd.f32 %v1337_v15, %v1169_v29  ;;  %v1718_v61 = vmax.f32 %v1561_v44, 0.0 }
 0x2ed   :  { %v1809_v57 = vmax.f32 %v1338_v31, 0.0 }
 0x2ee   :  { %v1393_v9 = vpop.f32.mrf.mxu0 }
 0x2ef   :  { %v1394_v37 = vadd.f32 %v1393_v9, %v3641_v45  ;;  %v1562_v34 = vpop.f32.mrf.mxu1 }
 0x2f0   :  { %v1170_v63 = vpop.f32.mrf.mxu2 }
 0x2f1   :  { %v1563_v35 = vadd.f32 %v1562_v34, %v1394_v37  ;;  %v1171_v52 = vadd.f32 %v1170_v63, %v3299_v17  ;;  %v1339_v20 = vpop.f32.mrf.mxu3 }
 0x2f3   :  { %v1720_v49 = vmax.f32 %v1563_v35, 0.0  ;;  %v1340_v8 = vadd.f32 %v1339_v20, %v1171_v52 }
 0x2f5   :  { %v1811_v24 = vmax.f32 %v1340_v8, 0.0  ;;  %2052 = vmatmul.bf16.gmra.mxu2 %v3356_v22  ;;  %v1840_v25 = vpack.c.bf16 %v1720_v49, %v1718_v61 }
 0x2f6   :  { %v1396_v3 = vpop.f32.mrf.mxu0 }
 0x2f7   :  { %v1565_v51 = vpop.f32.mrf.mxu1  ;;  %2221 = vmatmul.bf16.gmra.mxu3 %v1840_v25  ;;  %v3679_v58 = vpack.c.bf16 %v1811_v24, %v1809_v57  ;;  %v1397_v23 = vadd.f32 %v1396_v3, %v3641_v45 }
 0x2f8   :  { %v1173_v5 = vpop.f32.mrf.mxu2 }
 0x2f9   :  { %v1174_v40 = vadd.f32 %v1173_v5, %v3299_v17  ;;  %v1342_v41 = vpop.f32.mrf.mxu3  ;;  %1435 = vmatmul.bf16.gmra.mxu0 %v3350_v10  ;;  %v1566_v29 = vadd.f32 %v1565_v51, %v1397_v23 }
 0x2fa   :  { %1604 = vmatmul.bf16.gmra.mxu1 %v3352_v11 }
 0x2fb   :  { %v1343_v19 = vadd.f32 %v1342_v41, %v1174_v40  ;;  %v1722_v37 = vmax.f32 %v1566_v29, 0.0 }
 0x2fd   :  { %v1813_v35 = vmax.f32 %v1343_v19, 0.0 }
 0x2fe   :  { %v1398_v54 = vpop.f32.mrf.mxu0 }
 0x2ff   :  { %v1399_v22 = vadd.f32 %v1398_v54, %v3641_v45  ;;  %v1567_v15 = vpop.f32.mrf.mxu1 }
 0x300   :  { %v1175_v18 = vpop.f32.mrf.mxu2 }
 0x301   :  { %v1568_v31 = vadd.f32 %v1567_v15, %v1399_v22  ;;  %v1176_v9 = vadd.f32 %v1175_v18, %v3299_v17  ;;  %v1344_v44 = vpop.f32.mrf.mxu3 }
 0x303   :  { %v1724_v34 = vmax.f32 %v1568_v31, 0.0  ;;  %v1345_v63 = vadd.f32 %v1344_v44, %v1176_v9 }
 0x305   :  { %v1815_v10 = vmax.f32 %v1345_v63, 0.0  ;;  %2057 = vmatmul.bf16.gmra.mxu2 %v3370_v13  ;;  %v1842_v11 = vpack.c.bf16 %v1724_v34, %v1722_v37 }
 0x306   :  { %v1401_v52 = vpop.f32.mrf.mxu0 }
 0x307   :  { %v1570_v20 = vpop.f32.mrf.mxu1  ;;  %2226 = vmatmul.bf16.gmra.mxu3 %v1842_v11  ;;  %v3688_v61 = vpack.c.bf16 %v1815_v10, %v1813_v35  ;;  %v1402_v24 = vadd.f32 %v1401_v52, %v3641_v45 }
 0x308   :  { %v1178_v49 = vpop.f32.mrf.mxu2 }
 0x309   :  { %v1179_v8 = vadd.f32 %v1178_v49, %v3299_v17  ;;  %v1347_v57 = vpop.f32.mrf.mxu3  ;;  %1440 = vmatmul.bf16.gmra.mxu0 %v3364_v0  ;;  %v1571_v51 = vadd.f32 %v1570_v20, %v1402_v24 }
 0x30a   :  { %1609 = vmatmul.bf16.gmra.mxu1 %v3366_v1 }
 0x30b   :  { %v1348_v25 = vadd.f32 %v1347_v57, %v1179_v8  ;;  %v1726_v54 = vmax.f32 %v1571_v51, 0.0 }
 0x30d   :  { %v1817_v15 = vmax.f32 %v1348_v25, 0.0 }
 0x30e   :  { %v1403_v3 = vpop.f32.mrf.mxu0 }
 0x30f   :  { %v1404_v13 = vadd.f32 %v1403_v3, %v3641_v45  ;;  %v1572_v5 = vpop.f32.mrf.mxu1 }
 0x310   :  { %v1180_v40 = vpop.f32.mrf.mxu2 }
 0x311   :  { %v1573_v41 = vadd.f32 %v1572_v5, %v1404_v13  ;;  %v1181_v23 = vadd.f32 %v1180_v40, %v3299_v17  ;;  %v1349_v19 = vpop.f32.mrf.mxu3 }
 0x313   :  { %v1728_v29 = vmax.f32 %v1573_v41, 0.0  ;;  %v1350_v22 = vadd.f32 %v1349_v19, %v1181_v23 }
 0x315   :  { %v1819_v0 = vmax.f32 %v1350_v22, 0.0  ;;  %2062 = vmatmul.bf16.gmra.mxu2 %v3384_v36  ;;  %v1844_v1 = vpack.c.bf16 %v1728_v29, %v1726_v54 }
 0x316   :  { %v1406_v18 = vpop.f32.mrf.mxu0 }
 0x317   :  { %v1575_v31 = vpop.f32.mrf.mxu1  ;;  %2231 = vmatmul.bf16.gmra.mxu3 %v1844_v1  ;;  %v3697_v9 = vpack.c.bf16 %v1819_v0, %v1817_v15  ;;  %v1407_v63 = vadd.f32 %v1406_v18, %v3641_v45 }
 0x318   :  { %v1183_v44 = vpop.f32.mrf.mxu2 }
 0x319   :  { %v1184_v37 = vadd.f32 %v1183_v44, %v3299_v17  ;;  %v1352_v34 = vpop.f32.mrf.mxu3  ;;  %1445 = vmatmul.bf16.gmra.mxu0 %v3378_v7  ;;  %v1576_v11 = vadd.f32 %v1575_v31, %v1407_v63 }
 0x31a   :  { %1614 = vmatmul.bf16.gmra.mxu1 %v3380_v12 }
 0x31b   :  { %v1353_v35 = vadd.f32 %v1352_v34, %v1184_v37  ;;  %v1730_v24 = vmax.f32 %v1576_v11, 0.0 }
 0x31d   :  { %v1821_v51 = vmax.f32 %v1353_v35, 0.0 }
 0x31e   :  { %v1408_v10 = vpop.f32.mrf.mxu0 }
 0x31f   :  { %v1409_v36 = vadd.f32 %v1408_v10, %v3641_v45  ;;  %v1577_v52 = vpop.f32.mrf.mxu1  ;;  %v3964_v10 = vld [vmem:[#allocation18_spill] sm:$0xff] }
 0x320   :  { %v1185_v20 = vpop.f32.mrf.mxu2 }
 0x321   :  { %v1578_v49 = vadd.f32 %v1577_v52, %v1409_v36  ;;  %v1186_v8 = vadd.f32 %v1185_v20, %v3299_v17  ;;  %v1354_v57 = vpop.f32.mrf.mxu3 }
 0x323   :  { %v1732_v25 = vmax.f32 %v1578_v49, 0.0  ;;  %v1355_v3 = vadd.f32 %v1354_v57, %v1186_v8  ;;  %v3965_v57 = vld [vmem:[#allocation16_spill] sm:$0xff] }
 0x325   :  { %v1823_v7 = vmax.f32 %v1355_v3, 0.0  ;;  %2067 = vmatmul.bf16.gmra.mxu2 %v3398_v42  ;;  %v1846_v12 = vpack.c.bf16 %v1732_v25, %v1730_v24  ;;  %v3966_v24 = vld [vmem:[#allocation17_spill] sm:$0xff] }
 0x326   :  { %v1411_v13 = vpop.f32.mrf.mxu0 }
 0x327   :  { %v1580_v5 = vpop.f32.mrf.mxu1  ;;  %2236 = vmatmul.bf16.gmra.mxu3 %v1846_v12  ;;  %v3706_v40 = vpack.c.bf16 %v1823_v7, %v1821_v51  ;;  %v1412_v54 = vadd.f32 %v1411_v13, %v3641_v45 }
 0x328   :  { %v1188_v41 = vpop.f32.mrf.mxu2 }
 0x329   :  { %v1189_v23 = vadd.f32 %v1188_v41, %v3299_v17  ;;  %v1357_v19 = vpop.f32.mrf.mxu3  ;;  %1450 = vmatmul.bf16.gmra.mxu0 %v3392_v21  ;;  %v1581_v15 = vadd.f32 %v1580_v5, %v1412_v54 }
 0x32a   :  { %1619 = vmatmul.bf16.gmra.mxu1 %v3394_v26 }
 0x32b   :  { %v1358_v29 = vadd.f32 %v1357_v19, %v1189_v23  ;;  %v1734_v37 = vmax.f32 %v1581_v15, 0.0 }
 0x32d   :  { %v1825_v35 = vmax.f32 %v1358_v29, 0.0 }
 0x32e   :  { %v1413_v22 = vpop.f32.mrf.mxu0 }
 0x32f   :  { %v1414_v42 = vadd.f32 %v1413_v22, %v3641_v45  ;;  %v1582_v0 = vpop.f32.mrf.mxu1 }
 0x330   :  { %v1190_v1 = vpop.f32.mrf.mxu2 }
 0x331   :  { %v1583_v18 = vadd.f32 %v1582_v0, %v1414_v42  ;;  %v1191_v31 = vadd.f32 %v1190_v1, %v3299_v17  ;;  %v1359_v44 = vpop.f32.mrf.mxu3  ;;  %v3967_v0 = vld [vmem:[#allocation21_spill] sm:$0xff] }
 0x333   :  { %v1736_v34 = vmax.f32 %v1583_v18, 0.0  ;;  %v1360_v63 = vadd.f32 %v1359_v44, %v1191_v31  ;;  %v3727_v18 = vld [vmem:[%s3911_s6] ss:$0 sm:$0xff] }
 0x335   :  { %v1827_v21 = vmax.f32 %v1360_v63, 0.0  ;;  %2072 = vmatmul.bf16.gmra.mxu2 %v3964_v10  ;;  %v1848_v26 = vpack.c.bf16 %v1736_v34, %v1734_v37  ;;  %v3968_v63 = vld [vmem:[#allocation19_spill] sm:$0xff] }
 0x336   :  { %v1416_v11 = vpop.f32.mrf.mxu0 }
 0x337   :  { %v1585_v36 = vpop.f32.mrf.mxu1  ;;  %2241 = vmatmul.bf16.gmra.mxu3 %v1848_v26  ;;  %v3715_v52 = vpack.c.bf16 %v1827_v21, %v1825_v35  ;;  %v1417_v25 = vadd.f32 %v1416_v11, %v3641_v45  ;;  %v3969_v35 = vld [vmem:[#allocation20_spill] sm:$0xff] }
 0x338   :  { %v1193_v20 = vpop.f32.mrf.mxu2 }
 0x339   :  { %v1194_v49 = vadd.f32 %v1193_v20, %v3299_v17  ;;  %v1362_v8 = vpop.f32.mrf.mxu3  ;;  %1455 = vmatmul.bf16.gmra.mxu0 %v3965_v57  ;;  %v1586_v7 = vadd.f32 %v1585_v36, %v1417_v25 }
 0x33a   :  { %1624 = vmatmul.bf16.gmra.mxu1 %v3966_v24 }
 0x33b   :  { %v1363_v3 = vadd.f32 %v1362_v8, %v1194_v49  ;;  %v1738_v54 = vmax.f32 %v1586_v7, 0.0 }
 0x33d   :  { %v1829_v15 = vmax.f32 %v1363_v3, 0.0 }
 0x33e   :  { %v1418_v51 = vpop.f32.mrf.mxu0 }
 0x33f   :  { %v1419_v12 = vadd.f32 %v1418_v51, %v3641_v45  ;;  %v1587_v13 = vpop.f32.mrf.mxu1 }
 0x340   :  { %v1195_v5 = vpop.f32.mrf.mxu2 }
 0x341   :  { %v1588_v41 = vadd.f32 %v1587_v13, %v1419_v12  ;;  %v1196_v23 = vadd.f32 %v1195_v5, %v3299_v17  ;;  %v1364_v19 = vpop.f32.mrf.mxu3 }
 0x343   :  { %v1740_v29 = vmax.f32 %v1588_v41, 0.0  ;;  %v1365_v22 = vadd.f32 %v1364_v19, %v1196_v23 }
 0x345   :  { %v1831_v42 = vmax.f32 %v1365_v22, 0.0  ;;  %2077 = vmatmul.bf16.gmra.mxu2 %v3967_v0  ;;  %v1850_v1 = vpack.c.bf16 %v1740_v29, %v1738_v54  ;;  %v3970_v54 = vld [vmem:[#allocation22_spill] sm:$0xff]  ;;  %v3971_v29 = vld [vmem:[#allocation23_spill] sm:$0xff] }
 0x346   :  { %v1421_v31 = vpop.f32.mrf.mxu0 }
 0x347   :  { %v1590_v44 = vpop.f32.mrf.mxu1  ;;  %2246 = vmatmul.bf16.gmra.mxu3 %v1850_v1  ;;  %v3729_v37 = vpack.c.bf16 %v1831_v42, %v1829_v15  ;;  %v1422_v10 = vadd.f32 %v1421_v31, %v3641_v45 }
 0x348   :  { %v2038_v17 = vpop.f32.mrf.mxu2 }
 0x349   :  { %v2039_v34 = vadd.f32 %v3727_v18, %v2038_v17  ;;  %1460 = vmatmul.bf16.gmra.mxu0 %v3968_v63  ;;  %v1591_v36 = vadd.f32 %v1590_v44, %v1422_v10 }
 0x34a   :  { %1629 = vmatmul.bf16.gmra.mxu1 %v3969_v35  ;;  %v2207_v21 = vpop.f32.mrf.mxu3 }
 0x34b   :  { %v2208_v26 = vadd.f32 %v2207_v21, %v2039_v34  ;;  %v1742_v51 = vmax.f32 %v1591_v36, 0.0  ;;  %v3972_v36 = vld [vmem:[#allocation26_spill] sm:$0xff] }
 0x34d   :  { %2847 = vtanh.f32 %v2208_v26 }
 0x34e   :  { %v1423_v11 = vpop.f32.mrf.mxu0 }
 0x34f   :  { %v1424_v20 = vadd.f32 %v1423_v11, %v3641_v45  ;;  %v1592_v49 = vpop.f32.mrf.mxu1 }
 0x350   :  { %v2040_v8 = vpop.f32.mrf.mxu2 }
 0x351   :  { %v1593_v57 = vadd.f32 %v1592_v49, %v1424_v20  ;;  %v2041_v24 = vadd.f32 %v3727_v18, %v2040_v8 }
 0x352   :  { %v2209_v25 = vpop.f32.mrf.mxu3 }
 0x353   :  { %v2848_v3 = vpop.eup %2847  ;;  %v1744_v7 = vmax.f32 %v1593_v57, 0.0  ;;  %v2210_v12 = vadd.f32 %v2209_v25, %v2041_v24  ;;  %v3973_v25 = vld [vmem:[#allocation24_spill] sm:$0xff] }
 0x354   :  { %2431 = vst [vmem:[#allocation11] sm:$0xff] %v2848_v3  ;;  %v3974_v3 = vld [vmem:[#allocation25_spill] sm:$0xff] }
 0x355   :  { %2849 = vtanh.f32 %v2210_v12  ;;  %2082 = vmatmul.bf16.gmra.mxu2 %v3440_v60  ;;  %v1852_v13 = vpack.c.bf16 %v1744_v7, %v1742_v51 }
 0x356   :  { %v1426_v5 = vpop.f32.mrf.mxu0 }
 0x357   :  { %v1595_v41 = vpop.f32.mrf.mxu1  ;;  %2251 = vmatmul.bf16.gmra.mxu3 %v1852_v13  ;;  %v1427_v42 = vadd.f32 %v1426_v5, %v3641_v45 }
 0x358   :  { %v2043_v23 = vpop.f32.mrf.mxu2 }
 0x359   :  { %v2044_v19 = vadd.f32 %v3727_v18, %v2043_v23  ;;  %1465 = vmatmul.bf16.gmra.mxu0 %v3970_v54  ;;  %v1596_v60 = vadd.f32 %v1595_v41, %v1427_v42 }
 0x35a   :  { %1634 = vmatmul.bf16.gmra.mxu1 %v3971_v29  ;;  %v2212_v22 = vpop.f32.mrf.mxu3 }
 0x35b   :  { %v2850_v15 = vpop.eup %2849  ;;  %v2213_v0 = vadd.f32 %v2212_v22, %v2044_v19  ;;  %v1746_v10 = vmax.f32 %v1596_v60, 0.0 }
 0x35c   :  { %2432 = vst [vmem:[#allocation11 + $0x8] sm:$0xff] %v2850_v15 }
 0x35d   :  { %2851 = vtanh.f32 %v2213_v0 }
 0x35e   :  { %v1428_v1 = vpop.f32.mrf.mxu0 }
 0x35f   :  { %v1429_v31 = vadd.f32 %v1428_v1, %v3641_v45  ;;  %v1597_v44 = vpop.f32.mrf.mxu1 }
 0x360   :  { %v2045_v17 = vpop.f32.mrf.mxu2 }
 0x361   :  { %v1598_v34 = vadd.f32 %v1597_v44, %v1429_v31  ;;  %v2046_v63 = vadd.f32 %v3727_v18, %v2045_v17  ;;  %v3975_v31 = vld [vmem:[#allocation29_spill] sm:$0xff] }
 0x362   :  { %v2214_v35 = vpop.f32.mrf.mxu3 }
 0x363   :  { %v2852_v21 = vpop.eup %2851  ;;  %v1748_v26 = vmax.f32 %v1598_v34, 0.0  ;;  %v2215_v11 = vadd.f32 %v2214_v35, %v2046_v63 }
 0x364   :  { %2433 = vst [vmem:[#allocation11 + $0x10] sm:$0xff] %v2852_v21  ;;  %v3976_v21 = vld [vmem:[#allocation27_spill] sm:$0xff] }
 0x365   :  { %2853 = vtanh.f32 %v2215_v11  ;;  %2087 = vmatmul.bf16.gmra.mxu2 %v3972_v36  ;;  %v1854_v20 = vpack.c.bf16 %v1748_v26, %v1746_v10  ;;  %v3977_v10 = vld [vmem:[#allocation28_spill] sm:$0xff] }
 0x366   :  { %v1431_v49 = vpop.f32.mrf.mxu0 }
 0x367   :  { %v1600_v8 = vpop.f32.mrf.mxu1  ;;  %2256 = vmatmul.bf16.gmra.mxu3 %v1854_v20  ;;  %v1432_v12 = vadd.f32 %v1431_v49, %v3641_v45 }
 0x368   :  { %v2048_v57 = vpop.f32.mrf.mxu2 }
 0x369   :  { %v2049_v24 = vadd.f32 %v3727_v18, %v2048_v57  ;;  %1470 = vmatmul.bf16.gmra.mxu0 %v3973_v25  ;;  %v1601_v41 = vadd.f32 %v1600_v8, %v1432_v12 }
 0x36a   :  { %1639 = vmatmul.bf16.gmra.mxu1 %v3974_v3  ;;  %v2217_v51 = vpop.f32.mrf.mxu3 }
 0x36b   :  { %v2854_v7 = vpop.eup %2853  ;;  %v2218_v13 = vadd.f32 %v2217_v51, %v2049_v24  ;;  %v1750_v0 = vmax.f32 %v1601_v41, 0.0 }
 0x36c   :  { %2434 = vst [vmem:[#allocation11 + $0x18] sm:$0xff] %v2854_v7 }
 0x36d   :  { %2855 = vtanh.f32 %v2218_v13 }
 0x36e   :  { %v1433_v5 = vpop.f32.mrf.mxu0 }
 0x36f   :  { %v1434_v23 = vadd.f32 %v1433_v5, %v3641_v45  ;;  %v1602_v19 = vpop.f32.mrf.mxu1 }
 0x370   :  { %v2050_v54 = vpop.f32.mrf.mxu2 }
 0x371   :  { %v1603_v29 = vadd.f32 %v1602_v19, %v1434_v23  ;;  %v2051_v22 = vadd.f32 %v3727_v18, %v2050_v54  ;;  %v3978_v23 = vld [vmem:[#allocation32_spill] sm:$0xff] }
 0x372   :  { %v2219_v15 = vpop.f32.mrf.mxu3 }
 0x373   :  { %v2856_v42 = vpop.eup %2855  ;;  %v1752_v1 = vmax.f32 %v1603_v29, 0.0  ;;  %v2220_v60 = vadd.f32 %v2219_v15, %v2051_v22 }
 0x374   :  { %2435 = vst [vmem:[#allocation11 + $0x20] sm:$0xff] %v2856_v42  ;;  %v3979_v42 = vld [vmem:[#allocation30_spill] sm:$0xff] }
 0x375   :  { %2857 = vtanh.f32 %v2220_v60  ;;  %2092 = vmatmul.bf16.gmra.mxu2 %v3975_v31  ;;  %v1856_v44 = vpack.c.bf16 %v1752_v1, %v1750_v0  ;;  %v3980_v0 = vld [vmem:[#allocation31_spill] sm:$0xff] }
 0x376   :  { %v1436_v17 = vpop.f32.mrf.mxu0 }
 0x377   :  { %v1605_v34 = vpop.f32.mrf.mxu1  ;;  %2261 = vmatmul.bf16.gmra.mxu3 %v1856_v44  ;;  %v1437_v36 = vadd.f32 %v1436_v17, %v3641_v45 }
 0x378   :  { %v2053_v63 = vpop.f32.mrf.mxu2 }
 0x379   :  { %v2054_v35 = vadd.f32 %v3727_v18, %v2053_v63  ;;  %1475 = vmatmul.bf16.gmra.mxu0 %v3976_v21  ;;  %v1606_v8 = vadd.f32 %v1605_v34, %v1437_v36 }
 0x37a   :  { %1644 = vmatmul.bf16.gmra.mxu1 %v3977_v10  ;;  %v2222_v26 = vpop.f32.mrf.mxu3 }
 0x37b   :  { %v2858_v11 = vpop.eup %2857  ;;  %v2223_v20 = vadd.f32 %v2222_v26, %v2054_v35  ;;  %v1754_v13 = vmax.f32 %v1606_v8, 0.0 }
 0x37c   :  { %2436 = vst [vmem:[#allocation11 + $0x28] sm:$0xff] %v2858_v11 }
 0x37d   :  { %2859 = vtanh.f32 %v2223_v20 }
 0x37e   :  { %v1438_v49 = vpop.f32.mrf.mxu0 }
 0x37f   :  { %v1439_v57 = vadd.f32 %v1438_v49, %v3641_v45  ;;  %v1607_v24 = vpop.f32.mrf.mxu1 }
 0x380   :  { %v2055_v25 = vpop.f32.mrf.mxu2 }
 0x381   :  { %v1608_v3 = vadd.f32 %v1607_v24, %v1439_v57  ;;  %v2056_v51 = vadd.f32 %v3727_v18, %v2055_v25 }
 0x382   :  { %v2224_v7 = vpop.f32.mrf.mxu3 }
 0x383   :  { %v2860_v12 = vpop.eup %2859  ;;  %v1756_v5 = vmax.f32 %v1608_v3, 0.0  ;;  %v2225_v41 = vadd.f32 %v2224_v7, %v2056_v51  ;;  %v3981_v7 = vld [vmem:[#allocation33_spill] sm:$0xff] }
 0x384   :  { %2437 = vst [vmem:[#allocation11 + $0x30] sm:$0xff] %v2860_v12 }
 0x385   :  { %2861 = vtanh.f32 %v2225_v41  ;;  %2097 = vmatmul.bf16.gmra.mxu2 %v3978_v23  ;;  %v1858_v19 = vpack.c.bf16 %v1756_v5, %v1754_v13 }
 0x386   :  { %v1441_v54 = vpop.f32.mrf.mxu0 }
 0x387   :  { %v1610_v29 = vpop.f32.mrf.mxu1  ;;  %2266 = vmatmul.bf16.gmra.mxu3 %v1858_v19  ;;  %v1442_v31 = vadd.f32 %v1441_v54, %v3641_v45 }
 0x388   :  { %v2058_v22 = vpop.f32.mrf.mxu2 }
 0x389   :  { %v2059_v15 = vadd.f32 %v3727_v18, %v2058_v22  ;;  %1480 = vmatmul.bf16.gmra.mxu0 %v3979_v42  ;;  %v1611_v34 = vadd.f32 %v1610_v29, %v1442_v31 }
 0x38a   :  { %1649 = vmatmul.bf16.gmra.mxu1 %v3980_v0  ;;  %v2227_v1 = vpop.f32.mrf.mxu3 }
 0x38b   :  { %v2862_v60 = vpop.eup %2861  ;;  %v2228_v44 = vadd.f32 %v2227_v1, %v2059_v15  ;;  %v1758_v20 = vmax.f32 %v1611_v34, 0.0 }
 0x38c   :  { %2438 = vst [vmem:[#allocation11 + $0x38] sm:$0xff] %v2862_v60 }
 0x38d   :  { %2863 = vtanh.f32 %v2228_v44 }
 0x38e   :  { %v1443_v17 = vpop.f32.mrf.mxu0 }
 0x38f   :  { %v1444_v63 = vadd.f32 %v1443_v17, %v3641_v45  ;;  %v1612_v35 = vpop.f32.mrf.mxu1 }
 0x390   :  { %v2060_v21 = vpop.f32.mrf.mxu2 }
 0x391   :  { %v1613_v10 = vadd.f32 %v1612_v35, %v1444_v63  ;;  %v2061_v26 = vadd.f32 %v3727_v18, %v2060_v21  ;;  %v3982_v35 = vld [vmem:[#allocation34_spill] sm:$0xff] }
 0x392   :  { %v2229_v11 = vpop.f32.mrf.mxu3 }
 0x393   :  { %v2864_v36 = vpop.eup %2863  ;;  %v1760_v49 = vmax.f32 %v1613_v10, 0.0  ;;  %v2230_v8 = vadd.f32 %v2229_v11, %v2061_v26 }
 0x394   :  { %2439 = vst [vmem:[#allocation11 + $0x40] sm:$0xff] %v2864_v36 }
 0x395   :  { %2865 = vtanh.f32 %v2230_v8  ;;  %2102 = vmatmul.bf16.gmra.mxu2 %v3496_v14  ;;  %v1860_v57 = vpack.c.bf16 %v1760_v49, %v1758_v20 }
 0x396   :  { %v1446_v24 = vpop.f32.mrf.mxu0 }
 0x397   :  { %v1615_v25 = vpop.f32.mrf.mxu1  ;;  %2271 = vmatmul.bf16.gmra.mxu3 %v1860_v57  ;;  %v1447_v5 = vadd.f32 %v1446_v24, %v3641_v45 }
 0x398   :  { %v2063_v3 = vpop.f32.mrf.mxu2 }
 0x399   :  { %v2064_v51 = vadd.f32 %v3727_v18, %v2063_v3  ;;  %1485 = vmatmul.bf16.gmra.mxu0 %v3490_v39  ;;  %v1616_v14 = vadd.f32 %v1615_v25, %v1447_v5 }
 0x39a   :  { %1654 = vmatmul.bf16.gmra.mxu1 %v3981_v7  ;;  %v2232_v12 = vpop.f32.mrf.mxu3 }
 0x39b   :  { %v2866_v13 = vpop.eup %2865  ;;  %v2233_v41 = vadd.f32 %v2232_v12, %v2064_v51  ;;  %v1762_v0 = vmax.f32 %v1616_v14, 0.0  ;;  %v3983_v14 = vld [vmem:[#allocation35_spill] sm:$0xff] }
 0x39c   :  { %2440 = vst [vmem:[#allocation11 + $0x48] sm:$0xff] %v2866_v13 }
 0x39d   :  { %2867 = vtanh.f32 %v2233_v41 }
 0x39e   :  { %v1448_v23 = vpop.f32.mrf.mxu0 }
 0x39f   :  { %v1449_v19 = vadd.f32 %v1448_v23, %v3641_v45  ;;  %v1617_v54 = vpop.f32.mrf.mxu1 }
 0x3a0   :  { %v2065_v29 = vpop.f32.mrf.mxu2 }
 0x3a1   :  { %v1618_v22 = vadd.f32 %v1617_v54, %v1449_v19  ;;  %v2066_v15 = vadd.f32 %v3727_v18, %v2065_v29 }
 0x3a2   :  { %v2234_v42 = vpop.f32.mrf.mxu3 }
 0x3a3   :  { %v2868_v39 = vpop.eup %2867  ;;  %v1764_v1 = vmax.f32 %v1618_v22, 0.0  ;;  %v2235_v60 = vadd.f32 %v2234_v42, %v2066_v15 }
 0x3a4   :  { %2441 = vst [vmem:[#allocation11 + $0x50] sm:$0xff] %v2868_v39 }
 0x3a5   :  { %2869 = vtanh.f32 %v2235_v60  ;;  %2107 = vmatmul.bf16.gmra.mxu2 %v3510_v62  ;;  %v1862_v31 = vpack.c.bf16 %v1764_v1, %v1762_v0 }
 0x3a6   :  { %v1451_v44 = vpop.f32.mrf.mxu0 }
 0x3a7   :  { %v1620_v17 = vpop.f32.mrf.mxu1  ;;  %2276 = vmatmul.bf16.gmra.mxu3 %v1862_v31  ;;  %v1452_v26 = vadd.f32 %v1451_v44, %v3641_v45 }
 0x3a8   :  { %v2068_v34 = vpop.f32.mrf.mxu2 }
 0x3a9   :  { %v2069_v63 = vadd.f32 %v3727_v18, %v2068_v34  ;;  %1490 = vmatmul.bf16.gmra.mxu0 %v3504_v6  ;;  %v1621_v62 = vadd.f32 %v1620_v17, %v1452_v26 }
 0x3aa   :  { %1659 = vmatmul.bf16.gmra.mxu1 %v3982_v35  ;;  %v2237_v21 = vpop.f32.mrf.mxu3 }
 0x3ab   :  { %v2870_v10 = vpop.eup %2869  ;;  %v2238_v11 = vadd.f32 %v2237_v21, %v2069_v63  ;;  %v1766_v3 = vmax.f32 %v1621_v62, 0.0 }
 0x3ac   :  { %2442 = vst [vmem:[#allocation11 + $0x58] sm:$0xff] %v2870_v10 }
 0x3ad   :  { %2871 = vtanh.f32 %v2238_v11  ;;  %v3984_v11 = vld [vmem:[#allocation36_spill] sm:$0xff] }
 0x3ae   :  { %v1453_v36 = vpop.f32.mrf.mxu0 }
 0x3af   :  { %v1454_v20 = vadd.f32 %v1453_v36, %v3641_v45  ;;  %v1622_v49 = vpop.f32.mrf.mxu1 }
 0x3b0   :  { %v2070_v8 = vpop.f32.mrf.mxu2 }
 0x3b1   :  { %v1623_v57 = vadd.f32 %v1622_v49, %v1454_v20  ;;  %v2071_v24 = vadd.f32 %v3727_v18, %v2070_v8 }
 0x3b2   :  { %v2239_v25 = vpop.f32.mrf.mxu3 }
 0x3b3   :  { %v2872_v6 = vpop.eup %2871  ;;  %v1768_v51 = vmax.f32 %v1623_v57, 0.0  ;;  %v2240_v7 = vadd.f32 %v2239_v25, %v2071_v24 }
 0x3b4   :  { %2443 = vst [vmem:[#allocation11 + $0x60] sm:$0xff] %v2872_v6 }
 0x3b5   :  { %2873 = vtanh.f32 %v2240_v7  ;;  %2112 = vmatmul.bf16.gmra.mxu2 %v3526_v28  ;;  %v1864_v12 = vpack.c.bf16 %v1768_v51, %v1766_v3 }
 0x3b6   :  { %v1456_v13 = vpop.f32.mrf.mxu0 }
 0x3b7   :  { %v1625_v5 = vpop.f32.mrf.mxu1  ;;  %2281 = vmatmul.bf16.gmra.mxu3 %v1864_v12  ;;  %v1457_v29 = vadd.f32 %v1456_v13, %v3641_v45 }
 0x3b8   :  { %v2073_v41 = vpop.f32.mrf.mxu2 }
 0x3b9   :  { %v2074_v23 = vadd.f32 %v3727_v18, %v2073_v41  ;;  %1495 = vmatmul.bf16.gmra.mxu0 %v3520_v2  ;;  %v1626_v28 = vadd.f32 %v1625_v5, %v1457_v29 }
 0x3ba   :  { %1664 = vmatmul.bf16.gmra.mxu1 %v3983_v14  ;;  %v2242_v19 = vpop.f32.mrf.mxu3 }
 0x3bb   :  { %v2874_v54 = vpop.eup %2873  ;;  %v2243_v22 = vadd.f32 %v2242_v19, %v2074_v23  ;;  %v1770_v44 = vmax.f32 %v1626_v28, 0.0 }
 0x3bc   :  { %2444 = vst [vmem:[#allocation11 + $0x68] sm:$0xff] %v2874_v54  ;;  %v3985_v54 = vld [vmem:[#allocation37_spill] sm:$0xff] }
 0x3bd   :  { %2875 = vtanh.f32 %v2243_v22 }
 0x3be   :  { %v1458_v15 = vpop.f32.mrf.mxu0 }
 0x3bf   :  { %v1459_v42 = vadd.f32 %v1458_v15, %v3641_v45  ;;  %v1627_v39 = vpop.f32.mrf.mxu1 }
 0x3c0   :  { %v2075_v0 = vpop.f32.mrf.mxu2 }
 0x3c1   :  { %v1628_v1 = vadd.f32 %v1627_v39, %v1459_v42  ;;  %v2076_v60 = vadd.f32 %v3727_v18, %v2075_v0 }
 0x3c2   :  { %v2244_v31 = vpop.f32.mrf.mxu3 }
 0x3c3   :  { %v2876_v2 = vpop.eup %2875  ;;  %v1772_v17 = vmax.f32 %v1628_v1, 0.0  ;;  %v2245_v34 = vadd.f32 %v2244_v31, %v2076_v60 }
 0x3c4   :  { %2445 = vst [vmem:[#allocation11 + $0x70] sm:$0xff] %v2876_v2 }
 0x3c5   :  { %2877 = vtanh.f32 %v2245_v34  ;;  %2117 = vmatmul.bf16.gmra.mxu2 %v3542_v47  ;;  %v1866_v63 = vpack.c.bf16 %v1772_v17, %v1770_v44 }
 0x3c6   :  { %v1461_v35 = vpop.f32.mrf.mxu0 }
 0x3c7   :  { %v1630_v21 = vpop.f32.mrf.mxu1  ;;  %2286 = vmatmul.bf16.gmra.mxu3 %v1866_v63  ;;  %v1462_v20 = vadd.f32 %v1461_v35, %v3641_v45 }
 0x3c8   :  { %v2078_v10 = vpop.f32.mrf.mxu2 }
 0x3c9   :  { %v2079_v26 = vadd.f32 %v3727_v18, %v2078_v10  ;;  %1500 = vmatmul.bf16.gmra.mxu0 %v3536_v59  ;;  %v1631_v47 = vadd.f32 %v1630_v21, %v1462_v20 }
 0x3ca   :  { %1669 = vmatmul.bf16.gmra.mxu1 %v3984_v11  ;;  %v2247_v36 = vpop.f32.mrf.mxu3  ;;  %v3986_v11 = vld [vmem:[#allocation38_spill] sm:$0xff] }
 0x3cb   :  { %v2878_v62 = vpop.eup %2877  ;;  %v2248_v49 = vadd.f32 %v2247_v36, %v2079_v26  ;;  %v1774_v7 = vmax.f32 %v1631_v47, 0.0 }
 0x3cc   :  { %2446 = vst [vmem:[#allocation11 + $0x78] sm:$0xff] %v2878_v62 }
 0x3cd   :  { %2879 = vtanh.f32 %v2248_v49 }
 0x3ce   :  { %v1463_v8 = vpop.f32.mrf.mxu0 }
 0x3cf   :  { %v1464_v57 = vadd.f32 %v1463_v8, %v3641_v45  ;;  %v1632_v24 = vpop.f32.mrf.mxu1 }
 0x3d0   :  { %v2080_v25 = vpop.f32.mrf.mxu2 }
 0x3d1   :  { %v1633_v6 = vadd.f32 %v1632_v24, %v1464_v57  ;;  %v2081_v3 = vadd.f32 %v3727_v18, %v2080_v25 }
 0x3d2   :  { %v2249_v51 = vpop.f32.mrf.mxu3 }
 0x3d3   :  { %v2880_v59 = vpop.eup %2879  ;;  %v1776_v12 = vmax.f32 %v1633_v6, 0.0  ;;  %v2250_v13 = vadd.f32 %v2249_v51, %v2081_v3 }
 0x3d4   :  { %2447 = vst [vmem:[#allocation11 + $0x80] sm:$0xff] %v2880_v59 }
 0x3d5   :  { %2881 = vtanh.f32 %v2250_v13  ;;  %2122 = vmatmul.bf16.gmra.mxu2 %v3558_v38  ;;  %v1868_v5 = vpack.c.bf16 %v1776_v12, %v1774_v7 }
 0x3d6   :  { %v1466_v41 = vpop.f32.mrf.mxu0 }
 0x3d7   :  { %v1635_v23 = vpop.f32.mrf.mxu1  ;;  %2291 = vmatmul.bf16.gmra.mxu3 %v1868_v5  ;;  %v1467_v15 = vadd.f32 %v1466_v41, %v3641_v45 }
 0x3d8   :  { %v2083_v14 = vpop.f32.mrf.mxu2 }
 0x3d9   :  { %v2084_v19 = vadd.f32 %v3727_v18, %v2083_v14  ;;  %1505 = vmatmul.bf16.gmra.mxu0 %v3552_v32  ;;  %v1636_v38 = vadd.f32 %v1635_v23, %v1467_v15  ;;  %v3987_v14 = vld [vmem:[#allocation39_spill] sm:$0xff] }
 0x3da   :  { %1674 = vmatmul.bf16.gmra.mxu1 %v3985_v54  ;;  %v2252_v29 = vpop.f32.mrf.mxu3 }
 0x3db   :  { %v2882_v22 = vpop.eup %2881  ;;  %v2253_v28 = vadd.f32 %v2252_v29, %v2084_v19  ;;  %v1778_v44 = vmax.f32 %v1636_v38, 0.0 }
 0x3dc   :  { %2448 = vst [vmem:[#allocation11 + $0x88] sm:$0xff] %v2882_v22 }
 0x3dd   :  { %2883 = vtanh.f32 %v2253_v28 }
 0x3de   :  { %v1468_v42 = vpop.f32.mrf.mxu0 }
 0x3df   :  { %v1469_v39 = vadd.f32 %v1468_v42, %v3641_v45  ;;  %v1637_v0 = vpop.f32.mrf.mxu1 }
 0x3e0   :  { %v2085_v1 = vpop.f32.mrf.mxu2 }
 0x3e1   :  { %v1638_v60 = vadd.f32 %v1637_v0, %v1469_v39  ;;  %v2086_v31 = vadd.f32 %v3727_v18, %v2085_v1 }
 0x3e2   :  { %v2254_v2 = vpop.f32.mrf.mxu3 }
 0x3e3   :  { %v2884_v32 = vpop.eup %2883  ;;  %v1780_v17 = vmax.f32 %v1638_v60, 0.0  ;;  %v2255_v34 = vadd.f32 %v2254_v2, %v2086_v31 }
 0x3e4   :  { %2449 = vst [vmem:[#allocation11 + $0x90] sm:$0xff] %v2884_v32 }
 0x3e5   :  { %2885 = vtanh.f32 %v2255_v34  ;;  %2127 = vmatmul.bf16.gmra.mxu2 %v3574_v50  ;;  %v1870_v63 = vpack.c.bf16 %v1780_v17, %v1778_v44 }
 0x3e6   :  { %v1471_v35 = vpop.f32.mrf.mxu0 }
 0x3e7   :  { %v1640_v21 = vpop.f32.mrf.mxu1  ;;  %2296 = vmatmul.bf16.gmra.mxu3 %v1870_v63  ;;  %v1472_v20 = vadd.f32 %v1471_v35, %v3641_v45  ;;  %v3988_v35 = vld [vmem:[#allocation40_spill] sm:$0xff] }
 0x3e8   :  { %v2088_v10 = vpop.f32.mrf.mxu2 }
 0x3e9   :  { %v2089_v26 = vadd.f32 %v3727_v18, %v2088_v10  ;;  %1510 = vmatmul.bf16.gmra.mxu0 %v3568_v56  ;;  %v1641_v50 = vadd.f32 %v1640_v21, %v1472_v20 }
 0x3ea   :  { %1679 = vmatmul.bf16.gmra.mxu1 %v3986_v11  ;;  %v2257_v36 = vpop.f32.mrf.mxu3 }
 0x3eb   :  { %v2886_v62 = vpop.eup %2885  ;;  %v2258_v49 = vadd.f32 %v2257_v36, %v2089_v26  ;;  %v1782_v51 = vmax.f32 %v1641_v50, 0.0 }
 0x3ec   :  { %2450 = vst [vmem:[#allocation11 + $0x98] sm:$0xff] %v2886_v62 }
 0x3ed   :  { %2887 = vtanh.f32 %v2258_v49 }
 0x3ee   :  { %v1473_v8 = vpop.f32.mrf.mxu0 }
 0x3ef   :  { %v1474_v47 = vadd.f32 %v1473_v8, %v3641_v45  ;;  %v1642_v57 = vpop.f32.mrf.mxu1 }
 0x3f0   :  { %v2090_v24 = vpop.f32.mrf.mxu2 }
 0x3f1   :  { %v1643_v25 = vadd.f32 %v1642_v57, %v1474_v47  ;;  %v2091_v6 = vadd.f32 %v3727_v18, %v2090_v24 }
 0x3f2   :  { %v2259_v3 = vpop.f32.mrf.mxu3 }
 0x3f3   :  { %v2888_v56 = vpop.eup %2887  ;;  %v1784_v59 = vmax.f32 %v1643_v25, 0.0  ;;  %v2260_v7 = vadd.f32 %v2259_v3, %v2091_v6 }
 0x3f4   :  { %2451 = vst [vmem:[#allocation11 + $0xa0] sm:$0xff] %v2888_v56 }
 0x3f5   :  { %2889 = vtanh.f32 %v2260_v7  ;;  %2132 = vmatmul.bf16.gmra.mxu2 %v3590_v46  ;;  %v1872_v12 = vpack.c.bf16 %v1784_v59, %v1782_v51  ;;  %v3989_v7 = vld [vmem:[#allocation41_spill] sm:$0xff] }
 0x3f6   :  { %v1476_v13 = vpop.f32.mrf.mxu0 }
 0x3f7   :  { %v1645_v5 = vpop.f32.mrf.mxu1  ;;  %2301 = vmatmul.bf16.gmra.mxu3 %v1872_v12  ;;  %v1477_v29 = vadd.f32 %v1476_v13, %v3641_v45 }
 0x3f8   :  { %v2093_v41 = vpop.f32.mrf.mxu2 }
 0x3f9   :  { %v2094_v23 = vadd.f32 %v3727_v18, %v2093_v41  ;;  %1515 = vmatmul.bf16.gmra.mxu0 %v3584_v55  ;;  %v1646_v46 = vadd.f32 %v1645_v5, %v1477_v29 }
 0x3fa   :  { %1684 = vmatmul.bf16.gmra.mxu1 %v3987_v14  ;;  %v2262_v19 = vpop.f32.mrf.mxu3 }
 0x3fb   :  { %v2890_v54 = vpop.eup %2889  ;;  %v2263_v22 = vadd.f32 %v2262_v19, %v2094_v23  ;;  %v1786_v60 = vmax.f32 %v1646_v46, 0.0 }
 0x3fc   :  { %2452 = vst [vmem:[#allocation11 + $0xa8] sm:$0xff] %v2890_v54 }
 0x3fd   :  { %2891 = vtanh.f32 %v2263_v22 }
 0x3fe   :  { %v1478_v15 = vpop.f32.mrf.mxu0 }
 0x3ff   :  { %v1479_v28 = vadd.f32 %v1478_v15, %v3641_v45  ;;  %v1647_v42 = vpop.f32.mrf.mxu1 }
 0x400   :  { %v2095_v38 = vpop.f32.mrf.mxu2 }
 0x401   :  { %v1648_v39 = vadd.f32 %v1647_v42, %v1479_v28  ;;  %v2096_v0 = vadd.f32 %v3727_v18, %v2095_v38 }
 0x402   :  { %v2264_v1 = vpop.f32.mrf.mxu3 }
 0x403   :  { %v2892_v55 = vpop.eup %2891  ;;  %v1788_v31 = vmax.f32 %v1648_v39, 0.0  ;;  %v2265_v2 = vadd.f32 %v2264_v1, %v2096_v0 }
 0x404   :  { %2453 = vst [vmem:[#allocation11 + $0xb0] sm:$0xff] %v2892_v55 }
 0x405   :  { %v1874_v32 = vpack.c.bf16 %v1788_v31, %v1786_v60  ;;  %2893 = vtanh.f32 %v2265_v2  ;;  %2137 = vmatmul.bf16.gmra.mxu2 %v3606_v27  ;;  %v3990_v60 = vld [vmem:[#allocation42_spill] sm:$0xff]  ;;  %v3991_v31 = vld [vmem:[#allocation43_spill] sm:$0xff] }
 0x406   :  { %v1481_v44 = vpop.f32.mrf.mxu0 }
 0x407   :  { %v1650_v17 = vpop.f32.mrf.mxu1  ;;  %2306 = vmatmul.bf16.gmra.mxu3 %v1874_v32  ;;  %v1482_v26 = vadd.f32 %v1481_v44, %v3641_v45 }
 0x408   :  { %v2098_v34 = vpop.f32.mrf.mxu2 }
 0x409   :  { %v2099_v63 = vadd.f32 %v3727_v18, %v2098_v34  ;;  %1520 = vmatmul.bf16.gmra.mxu0 %v3600_v30  ;;  %v1651_v62 = vadd.f32 %v1650_v17, %v1482_v26 }
 0x40a   :  { %1689 = vmatmul.bf16.gmra.mxu1 %v3988_v35  ;;  %v2267_v21 = vpop.f32.mrf.mxu3 }
 0x40b   :  { %v2894_v10 = vpop.eup %2893  ;;  %v2268_v11 = vadd.f32 %v2267_v21, %v2099_v63  ;;  %v1790_v57 = vmax.f32 %v1651_v62, 0.0 }
 0x40c   :  { %2454 = vst [vmem:[#allocation11 + $0xb8] sm:$0xff] %v2894_v10 }
 0x40d   :  { %2895 = vtanh.f32 %v2268_v11 }
 0x40e   :  { %v1483_v36 = vpop.f32.mrf.mxu0 }
 0x40f   :  { %v1484_v27 = vadd.f32 %v1483_v36, %v3641_v45  ;;  %v1652_v20 = vpop.f32.mrf.mxu1 }
 0x410   :  { %v2100_v49 = vpop.f32.mrf.mxu2 }
 0x411   :  { %v1653_v8 = vadd.f32 %v1652_v20, %v1484_v27  ;;  %v2101_v50 = vadd.f32 %v3727_v18, %v2100_v49 }
 0x412   :  { %v2269_v47 = vpop.f32.mrf.mxu3 }
 0x413   :  { %v2896_v30 = vpop.eup %2895  ;;  %v1792_v24 = vmax.f32 %v1653_v8, 0.0  ;;  %v2270_v25 = vadd.f32 %v2269_v47, %v2101_v50 }
 0x414   :  { %2455 = vst [vmem:[#allocation11 + $0xc0] sm:$0xff] %v2896_v30 }
 0x415   :  { %v1876_v6 = vpack.c.bf16 %v1792_v24, %v1790_v57  ;;  %2897 = vtanh.f32 %v2270_v25  ;;  %2142 = vmatmul.bf16.gmra.mxu2 %v3622_v33 }
 0x416   :  { %v1486_v3 = vpop.f32.mrf.mxu0 }
 0x417   :  { %v1655_v56 = vpop.f32.mrf.mxu1  ;;  %2311 = vmatmul.bf16.gmra.mxu3 %v1876_v6  ;;  %v1487_v5 = vadd.f32 %v1486_v3, %v3641_v45 }
 0x418   :  { %v2103_v51 = vpop.f32.mrf.mxu2 }
 0x419   :  { %v2104_v59 = vadd.f32 %v3727_v18, %v2103_v51  ;;  %1525 = vmatmul.bf16.gmra.mxu0 %v3616_v48  ;;  %v1656_v14 = vadd.f32 %v1655_v56, %v1487_v5 }
 0x41a   :  { %1694 = vmatmul.bf16.gmra.mxu1 %v3989_v7  ;;  %v2272_v12 = vpop.f32.mrf.mxu3 }
 0x41b   :  { %v2898_v13 = vpop.eup %2897  ;;  %v2273_v41 = vadd.f32 %v2272_v12, %v2104_v59  ;;  %v1794_v46 = vmax.f32 %v1656_v14, 0.0 }
 0x41c   :  { %2456 = vst [vmem:[#allocation11 + $0xc8] sm:$0xff] %v2898_v13 }
 0x41d   :  { %2899 = vtanh.f32 %v2273_v41 }
 0x41e   :  { %v1488_v23 = vpop.f32.mrf.mxu0 }
 0x41f   :  { %v1489_v33 = vadd.f32 %v1488_v23, %v3641_v45  ;;  %v1657_v19 = vpop.f32.mrf.mxu1 }
 0x420   :  { %v2105_v54 = vpop.f32.mrf.mxu2 }
 0x421   :  { %v1658_v29 = vadd.f32 %v1657_v19, %v1489_v33  ;;  %v2106_v22 = vadd.f32 %v3727_v18, %v2105_v54 }
 0x422   :  { %v2274_v15 = vpop.f32.mrf.mxu3 }
 0x423   :  { %v2900_v48 = vpop.eup %2899  ;;  %v1796_v28 = vmax.f32 %v1658_v29, 0.0  ;;  %v2275_v42 = vadd.f32 %v2274_v15, %v2106_v22 }
 0x424   :  { %2457 = vst [vmem:[#allocation11 + $0xd0] sm:$0xff] %v2900_v48 }
 0x425   :  { %v1878_v38 = vpack.c.bf16 %v1796_v28, %v1794_v46  ;;  %2901 = vtanh.f32 %v2275_v42  ;;  %2147 = vmatmul.bf16.gmra.mxu2 %v3643_v4 }
 0x426   :  { %v1491_v39 = vpop.f32.mrf.mxu0 }
 0x427   :  { %v1660_v0 = vpop.f32.mrf.mxu1  ;;  %2316 = vmatmul.bf16.gmra.mxu3 %v1878_v38  ;;  %v1492_v44 = vadd.f32 %v1491_v39, %v3641_v45 }
 0x428   :  { %v2108_v1 = vpop.f32.mrf.mxu2 }
 0x429   :  { %v2109_v55 = vadd.f32 %v3727_v18, %v2108_v1  ;;  %1530 = vmatmul.bf16.gmra.mxu0 %v3990_v60  ;;  %v1661_v63 = vadd.f32 %v1660_v0, %v1492_v44 }
 0x42a   :  { %1699 = vmatmul.bf16.gmra.mxu1 %v3991_v31  ;;  %v2277_v2 = vpop.f32.mrf.mxu3 }
 0x42b   :  { %v2902_v32 = vpop.eup %2901  ;;  %v2278_v17 = vadd.f32 %v2277_v2, %v2109_v55  ;;  %v1798_v62 = vmax.f32 %v1661_v63, 0.0 }
 0x42c   :  { %2458 = vst [vmem:[#allocation11 + $0xd8] sm:$0xff] %v2902_v32 }
 0x42d   :  { %2903 = vtanh.f32 %v2278_v17 }
 0x42e   :  { %v1493_v34 = vpop.f32.mrf.mxu0 }
 0x42f   :  { %v1494_v4 = vadd.f32 %v1493_v34, %v3641_v45  ;;  %v1662_v35 = vpop.f32.mrf.mxu1 }
 0x430   :  { %v2110_v21 = vpop.f32.mrf.mxu2 }
 0x431   :  { %v1663_v10 = vadd.f32 %v1662_v35, %v1494_v4  ;;  %v2111_v26 = vadd.f32 %v3727_v18, %v2110_v21 }
 0x432   :  { %v2279_v11 = vpop.f32.mrf.mxu3 }
 0x433   :  { %v2904_v36 = vpop.eup %2903  ;;  %v1800_v27 = vmax.f32 %v1663_v10, 0.0  ;;  %v2280_v20 = vadd.f32 %v2279_v11, %v2111_v26 }
 0x434   :  { %2459 = vst [vmem:[#allocation11 + $0xe0] sm:$0xff] %v2904_v36 }
 0x435   :  { %v1880_v49 = vpack.c.bf16 %v1800_v27, %v1798_v62  ;;  %2905 = vtanh.f32 %v2280_v20  ;;  %2152 = vmatmul.bf16.gmra.mxu2 %v3652_v43 }
 0x436   :  { %v1496_v8 = vpop.f32.mrf.mxu0 }
 0x437   :  { %v1665_v50 = vpop.f32.mrf.mxu1  ;;  %2321 = vmatmul.bf16.gmra.mxu3 %v1880_v49  ;;  %v1497_v25 = vadd.f32 %v1496_v8, %v3641_v45 }
 0x438   :  { %v2113_v47 = vpop.f32.mrf.mxu2 }
 0x439   :  { %v2114_v30 = vadd.f32 %v3727_v18, %v2113_v47  ;;  %v1666_v56 = vadd.f32 %v1665_v50, %v1497_v25 }
 0x43a   :  { %v2282_v57 = vpop.f32.mrf.mxu3 }
 0x43b   :  { %v2906_v24 = vpop.eup %2905  ;;  %v2283_v6 = vadd.f32 %v2282_v57, %v2114_v30  ;;  %v1802_v41 = vmax.f32 %v1666_v56, 0.0 }
 0x43c   :  { %2460 = vst [vmem:[#allocation11 + $0xe8] sm:$0xff] %v2906_v24 }
 0x43d   :  { %2907 = vtanh.f32 %v2283_v6 }
 0x43e   :  { %v1498_v3 = vpop.f32.mrf.mxu0 }
 0x43f   :  { %v1499_v51 = vadd.f32 %v1498_v3, %v3641_v45  ;;  %v1667_v59 = vpop.f32.mrf.mxu1 }
 0x440   :  { %v2115_v7 = vpop.f32.mrf.mxu2 }
 0x441   :  { %v1668_v43 = vadd.f32 %v1667_v59, %v1499_v51  ;;  %v2116_v12 = vadd.f32 %v3727_v18, %v2115_v7  ;;  %v3854_v51 = vld [vmem:[%s3911_s6] ss:$0 sm:$0xff]  ;;  %s3138_s6 = smov [#allocation11]  }
 0x442   :  { %v2284_v13 = vpop.f32.mrf.mxu3  ;;  %s2499_s11 = sshll.u32 %s3138_s6, 4  ;;  %s2500_s11 = int_to_ptr.vmem [resolvable:$true] %s2499_s11 }
 0x443   :  { %v2908_v5 = vpop.eup %2907  ;;  %v1804_v23 = vmax.f32 %v1668_v43, 0.0  ;;  %v2285_v14 = vadd.f32 %v2284_v13, %v2116_v12 }
 0x444   :  { %2461 = vst [vmem:[#allocation11 + $0xf0] sm:$0xff] %v2908_v5 }
 0x445   :  { %v1882_v33 = vpack.c.bf16 %v1804_v23, %v1802_v41  ;;  %2909 = vtanh.f32 %v2285_v14  ;;  %2157 = vmatmul.bf16.gmra.mxu2 %v3661_v16 }
 0x446   :  { %v1501_v19 = vpop.f32.mrf.mxu0 }
 0x447   :  { %v1670_v54 = vpop.f32.mrf.mxu1  ;;  %2326 = vmatmul.bf16.gmra.mxu3 %v1882_v33  ;;  %v1502_v46 = vadd.f32 %v1501_v19, %v3641_v45 }
 0x448   :  { %v2118_v29 = vpop.f32.mrf.mxu2 }
 0x449   :  { %v2119_v22 = vadd.f32 %v3727_v18, %v2118_v29  ;;  %v1671_v38 = vadd.f32 %v1670_v54, %v1502_v46 }
 0x44a   :  { %v2287_v15 = vpop.f32.mrf.mxu3 }
 0x44b   :  { %v2910_v48 = vpop.eup %2909  ;;  %v2288_v28 = vadd.f32 %v2287_v15, %v2119_v22  ;;  %v1806_v2 = vmax.f32 %v1671_v38, 0.0 }
 0x44c   :  { %2462 = vst [vmem:[#allocation11 + $0xf8] sm:$0xff] %v2910_v48 }
 0x44d   :  { %2911 = vtanh.f32 %v2288_v28 }
 0x44e   :  { %v1503_v42 = vpop.f32.mrf.mxu0 }
 0x44f   :  { %v1504_v39 = vadd.f32 %v1503_v42, %v3641_v45  ;;  %v1672_v0 = vpop.f32.mrf.mxu1 }
 0x450   :  { %v2120_v1 = vpop.f32.mrf.mxu2 }
 0x451   :  { %v1673_v16 = vadd.f32 %v1672_v0, %v1504_v39  ;;  %v2121_v55 = vadd.f32 %v3727_v18, %v2120_v1 }
 0x452   :  { %v2289_v60 = vpop.f32.mrf.mxu3 }
 0x453   :  { %v2912_v31 = vpop.eup %2911  ;;  %v1808_v32 = vmax.f32 %v1673_v16, 0.0  ;;  %v2290_v44 = vadd.f32 %v2289_v60, %v2121_v55 }
 0x454   :  { %2463 = vst [vmem:[#allocation11 + $0x100] sm:$0xff] %v2912_v31 }
 0x455   :  { %v1884_v17 = vpack.c.bf16 %v1808_v32, %v1806_v2  ;;  %2913 = vtanh.f32 %v2290_v44  ;;  %2162 = vmatmul.bf16.gmra.mxu2 %v3670_v53 }
 0x456   :  { %v1506_v34 = vpop.f32.mrf.mxu0 }
 0x457   :  { %v1675_v63 = vpop.f32.mrf.mxu1  ;;  %2331 = vmatmul.bf16.gmra.mxu3 %v1884_v17  ;;  %v1507_v26 = vadd.f32 %v1506_v34, %v3641_v45 }
 0x458   :  { %v2123_v4 = vpop.f32.mrf.mxu2 }
 0x459   :  { %v2124_v35 = vadd.f32 %v3727_v18, %v2123_v4  ;;  %v1676_v62 = vadd.f32 %v1675_v63, %v1507_v26 }
 0x45a   :  { %v2292_v21 = vpop.f32.mrf.mxu3 }
 0x45b   :  { %v2914_v10 = vpop.eup %2913  ;;  %v2293_v11 = vadd.f32 %v2292_v21, %v2124_v35  ;;  %v1810_v30 = vmax.f32 %v1676_v62, 0.0 }
 0x45c   :  { %2464 = vst [vmem:[#allocation11 + $0x108] sm:$0xff] %v2914_v10 }
 0x45d   :  { %2915 = vtanh.f32 %v2293_v11 }
 0x45e   :  { %v1508_v36 = vpop.f32.mrf.mxu0 }
 0x45f   :  { %v1509_v27 = vadd.f32 %v1508_v36, %v3641_v45  ;;  %v1677_v20 = vpop.f32.mrf.mxu1 }
 0x460   :  { %v2125_v49 = vpop.f32.mrf.mxu2 }
 0x461   :  { %v1678_v53 = vadd.f32 %v1677_v20, %v1509_v27  ;;  %v2126_v8 = vadd.f32 %v3727_v18, %v2125_v49 }
 0x462   :  { %v2294_v50 = vpop.f32.mrf.mxu3 }
 0x463   :  { %v2916_v47 = vpop.eup %2915  ;;  %v1812_v57 = vmax.f32 %v1678_v53, 0.0  ;;  %v2295_v24 = vadd.f32 %v2294_v50, %v2126_v8 }
 0x464   :  { %2465 = vst [vmem:[#allocation11 + $0x110] sm:$0xff] %v2916_v47 }
 0x465   :  { %v1886_v25 = vpack.c.bf16 %v1812_v57, %v1810_v30  ;;  %2917 = vtanh.f32 %v2295_v24  ;;  %2167 = vmatmul.bf16.gmra.mxu2 %v3679_v58 }
 0x466   :  { %v1511_v6 = vpop.f32.mrf.mxu0 }
 0x467   :  { %v1680_v3 = vpop.f32.mrf.mxu1  ;;  %2336 = vmatmul.bf16.gmra.mxu3 %v1886_v25  ;;  %v1512_v43 = vadd.f32 %v1511_v6, %v3641_v45 }
 0x468   :  { %v2128_v56 = vpop.f32.mrf.mxu2 }
 0x469   :  { %v2129_v18 = vadd.f32 %v3854_v51, %v2128_v56  ;;  %v1681_v58 = vadd.f32 %v1680_v3, %v1512_v43 }
 0x46a   :  { %v2297_v59 = vpop.f32.mrf.mxu3 }
 0x46b   :  { %v2918_v7 = vpop.eup %2917  ;;  %v2298_v12 = vadd.f32 %v2297_v59, %v2129_v18  ;;  %v1814_v29 = vmax.f32 %v1681_v58, 0.0 }
 0x46c   :  { %2466 = vst [vmem:[#allocation11 + $0x118] sm:$0xff] %v2918_v7 }
 0x46d   :  { %2919 = vtanh.f32 %v2298_v12 }
 0x46e   :  { %v1513_v13 = vpop.f32.mrf.mxu0 }
 0x46f   :  { %v1514_v5 = vadd.f32 %v1513_v13, %v3641_v45  ;;  %v1682_v41 = vpop.f32.mrf.mxu1 }
 0x470   :  { %v2130_v23 = vpop.f32.mrf.mxu2 }
 0x471   :  { %v1683_v14 = vadd.f32 %v1682_v41, %v1514_v5  ;;  %v2131_v33 = vadd.f32 %v3854_v51, %v2130_v23 }
 0x472   :  { %v2299_v19 = vpop.f32.mrf.mxu3 }
 0x473   :  { %v2920_v54 = vpop.eup %2919  ;;  %v1816_v22 = vmax.f32 %v1683_v14, 0.0  ;;  %v2300_v15 = vadd.f32 %v2299_v19, %v2131_v33 }
 0x474   :  { %2467 = vst [vmem:[#allocation11 + $0x120] sm:$0xff] %v2920_v54 }
 0x475   :  { %v1888_v48 = vpack.c.bf16 %v1816_v22, %v1814_v29  ;;  %2921 = vtanh.f32 %v2300_v15  ;;  %2172 = vmatmul.bf16.gmra.mxu2 %v3688_v61 }
 0x476   :  { %v1516_v46 = vpop.f32.mrf.mxu0 }
 0x477   :  { %v1685_v28 = vpop.f32.mrf.mxu1  ;;  %2341 = vmatmul.bf16.gmra.mxu3 %v1888_v48  ;;  %v1517_v1 = vadd.f32 %v1516_v46, %v3641_v45 }
 0x478   :  { %v2133_v42 = vpop.f32.mrf.mxu2 }
 0x479   :  { %v2134_v38 = vadd.f32 %v3854_v51, %v2133_v42  ;;  %v1686_v60 = vadd.f32 %v1685_v28, %v1517_v1 }
 0x47a   :  { %v2302_v39 = vpop.f32.mrf.mxu3 }
 0x47b   :  { %v2922_v0 = vpop.eup %2921  ;;  %v2303_v16 = vadd.f32 %v2302_v39, %v2134_v38  ;;  %v1818_v63 = vmax.f32 %v1686_v60, 0.0 }
 0x47c   :  { %2468 = vst [vmem:[#allocation11 + $0x128] sm:$0xff] %v2922_v0 }
 0x47d   :  { %2923 = vtanh.f32 %v2303_v16 }
 0x47e   :  { %v1518_v55 = vpop.f32.mrf.mxu0 }
 0x47f   :  { %v1519_v31 = vadd.f32 %v1518_v55, %v3641_v45  ;;  %v1687_v2 = vpop.f32.mrf.mxu1 }
 0x480   :  { %v2135_v32 = vpop.f32.mrf.mxu2 }
 0x481   :  { %v1688_v61 = vadd.f32 %v1687_v2, %v1519_v31  ;;  %v2136_v44 = vadd.f32 %v3854_v51, %v2135_v32 }
 0x482   :  { %v2304_v17 = vpop.f32.mrf.mxu3 }
 0x483   :  { %v2924_v34 = vpop.eup %2923  ;;  %v1820_v4 = vmax.f32 %v1688_v61, 0.0  ;;  %v2305_v35 = vadd.f32 %v2304_v17, %v2136_v44 }
 0x484   :  { %2469 = vst [vmem:[#allocation11 + $0x130] sm:$0xff] %v2924_v34 }
 0x485   :  { %v1890_v21 = vpack.c.bf16 %v1820_v4, %v1818_v63  ;;  %2925 = vtanh.f32 %v2305_v35  ;;  %2177 = vmatmul.bf16.gmra.mxu2 %v3697_v9 }
 0x486   :  { %v1521_v10 = vpop.f32.mrf.mxu0 }
 0x487   :  { %v1690_v26 = vpop.f32.mrf.mxu1  ;;  %2346 = vmatmul.bf16.gmra.mxu3 %v1890_v21  ;;  %v1522_v20 = vadd.f32 %v1521_v10, %v3641_v45 }
 0x488   :  { %v2138_v11 = vpop.f32.mrf.mxu2 }
 0x489   :  { %v2139_v36 = vadd.f32 %v3854_v51, %v2138_v11  ;;  %v1691_v8 = vadd.f32 %v1690_v26, %v1522_v20 }
 0x48a   :  { %v2307_v62 = vpop.f32.mrf.mxu3 }
 0x48b   :  { %v2926_v27 = vpop.eup %2925  ;;  %v2308_v49 = vadd.f32 %v2307_v62, %v2139_v36  ;;  %v1822_v6 = vmax.f32 %v1691_v8, 0.0 }
 0x48c   :  { %2470 = vst [vmem:[#allocation11 + $0x138] sm:$0xff] %v2926_v27 }
 0x48d   :  { %2927 = vtanh.f32 %v2308_v49 }
 0x48e   :  { %v1523_v53 = vpop.f32.mrf.mxu0 }
 0x48f   :  { %v1524_v50 = vadd.f32 %v1523_v53, %v3641_v45  ;;  %v1692_v47 = vpop.f32.mrf.mxu1 }
 0x490   :  { %v2140_v30 = vpop.f32.mrf.mxu2 }
 0x491   :  { %v1693_v9 = vadd.f32 %v1692_v47, %v1524_v50  ;;  %v2141_v57 = vadd.f32 %v3854_v51, %v2140_v30 }
 0x492   :  { %v2309_v24 = vpop.f32.mrf.mxu3 }
 0x493   :  { %v2928_v25 = vpop.eup %2927  ;;  %v1824_v3 = vmax.f32 %v1693_v9, 0.0  ;;  %v2310_v56 = vadd.f32 %v2309_v24, %v2141_v57 }
 0x494   :  { %2471 = vst [vmem:[#allocation11 + $0x140] sm:$0xff] %v2928_v25 }
 0x495   :  { %v1892_v18 = vpack.c.bf16 %v1824_v3, %v1822_v6  ;;  %2929 = vtanh.f32 %v2310_v56  ;;  %2182 = vmatmul.bf16.gmra.mxu2 %v3706_v40 }
 0x496   :  { %v1526_v59 = vpop.f32.mrf.mxu0 }
 0x497   :  { %v1695_v7 = vpop.f32.mrf.mxu1  ;;  %2351 = vmatmul.bf16.gmra.mxu3 %v1892_v18  ;;  %v1527_v5 = vadd.f32 %v1526_v59, %v3641_v45 }
 0x498   :  { %v2143_v43 = vpop.f32.mrf.mxu2 }
 0x499   :  { %v2144_v12 = vadd.f32 %v3854_v51, %v2143_v43  ;;  %v1696_v14 = vadd.f32 %v1695_v7, %v1527_v5 }
 0x49a   :  { %v2312_v13 = vpop.f32.mrf.mxu3 }
 0x49b   :  { %v2930_v58 = vpop.eup %2929  ;;  %v2313_v41 = vadd.f32 %v2312_v13, %v2144_v12  ;;  %v1826_v48 = vmax.f32 %v1696_v14, 0.0 }
 0x49c   :  { %2472 = vst [vmem:[#allocation11 + $0x148] sm:$0xff] %v2930_v58 }
 0x49d   :  { %2931 = vtanh.f32 %v2313_v41 }
 0x49e   :  { %v1528_v23 = vpop.f32.mrf.mxu0 }
 0x49f   :  { %v1529_v33 = vadd.f32 %v1528_v23, %v3641_v45  ;;  %v1697_v19 = vpop.f32.mrf.mxu1 }
 0x4a0   :  { %v2145_v54 = vpop.f32.mrf.mxu2 }
 0x4a1   :  { %v1698_v40 = vadd.f32 %v1697_v19, %v1529_v33  ;;  %v2146_v29 = vadd.f32 %v3854_v51, %v2145_v54 }
 0x4a2   :  { %v2314_v22 = vpop.f32.mrf.mxu3 }
 0x4a3   :  { %v2932_v15 = vpop.eup %2931  ;;  %v1828_v46 = vmax.f32 %v1698_v40, 0.0  ;;  %v2315_v28 = vadd.f32 %v2314_v22, %v2146_v29 }
 0x4a4   :  { %2473 = vst [vmem:[#allocation11 + $0x150] sm:$0xff] %v2932_v15 }
 0x4a5   :  { %v1894_v42 = vpack.c.bf16 %v1828_v46, %v1826_v48  ;;  %2933 = vtanh.f32 %v2315_v28  ;;  %2187 = vmatmul.bf16.gmra.mxu2 %v3715_v52 }
 0x4a6   :  { %v1531_v38 = vpop.f32.mrf.mxu0 }
 0x4a7   :  { %v1700_v39 = vpop.f32.mrf.mxu1  ;;  %2356 = vmatmul.bf16.gmra.mxu3 %v1894_v42  ;;  %v1532_v60 = vadd.f32 %v1531_v38, %v3641_v45 }
 0x4a8   :  { %v2148_v0 = vpop.f32.mrf.mxu2 }
 0x4a9   :  { %v2149_v1 = vadd.f32 %v3854_v51, %v2148_v0  ;;  %v1701_v32 = vadd.f32 %v1700_v39, %v1532_v60 }
 0x4aa   :  { %v2317_v16 = vpop.f32.mrf.mxu3 }
 0x4ab   :  { %v2934_v55 = vpop.eup %2933  ;;  %v2318_v31 = vadd.f32 %v2317_v16, %v2149_v1  ;;  %v1830_v35 = vmax.f32 %v1701_v32, 0.0 }
 0x4ac   :  { %2474 = vst [vmem:[#allocation11 + $0x158] sm:$0xff] %v2934_v55 }
 0x4ad   :  { %2935 = vtanh.f32 %v2318_v31 }
 0x4ae   :  { %v1533_v2 = vpop.f32.mrf.mxu0 }
 0x4af   :  { %v1534_v61 = vadd.f32 %v1533_v2, %v3641_v45  ;;  %v1702_v44 = vpop.f32.mrf.mxu1 }
 0x4b0   :  { %v2150_v17 = vpop.f32.mrf.mxu2 }
 0x4b1   :  { %v1703_v52 = vadd.f32 %v1702_v44, %v1534_v61  ;;  %v2151_v34 = vadd.f32 %v3854_v51, %v2150_v17 }
 0x4b2   :  { %v2319_v63 = vpop.f32.mrf.mxu3 }
 0x4b3   :  { %v2936_v4 = vpop.eup %2935  ;;  %v1832_v21 = vmax.f32 %v1703_v52, 0.0  ;;  %v2320_v10 = vadd.f32 %v2319_v63, %v2151_v34 }
 0x4b4   :  { %2475 = vst [vmem:[#allocation11 + $0x160] sm:$0xff] %v2936_v4 }
 0x4b5   :  { %v1896_v26 = vpack.c.bf16 %v1832_v21, %v1830_v35  ;;  %2937 = vtanh.f32 %v2320_v10  ;;  %2192 = vmatmul.bf16.gmra.mxu2 %v3729_v37 }
 0x4b7   :  { %2361 = vmatmul.bf16.gmra.mxu3 %v1896_v26 }
 0x4b8   :  { %v2153_v11 = vpop.f32.mrf.mxu2 }
 0x4b9   :  { %v2154_v36 = vadd.f32 %v3854_v51, %v2153_v11 }
 0x4ba   :  { %v2322_v45 = vpop.f32.mrf.mxu3 }
 0x4bb   :  { %v2938_v62 = vpop.eup %2937  ;;  %v2323_v27 = vadd.f32 %v2322_v45, %v2154_v36 }
 0x4bc   :  { %2476 = vst [vmem:[#allocation11 + $0x168] sm:$0xff] %v2938_v62 }
 0x4bd   :  { %2939 = vtanh.f32 %v2323_v27 }
 0x4c0   :  { %v2155_v20 = vpop.f32.mrf.mxu2 }
 0x4c1   :  { %v2156_v49 = vadd.f32 %v3854_v51, %v2155_v20 }
 0x4c2   :  { %v2324_v53 = vpop.f32.mrf.mxu3 }
 0x4c3   :  { %v2940_v8 = vpop.eup %2939  ;;  %v2325_v50 = vadd.f32 %v2324_v53, %v2156_v49 }
 0x4c4   :  { %2477 = vst [vmem:[#allocation11 + $0x170] sm:$0xff] %v2940_v8 }
 0x4c5   :  { %2941 = vtanh.f32 %v2325_v50 }
 0x4c8   :  { %v2158_v47 = vpop.f32.mrf.mxu2 }
 0x4c9   :  { %v2159_v37 = vadd.f32 %v3854_v51, %v2158_v47 }
 0x4ca   :  { %v2327_v30 = vpop.f32.mrf.mxu3 }
 0x4cb   :  { %v2942_v9 = vpop.eup %2941  ;;  %v2328_v57 = vadd.f32 %v2327_v30, %v2159_v37 }
 0x4cc   :  { %2478 = vst [vmem:[#allocation11 + $0x178] sm:$0xff] %v2942_v9 }
 0x4cd   :  { %2943 = vtanh.f32 %v2328_v57 }
 0x4d0   :  { %v2160_v24 = vpop.f32.mrf.mxu2 }
 0x4d1   :  { %v2161_v25 = vadd.f32 %v3854_v51, %v2160_v24 }
 0x4d2   :  { %v2329_v6 = vpop.f32.mrf.mxu3 }
 0x4d3   :  { %v2944_v3 = vpop.eup %2943  ;;  %v2330_v56 = vadd.f32 %v2329_v6, %v2161_v25 }
 0x4d4   :  { %2479 = vst [vmem:[#allocation11 + $0x180] sm:$0xff] %v2944_v3 }
 0x4d5   :  { %2945 = vtanh.f32 %v2330_v56 }
 0x4d8   :  { %v2163_v18 = vpop.f32.mrf.mxu2 }
 0x4d9   :  { %v2164_v59 = vadd.f32 %v3854_v51, %v2163_v18 }
 0x4da   :  { %v2332_v7 = vpop.f32.mrf.mxu3 }
 0x4db   :  { %v2946_v43 = vpop.eup %2945  ;;  %v2333_v12 = vadd.f32 %v2332_v7, %v2164_v59 }
 0x4dc   :  { %2480 = vst [vmem:[#allocation11 + $0x188] sm:$0xff] %v2946_v43 }
 0x4dd   :  { %2947 = vtanh.f32 %v2333_v12 }
 0x4e0   :  { %v2165_v13 = vpop.f32.mrf.mxu2 }
 0x4e1   :  { %v2166_v58 = vadd.f32 %v3854_v51, %v2165_v13 }
 0x4e2   :  { %v2334_v5 = vpop.f32.mrf.mxu3 }
 0x4e3   :  { %v2948_v41 = vpop.eup %2947  ;;  %v2335_v23 = vadd.f32 %v2334_v5, %v2166_v58 }
 0x4e4   :  { %2481 = vst [vmem:[#allocation11 + $0x190] sm:$0xff] %v2948_v41 }
 0x4e5   :  { %2949 = vtanh.f32 %v2335_v23 }
 0x4e8   :  { %v2168_v14 = vpop.f32.mrf.mxu2 }
 0x4e9   :  { %v2169_v33 = vadd.f32 %v3854_v51, %v2168_v14 }
 0x4ea   :  { %v2337_v19 = vpop.f32.mrf.mxu3 }
 0x4eb   :  { %v2950_v54 = vpop.eup %2949  ;;  %v2338_v40 = vadd.f32 %v2337_v19, %v2169_v33 }
 0x4ec   :  { %2482 = vst [vmem:[#allocation11 + $0x198] sm:$0xff] %v2950_v54 }
 0x4ed   :  { %2951 = vtanh.f32 %v2338_v40 }
 0x4f0   :  { %v2170_v29 = vpop.f32.mrf.mxu2 }
 0x4f1   :  { %v2171_v22 = vadd.f32 %v3854_v51, %v2170_v29 }
 0x4f2   :  { %v2339_v15 = vpop.f32.mrf.mxu3 }
 0x4f3   :  { %v2952_v48 = vpop.eup %2951  ;;  %v2340_v46 = vadd.f32 %v2339_v15, %v2171_v22 }
 0x4f4   :  { %2483 = vst [vmem:[#allocation11 + $0x1a0] sm:$0xff] %v2952_v48 }
 0x4f5   :  { %2953 = vtanh.f32 %v2340_v46 }
 0x4f8   :  { %v2173_v28 = vpop.f32.mrf.mxu2 }
 0x4f9   :  { %v2174_v42 = vadd.f32 %v3854_v51, %v2173_v28 }
 0x4fa   :  { %v2342_v38 = vpop.f32.mrf.mxu3 }
 0x4fb   :  { %v2954_v39 = vpop.eup %2953  ;;  %v2343_v0 = vadd.f32 %v2342_v38, %v2174_v42 }
 0x4fc   :  { %2484 = vst [vmem:[#allocation11 + $0x1a8] sm:$0xff] %v2954_v39 }
 0x4fd   :  { %2955 = vtanh.f32 %v2343_v0 }
 0x500   :  { %v2175_v1 = vpop.f32.mrf.mxu2 }
 0x501   :  { %v2176_v16 = vadd.f32 %v3854_v51, %v2175_v1 }
 0x502   :  { %v2344_v55 = vpop.f32.mrf.mxu3 }
 0x503   :  { %v2956_v60 = vpop.eup %2955  ;;  %v2345_v31 = vadd.f32 %v2344_v55, %v2176_v16 }
 0x504   :  { %2485 = vst [vmem:[#allocation11 + $0x1b0] sm:$0xff] %v2956_v60 }
 0x505   :  { %2957 = vtanh.f32 %v2345_v31 }
 0x508   :  { %v2178_v2 = vpop.f32.mrf.mxu2 }
 0x509   :  { %v2179_v32 = vadd.f32 %v3854_v51, %v2178_v2 }
 0x50a   :  { %v2347_v61 = vpop.f32.mrf.mxu3 }
 0x50b   :  { %v2958_v44 = vpop.eup %2957  ;;  %v2348_v17 = vadd.f32 %v2347_v61, %v2179_v32 }
 0x50c   :  { %2486 = vst [vmem:[#allocation11 + $0x1b8] sm:$0xff] %v2958_v44 }
 0x50d   :  { %2959 = vtanh.f32 %v2348_v17 }
 0x510   :  { %v2180_v52 = vpop.f32.mrf.mxu2 }
 0x511   :  { %v2181_v34 = vadd.f32 %v3854_v51, %v2180_v52 }
 0x512   :  { %v2349_v63 = vpop.f32.mrf.mxu3 }
 0x513   :  { %v2960_v4 = vpop.eup %2959  ;;  %v2350_v35 = vadd.f32 %v2349_v63, %v2181_v34 }
 0x514   :  { %2487 = vst [vmem:[#allocation11 + $0x1c0] sm:$0xff] %v2960_v4 }
 0x515   :  { %2961 = vtanh.f32 %v2350_v35 }
 0x518   :  { %v2183_v21 = vpop.f32.mrf.mxu2 }
 0x519   :  { %v2184_v10 = vadd.f32 %v3854_v51, %v2183_v21 }
 0x51a   :  { %v2352_v26 = vpop.f32.mrf.mxu3 }
 0x51b   :  { %v2962_v11 = vpop.eup %2961  ;;  %v2353_v36 = vadd.f32 %v2352_v26, %v2184_v10 }
 0x51c   :  { %2488 = vst [vmem:[#allocation11 + $0x1c8] sm:$0xff] %v2962_v11 }
 0x51d   :  { %2963 = vtanh.f32 %v2353_v36 }
 0x520   :  { %v2185_v45 = vpop.f32.mrf.mxu2 }
 0x521   :  { %v2186_v62 = vadd.f32 %v3854_v51, %v2185_v45 }
 0x522   :  { %v2354_v27 = vpop.f32.mrf.mxu3 }
 0x523   :  { %v2964_v20 = vpop.eup %2963  ;;  %v2355_v49 = vadd.f32 %v2354_v27, %v2186_v62 }
 0x524   :  { %2489 = vst [vmem:[#allocation11 + $0x1d0] sm:$0xff] %v2964_v20 }
 0x525   :  { %2965 = vtanh.f32 %v2355_v49 }
 0x528   :  { %v2188_v53 = vpop.f32.mrf.mxu2 }
 0x529   :  { %v2189_v8 = vadd.f32 %v3854_v51, %v2188_v53 }
 0x52a   :  { %v2357_v50 = vpop.f32.mrf.mxu3 }
 0x52b   :  { %v2966_v47 = vpop.eup %2965  ;;  %v2358_v37 = vadd.f32 %v2357_v50, %v2189_v8 }
 0x52c   :  { %2490 = vst [vmem:[#allocation11 + $0x1d8] sm:$0xff] %v2966_v47 }
 0x52d   :  { %2967 = vtanh.f32 %v2358_v37 }
 0x530   :  { %v2190_v30 = vpop.f32.mrf.mxu2 }
 0x531   :  { %v2191_v9 = vadd.f32 %v3854_v51, %v2190_v30 }
 0x532   :  { %v2359_v57 = vpop.f32.mrf.mxu3 }
 0x533   :  { %v2968_v24 = vpop.eup %2967  ;;  %v2360_v25 = vadd.f32 %v2359_v57, %v2191_v9 }
 0x534   :  { %2491 = vst [vmem:[#allocation11 + $0x1e0] sm:$0xff] %v2968_v24 }
 0x535   :  { %2969 = vtanh.f32 %v2360_v25 }
 0x538   :  { %v2193_v6 = vpop.f32.mrf.mxu2 }
 0x539   :  { %v2194_v3 = vadd.f32 %v3854_v51, %v2193_v6 }
 0x53a   :  { %v2362_v56 = vpop.f32.mrf.mxu3 }
 0x53b   :  { %v2970_v18 = vpop.eup %2969  ;;  %v2363_v59 = vadd.f32 %v2362_v56, %v2194_v3 }
 0x53c   :  { %2492 = vst [vmem:[#allocation11 + $0x1e8] sm:$0xff] %v2970_v18 }
 0x53d   :  { %2971 = vtanh.f32 %v2363_v59 }
 0x540   :  { %v2195_v7 = vpop.f32.mrf.mxu2 }
 0x541   :  { %v2196_v43 = vadd.f32 %v3854_v51, %v2195_v7 }
 0x542   :  { %v2364_v12 = vpop.f32.mrf.mxu3 }
 0x543   :  { %v2972_v13 = vpop.eup %2971  ;;  %v2365_v58 = vadd.f32 %v2364_v12, %v2196_v43 }
 0x544   :  { %2493 = vst [vmem:[#allocation11 + $0x1f0] sm:$0xff] %v2972_v13 }
 0x545   :  { %2973 = vtanh.f32 %v2365_v58 }
 0x54b   :  { %v2974_v5 = vpop.eup %2973 }
 0x54c   :  { %2494 = vst [vmem:[#allocation11 + $0x1f8] sm:$0xff] %v2974_v5 }
 0x54d   :  { %2507 = dma.vmem_to_hbm [thread:$0]  %s2500_s11, 8192, %s2502_s14, [#allocation4], %s3130_s9, %s3130_s9, %s3131_s10  }
 0x54e   :  { %3127 = dma.done.wait [#allocation4], 8192  }
 0x54f   :  { %3128 = vsyncadd [#allocation4], 4294959104 }
 0x550   :  { %2512 = vsyncpa [#allocation3], 1 }
 0x551   :  { %2513 = vsyncpa [#allocation6], 1 }
 0x552   :  { %2514 = vsyncpa [#allocation9], 1 }
 0x553   :  { %2515 = vsyncpa [#allocation4], 1 }

</bundles_post_ra>
